<compile_context>
chip_gen: v5e
topology: v5e:2x2
jax: 0.10.0
libtpu: 0.0.40
codegen_flags: <defaults>
</compile_context>

<pallas_src>
import functools

import numpy as np
import jax
import jax.numpy as jnp
from jax.experimental import pallas as pl
from jax.experimental.pallas import tpu as pltpu


def _sigmoid(x):
    # approx reciprocal -> single EUP op; precision loss acceptable (review item).
    return pl.reciprocal(1.0 + jnp.exp(-x), approx=True)


def _silu(x):
    return x * _sigmoid(x)


def _make_masks(H, W):
    """(10, 1, H*W) f32 constants.

    rows 0..8 : validity of the 9 zero-padded 3x3 taps (row-major over ky, kx),
    row  9    : 1.0 where w == 0 (fix-up column for the circular grad_x shift).
    Rows 3/5/1/7 double as the left/right/up/down boundary masks of the separable box.
    """
    pos = np.arange(H * W)
    hh, ww = pos // W, pos % W
    rows = []
    for ky in range(3):
        for kx in range(3):
            ok = ((hh + ky - 1 >= 0) & (hh + ky - 1 < H) &
                  (ww + kx - 1 >= 0) & (ww + kx - 1 < W))
            rows.append(ok.astype(np.float32))
    rows.append((ww == 0).astype(np.float32))
    return jnp.asarray(np.stack(rows)[:, None, :])


# --------------------------------------------------------------------------- fused kernel

def _fused_kernel(*refs, H, W, C, G, depth, has_group_mats):
    if has_group_mats:
        (x_ref, masks_ref, convw_ref, gnp_ref, a_ref, at_ref,
         hw1_ref, haux_ref, refl_ref, corr_ref, coh_ref) = refs
    else:
        (x_ref, masks_ref, convw_ref, gnp_ref,
         hw1_ref, haux_ref, refl_ref, corr_ref, coh_ref) = refs
        a_ref = at_ref = None

    HW = H * W
    x = x_ref[0]                                             # (C, HW) channel-major, lane-dense

    # static flat-roll amounts for the 9 conv taps; tap offset = (ky-1)*W + (kx-1)
    tap_shifts = [(-((ky - 1) * W + (kx - 1))) % HW for ky in range(3) for kx in range(3)]

    def conv3x3(v, k):
        """3x3 conv (zero pad) as 9 accumulated MXU dots: W_t (C,C) @ masked roll_t(v)."""
        acc = None
        for t in range(9):
            s = tap_shifts[t]
            r = v if s == 0 else pltpu.roll(v, s, 1)
            d = jnp.dot(convw_ref[k, t], masks_ref[t] * r,
                        preferred_element_type=jnp.float32)
            acc = d if acc is None else acc + d
        return acc

    def group_norm(v, gamma, beta):
        # Two-pass centered variance (always >= 0, no cancellation), eps = 1e-5.
        if G == C:                                           # per-channel (default C>=8 path)
            mean = jnp.mean(v, axis=1, keepdims=True)        # (C, 1)
            var = jnp.mean((v - mean) ** 2, axis=1, keepdims=True)
        elif G == 1:                                         # single group over everything
            mean = jnp.mean(v)
            var = jnp.mean((v - mean) ** 2)
        else:                                                # grouped: one-hot group matmuls
            n = float((C // G) * HW)
            gsum = jnp.dot(at_ref[...], jnp.sum(v, axis=1, keepdims=True),
                           preferred_element_type=jnp.float32)           # (G, 1)
            mean = jnp.dot(a_ref[...], gsum, preferred_element_type=jnp.float32) / n
            d = v - mean
            gvar = jnp.dot(at_ref[...], jnp.sum(d * d, axis=1, keepdims=True),
                           preferred_element_type=jnp.float32) / n
            var = jnp.dot(a_ref[...], gvar, preferred_element_type=jnp.float32)
        y = (v - mean) * jax.lax.rsqrt(var + 1e-5)
        return y * gamma + beta

    def conv_gn_silu(v, k):
        pre = conv3x3(v, k) + gnp_ref[k, 0]                  # bias (C, 1)
        return _silu(group_norm(pre, gnp_ref[k, 1], gnp_ref[k, 2]))

    # boundary masks for the separable box filter (reused 3x3 tap masks)
    m_left, m_right = masks_ref[3], masks_ref[5]             # w > 0 , w < W-1
    m_up, m_down = masks_ref[1], masks_ref[7]                # h > 0 , h < H-1
    wz = masks_ref[9]                                        # 1.0 where w == 0

    def box9(v, r1=None):
        """Depthwise 3x3 box mean, zero pad, separable (4 rolls instead of 8)."""
        r1 = pltpu.roll(v, 1, 1) if r1 is None else r1
        hs = m_left * r1 + v + m_right * pltpu.roll(v, HW - 1, 1)
        vs = m_up * pltpu.roll(hs, W, 1) + hs + m_down * pltpu.roll(hs, HW - W, 1)
        return vs * (1.0 / 9.0)

    # ---------------- reflection layers (residual blocks), activations stay resident
    feats = x
    for l in range(depth):
        h = conv_gn_silu(feats, 2 * l)
        h = conv_gn_silu(h, 2 * l + 1)
        feats = h + feats

    # ---------------- semantic coherence: local variance under a 3x3 box filter
    r1_feats = pltpu.roll(feats, 1, 1)                       # reused by box9 AND grad_x
    lm = box9(feats, r1_feats)
    lv = box9((feats - lm) ** 2)
    sem = pl.reciprocal(1.0 + jnp.mean(lv, axis=0, keepdims=True), approx=True)   # (1, HW)

    # ---------------- structural coherence: circular backward diffs, channel std (ddof=1)
    prev_x = wz * pltpu.roll(feats, (1 - W) % HW, 1) + (1.0 - wz) * r1_feats
    gx = feats - prev_x
    gy = feats - pltpu.roll(feats, W, 1)      # flat roll by W == circular shift along H
    gm = jnp.sqrt(gx * gx + gy * gy)
    mu = jnp.mean(gm, axis=0, keepdims=True)
    ddof = C - 1 if C > 1 else 1              # guard C==1 (torch.std would give NaN)
    var_c = jnp.sum((gm - mu) ** 2, axis=0, keepdims=True) * (1.0 / ddof)
    struct = pl.reciprocal(1.0 + jnp.sqrt(var_c), approx=True)                    # (1, HW)

    # ---------------- overall coherence head: 1x1 conv -> SiLU -> 1x1 conv -> sigmoid
    haux = haux_ref[...]                                     # (Ch, 3): [b1 | w2 | b2@row0]
    b1 = haux[:, 0:1]
    w2 = haux[:, 1:2]
    b2 = haux[0:1, 2:3]
    hmid = _silu(jnp.dot(hw1_ref[...], feats, preferred_element_type=jnp.float32) + b1)
    overall = _sigmoid(jnp.sum(hmid * w2, axis=0, keepdims=True) + b2)            # (1, HW)

    mean_coh = (sem + struct + overall) * (1.0 / 3.0)

    # ---------------- correction head, weighted by (1 - mean_coherence)
    chid = conv_gn_silu(feats, 2 * depth)
    corr = (conv3x3(chid, 2 * depth + 1) + gnp_ref[2 * depth + 1, 0]) * (1.0 - mean_coh)

    refl_ref[0] = feats
    corr_ref[0] = corr
    coh_ref[0] = jnp.concatenate([sem, struct, overall, mean_coh], axis=0)        # (4, HW)


# --------------------------------------------------------------------------- params & wrapper

def init_params(key, feature_dim, reflection_depth=3):
    C = feature_dim
    G = min(8, C) if C >= 8 else 1
    n_conv = 2 * reflection_depth + 2            # 6 reflection convs + 2 correction-head convs
    kit = iter(jax.random.split(key, 4 * n_conv + 8))

    conv_w, gn_pack = [], []
    for k in range(n_conv):
        # (tap, Cout, Cin); tap index = ky*3 + kx (matches kernel's tap order)
        w = 0.1 * jax.random.normal(next(kit), (9, C, C), jnp.float32)
        conv_w.append(w)
        b = 0.05 * jax.random.normal(next(kit), (C,), jnp.float32)
        if k < n_conv - 1:                       # conv followed by GroupNorm (+ SiLU)
            gamma = 1.0 + 0.05 * jax.random.normal(next(kit), (C,), jnp.float32)
            beta = 0.05 * jax.random.normal(next(kit), (C,), jnp.float32)
        else:                                    # final correction conv: bias only
            gamma = jnp.ones((C,), jnp.float32)
            beta = jnp.zeros((C,), jnp.float32)
        gn_pack.append(jnp.stack([b, gamma, beta], axis=0)[..., None])            # (3, C, 1)

    Ch = C // 2
    head_w1 = 0.1 * jax.random.normal(next(kit), (Ch, C), jnp.float32)
    head_b1 = 0.05 * jax.random.normal(next(kit), (Ch,), jnp.float32)
    head_w2 = 0.1 * jax.random.normal(next(kit), (Ch,), jnp.float32)
    head_b2 = 0.05 * jax.random.normal(next(kit), (), jnp.float32)
    b2_col = jnp.zeros((Ch,), jnp.float32).at[0].set(head_b2)
    head_aux = jnp.stack([head_b1, head_w2, b2_col], axis=1)                      # (Ch, 3)

    cs = C // G
    a = (jnp.arange(C)[:, None] // cs == jnp.arange(G)[None, :]).astype(jnp.float32)

    return dict(
        conv_w=jnp.stack(conv_w, axis=0),        # (n_conv, 9, C, C)
        gnp=jnp.stack(gn_pack, axis=0),          # (n_conv, 3, C, 1)   [bias, gamma, beta]
        head_w1=head_w1,                         # (Ch, C)
        head_aux=head_aux,                       # (Ch, 3)
        group_a=a,                               # (C, G) one-hot channel->group
        group_at=a.T,                            # (G, C)
        num_groups=G, depth=reflection_depth,
    )


def self_reflection_forward(params, features_nchw):
    B, C, H, W = features_nchw.shape
    HW = H * W
    G = int(params["num_groups"])
    depth = int(params["depth"])
    n_conv = 2 * depth + 2
    Ch = params["head_w1"].shape[0]
    has_group_mats = (G != C) and (G != 1)       # default feature_dim=8 path: False

    x = features_nchw.reshape(B, C, HW).astype(jnp.float32)     # channel-major, lane-dense
    masks = _make_masks(H, W)                                   # (10, 1, HW) constants

    kernel = functools.partial(_fused_kernel, H=H, W=W, C=C, G=G, depth=depth,
                               has_group_mats=has_group_mats)

    def fixed(rank):
        return lambda i, _r=rank: (0,) * _r

    per_img3 = lambda i: (i, 0, 0)

    in_specs = [
        pl.BlockSpec((1, C, HW), per_img3),                  # x
        pl.BlockSpec((10, 1, HW), fixed(3)),                 # tap / boundary / fix-up masks
        pl.BlockSpec((n_conv, 9, C, C), fixed(4)),           # per-tap conv weights
        pl.BlockSpec((n_conv, 3, C, 1), fixed(4)),           # [bias, gamma, beta]
    ]
    inputs = [x, masks, params["conv_w"], params["gnp"]]
    if has_group_mats:                                       # only shipped when actually read
        in_specs += [pl.BlockSpec((C, G), fixed(2)), pl.BlockSpec((G, C), fixed(2))]
        inputs += [params["group_a"], params["group_at"]]
    in_specs += [pl.BlockSpec((Ch, C), fixed(2)),            # coherence head 1x1 weights
                 pl.BlockSpec((Ch, 3), fixed(2))]            # packed [b1, w2, b2]
    inputs += [params["head_w1"], params["head_aux"]]

    outs = pl.pallas_call(
        kernel,
        out_shape=(
            jax.ShapeDtypeStruct((B, C, HW), jnp.float32),   # reflected features
            jax.ShapeDtypeStruct((B, C, HW), jnp.float32),   # corrections
            jax.ShapeDtypeStruct((B, 4, HW), jnp.float32),   # packed coherence maps
        ),
        grid=(B,),
        in_specs=in_specs,
        out_specs=(
            pl.BlockSpec((1, C, HW), per_img3),
            pl.BlockSpec((1, C, HW), per_img3),
            pl.BlockSpec((1, 4, HW), per_img3),
        ),
        compiler_params=pltpu.CompilerParams(
            dimension_semantics=("parallel",),               # B>=2 -> both v7x TCs busy
            vmem_limit_bytes=32 * 1024 * 1024,               # lift v5e's 16 MiB scoped default
        ),
    )(*inputs)

    refl, corr, coh = outs
    coh = coh.reshape(B, 4, H, W)
    return {
        "reflected_features": refl.reshape(B, C, H, W),
        "coherence_analysis": {
            "semantic_coherence": coh[:, 0:1],
            "structural_coherence": coh[:, 1:2],
            "overall_coherence": coh[:, 2:3],
            "mean_coherence": coh[:, 3:4],
        },
        "corrections": corr.reshape(B, C, H, W),
        "original_features": features_nchw,
    }


if __name__ == "__main__":
    key = jax.random.PRNGKey(0)
    pkey, xkey = jax.random.split(key)

    B, C, H, W = 2, 8, 16, 16                  # feature_dim=8 -> num_groups=8; H*W = 256 lanes
    params = init_params(pkey, feature_dim=C, reflection_depth=3)
    x = jax.random.normal(xkey, (B, C, H, W), jnp.float32)

    fwd = jax.jit(functools.partial(self_reflection_forward, params))
    out = fwd(x)
    jax.block_until_ready(out)

    assert out["reflected_features"].shape == (B, C, H, W)
    assert out["corrections"].shape == (B, C, H, W)
    assert out["coherence_analysis"]["semantic_coherence"].shape == (B, 1, H, W)
    assert out["coherence_analysis"]["structural_coherence"].shape == (B, 1, H, W)
    assert out["coherence_analysis"]["overall_coherence"].shape == (B, 1, H, W)
    assert out["coherence_analysis"]["mean_coherence"].shape == (B, 1, H, W)
    assert bool(jnp.all(jnp.isfinite(out["reflected_features"])))
    assert bool(jnp.all(jnp.isfinite(out["corrections"])))
    assert bool(jnp.all(jnp.isfinite(out["coherence_analysis"]["mean_coherence"])))
    print("KERNEL_OK")
</pallas_src>

<mosaic_0001>
module attributes {stable_mosaic.version = 11 : i64} {
  func.func @_fused_kernel(%arg0: i32, %arg1: memref<1x8x256xf32, #tpu.memory_space<vmem>>, %arg2: memref<10x1x256xf32, #tpu.memory_space<vmem>>, %arg3: memref<8x9x8x8xf32, #tpu.memory_space<vmem>>, %arg4: memref<8x3x8x1xf32, #tpu.memory_space<vmem>>, %arg5: memref<4x8xf32, #tpu.memory_space<vmem>>, %arg6: memref<4x3xf32, #tpu.memory_space<vmem>>, %arg7: memref<1x8x256xf32, #tpu.memory_space<vmem>>, %arg8: memref<1x8x256xf32, #tpu.memory_space<vmem>>, %arg9: memref<1x4x256xf32, #tpu.memory_space<vmem>>) attributes {dimension_semantics = [#tpu.dimension_semantics<parallel>], iteration_bounds = array<i64: 2>, scalar_prefetch = 0 : i64, scratch_operands = 0 : i64, tpu.core_type = #tpu.core_type<tc>, window_params = [{transform_indices = @transform_0, window_bounds = array<i64: 1, 8, 256>}, {pipeline_mode = #tpu.pipeline_mode<synchronous>, transform_indices = @transform_1, window_bounds = array<i64: 10, 1, 256>}, {pipeline_mode = #tpu.pipeline_mode<synchronous>, transform_indices = @transform_2, window_bounds = array<i64: 8, 9, 8, 8>}, {pipeline_mode = #tpu.pipeline_mode<synchronous>, transform_indices = @transform_3, window_bounds = array<i64: 8, 3, 8, 1>}, {pipeline_mode = #tpu.pipeline_mode<synchronous>, transform_indices = @transform_4, window_bounds = array<i64: 4, 8>}, {pipeline_mode = #tpu.pipeline_mode<synchronous>, transform_indices = @transform_5, window_bounds = array<i64: 4, 3>}, {transform_indices = @transform_6, window_bounds = array<i64: 1, 8, 256>}, {transform_indices = @transform_7, window_bounds = array<i64: 1, 8, 256>}, {transform_indices = @transform_8, window_bounds = array<i64: 1, 4, 256>}]} {
    %c0 = arith.constant 0 : index
    %c0_0 = arith.constant 0 : index
    %c0_1 = arith.constant 0 : index
    %0 = vector.load %arg1[%c0, %c0_0, %c0_1] : memref<1x8x256xf32, #tpu.memory_space<vmem>>, vector<1x8x256xf32>
    %1 = vector.shape_cast %0 : vector<1x8x256xf32> to vector<8x256xf32>
    %c3 = arith.constant 3 : index
    %c0_2 = arith.constant 0 : index
    %c0_3 = arith.constant 0 : index
    %2 = vector.load %arg2[%c3, %c0_2, %c0_3] : memref<10x1x256xf32, #tpu.memory_space<vmem>>, vector<1x1x256xf32>
    %3 = vector.shape_cast %2 : vector<1x1x256xf32> to vector<1x256xf32>
    %c5 = arith.constant 5 : index
    %c0_4 = arith.constant 0 : index
    %c0_5 = arith.constant 0 : index
    %4 = vector.load %arg2[%c5, %c0_4, %c0_5] : memref<10x1x256xf32, #tpu.memory_space<vmem>>, vector<1x1x256xf32>
    %5 = vector.shape_cast %4 : vector<1x1x256xf32> to vector<1x256xf32>
    %c1 = arith.constant 1 : index
    %c0_6 = arith.constant 0 : index
    %c0_7 = arith.constant 0 : index
    %6 = vector.load %arg2[%c1, %c0_6, %c0_7] : memref<10x1x256xf32, #tpu.memory_space<vmem>>, vector<1x1x256xf32>
    %7 = vector.shape_cast %6 : vector<1x1x256xf32> to vector<1x256xf32>
    %c7 = arith.constant 7 : index
    %c0_8 = arith.constant 0 : index
    %c0_9 = arith.constant 0 : index
    %8 = vector.load %arg2[%c7, %c0_8, %c0_9] : memref<10x1x256xf32, #tpu.memory_space<vmem>>, vector<1x1x256xf32>
    %9 = vector.shape_cast %8 : vector<1x1x256xf32> to vector<1x256xf32>
    %c9 = arith.constant 9 : index
    %c0_10 = arith.constant 0 : index
    %c0_11 = arith.constant 0 : index
    %10 = vector.load %arg2[%c9, %c0_10, %c0_11] : memref<10x1x256xf32, #tpu.memory_space<vmem>>, vector<1x1x256xf32>
    %11 = vector.shape_cast %10 : vector<1x1x256xf32> to vector<1x256xf32>
    %c17_i32 = arith.constant 17 : i32
    %12 = tpu.dynamic_rotate %1 by %c17_i32 dim 1 : vector<8x256xf32>, i32 -> vector<8x256xf32>
    %c0_12 = arith.constant 0 : index
    %c0_13 = arith.constant 0 : index
    %c0_14 = arith.constant 0 : index
    %c0_15 = arith.constant 0 : index
    %13 = vector.load %arg3[%c0_12, %c0_13, %c0_14, %c0_15] : memref<8x9x8x8xf32, #tpu.memory_space<vmem>>, vector<1x1x8x8xf32>
    %14 = vector.shape_cast %13 : vector<1x1x8x8xf32> to vector<8x8xf32>
    %c0_16 = arith.constant 0 : index
    %c0_17 = arith.constant 0 : index
    %c0_18 = arith.constant 0 : index
    %15 = vector.load %arg2[%c0_16, %c0_17, %c0_18] : memref<10x1x256xf32, #tpu.memory_space<vmem>>, vector<1x1x256xf32>
    %16 = vector.shape_cast %15 : vector<1x1x256xf32> to vector<1x256xf32>
    %17 = vector.broadcast %16 : vector<1x256xf32> to vector<8x256xf32>
    %18 = arith.mulf %17, %12 : vector<8x256xf32>
    %cst = arith.constant dense<0.000000e+00> : vector<8x256xf32>
    %19 = tpu.matmul %14, %18, %cst {dimension_numbers = #tpu.dot_dimension_numbers<[1], [0], [0], [1], [0, 0, 1, 1], [], []>} : vector<8x8xf32>, vector<8x256xf32>, vector<8x256xf32> -> vector<8x256xf32>
    %c16_i32 = arith.constant 16 : i32
    %20 = tpu.dynamic_rotate %1 by %c16_i32 dim 1 : vector<8x256xf32>, i32 -> vector<8x256xf32>
    %c0_19 = arith.constant 0 : index
    %c1_20 = arith.constant 1 : index
    %c0_21 = arith.constant 0 : index
    %c0_22 = arith.constant 0 : index
    %21 = vector.load %arg3[%c0_19, %c1_20, %c0_21, %c0_22] : memref<8x9x8x8xf32, #tpu.memory_space<vmem>>, vector<1x1x8x8xf32>
    %22 = vector.shape_cast %21 : vector<1x1x8x8xf32> to vector<8x8xf32>
    %c1_23 = arith.constant 1 : index
    %c0_24 = arith.constant 0 : index
    %c0_25 = arith.constant 0 : index
    %23 = vector.load %arg2[%c1_23, %c0_24, %c0_25] : memref<10x1x256xf32, #tpu.memory_space<vmem>>, vector<1x1x256xf32>
    %24 = vector.shape_cast %23 : vector<1x1x256xf32> to vector<1x256xf32>
    %25 = vector.broadcast %24 : vector<1x256xf32> to vector<8x256xf32>
    %26 = arith.mulf %25, %20 : vector<8x256xf32>
    %cst_26 = arith.constant dense<0.000000e+00> : vector<8x256xf32>
    %27 = tpu.matmul %22, %26, %cst_26 {dimension_numbers = #tpu.dot_dimension_numbers<[1], [0], [0], [1], [0, 0, 1, 1], [], []>} : vector<8x8xf32>, vector<8x256xf32>, vector<8x256xf32> -> vector<8x256xf32>
    %28 = arith.addf %19, %27 : vector<8x256xf32>
    %c15_i32 = arith.constant 15 : i32
    %29 = tpu.dynamic_rotate %1 by %c15_i32 dim 1 : vector<8x256xf32>, i32 -> vector<8x256xf32>
    %c0_27 = arith.constant 0 : index
    %c2 = arith.constant 2 : index
    %c0_28 = arith.constant 0 : index
    %c0_29 = arith.constant 0 : index
    %30 = vector.load %arg3[%c0_27, %c2, %c0_28, %c0_29] : memref<8x9x8x8xf32, #tpu.memory_space<vmem>>, vector<1x1x8x8xf32>
    %31 = vector.shape_cast %30 : vector<1x1x8x8xf32> to vector<8x8xf32>
    %c2_30 = arith.constant 2 : index
    %c0_31 = arith.constant 0 : index
    %c0_32 = arith.constant 0 : index
    %32 = vector.load %arg2[%c2_30, %c0_31, %c0_32] : memref<10x1x256xf32, #tpu.memory_space<vmem>>, vector<1x1x256xf32>
    %33 = vector.shape_cast %32 : vector<1x1x256xf32> to vector<1x256xf32>
    %34 = vector.broadcast %33 : vector<1x256xf32> to vector<8x256xf32>
    %35 = arith.mulf %34, %29 : vector<8x256xf32>
    %cst_33 = arith.constant dense<0.000000e+00> : vector<8x256xf32>
    %36 = tpu.matmul %31, %35, %cst_33 {dimension_numbers = #tpu.dot_dimension_numbers<[1], [0], [0], [1], [0, 0, 1, 1], [], []>} : vector<8x8xf32>, vector<8x256xf32>, vector<8x256xf32> -> vector<8x256xf32>
    %37 = arith.addf %28, %36 : vector<8x256xf32>
    %c1_i32 = arith.constant 1 : i32
    %38 = tpu.dynamic_rotate %1 by %c1_i32 dim 1 : vector<8x256xf32>, i32 -> vector<8x256xf32>
    %c0_34 = arith.constant 0 : index
    %c3_35 = arith.constant 3 : index
    %c0_36 = arith.constant 0 : index
    %c0_37 = arith.constant 0 : index
    %39 = vector.load %arg3[%c0_34, %c3_35, %c0_36, %c0_37] : memref<8x9x8x8xf32, #tpu.memory_space<vmem>>, vector<1x1x8x8xf32>
    %40 = vector.shape_cast %39 : vector<1x1x8x8xf32> to vector<8x8xf32>
    %c3_38 = arith.constant 3 : index
    %c0_39 = arith.constant 0 : index
    %c0_40 = arith.constant 0 : index
    %41 = vector.load %arg2[%c3_38, %c0_39, %c0_40] : memref<10x1x256xf32, #tpu.memory_space<vmem>>, vector<1x1x256xf32>
    %42 = vector.shape_cast %41 : vector<1x1x256xf32> to vector<1x256xf32>
    %43 = vector.broadcast %42 : vector<1x256xf32> to vector<8x256xf32>
    %44 = arith.mulf %43, %38 : vector<8x256xf32>
    %cst_41 = arith.constant dense<0.000000e+00> : vector<8x256xf32>
    %45 = tpu.matmul %40, %44, %cst_41 {dimension_numbers = #tpu.dot_dimension_numbers<[1], [0], [0], [1], [0, 0, 1, 1], [], []>} : vector<8x8xf32>, vector<8x256xf32>, vector<8x256xf32> -> vector<8x256xf32>
    %46 = arith.addf %37, %45 : vector<8x256xf32>
    %c0_42 = arith.constant 0 : index
    %c4 = arith.constant 4 : index
    %c0_43 = arith.constant 0 : index
    %c0_44 = arith.constant 0 : index
    %47 = vector.load %arg3[%c0_42, %c4, %c0_43, %c0_44] : memref<8x9x8x8xf32, #tpu.memory_space<vmem>>, vector<1x1x8x8xf32>
    %48 = vector.shape_cast %47 : vector<1x1x8x8xf32> to vector<8x8xf32>
    %c4_45 = arith.constant 4 : index
    %c0_46 = arith.constant 0 : index
    %c0_47 = arith.constant 0 : index
    %49 = vector.load %arg2[%c4_45, %c0_46, %c0_47] : memref<10x1x256xf32, #tpu.memory_space<vmem>>, vector<1x1x256xf32>
    %50 = vector.shape_cast %49 : vector<1x1x256xf32> to vector<1x256xf32>
    %51 = vector.broadcast %50 : vector<1x256xf32> to vector<8x256xf32>
    %52 = arith.mulf %51, %1 : vector<8x256xf32>
    %cst_48 = arith.constant dense<0.000000e+00> : vector<8x256xf32>
    %53 = tpu.matmul %48, %52, %cst_48 {dimension_numbers = #tpu.dot_dimension_numbers<[1], [0], [0], [1], [0, 0, 1, 1], [], []>} : vector<8x8xf32>, vector<8x256xf32>, vector<8x256xf32> -> vector<8x256xf32>
    %54 = arith.addf %46, %53 : vector<8x256xf32>
    %c255_i32 = arith.constant 255 : i32
    %55 = tpu.dynamic_rotate %1 by %c255_i32 dim 1 : vector<8x256xf32>, i32 -> vector<8x256xf32>
    %c0_49 = arith.constant 0 : index
    %c5_50 = arith.constant 5 : index
    %c0_51 = arith.constant 0 : index
    %c0_52 = arith.constant 0 : index
    %56 = vector.load %arg3[%c0_49, %c5_50, %c0_51, %c0_52] : memref<8x9x8x8xf32, #tpu.memory_space<vmem>>, vector<1x1x8x8xf32>
    %57 = vector.shape_cast %56 : vector<1x1x8x8xf32> to vector<8x8xf32>
    %c5_53 = arith.constant 5 : index
    %c0_54 = arith.constant 0 : index
    %c0_55 = arith.constant 0 : index
    %58 = vector.load %arg2[%c5_53, %c0_54, %c0_55] : memref<10x1x256xf32, #tpu.memory_space<vmem>>, vector<1x1x256xf32>
    %59 = vector.shape_cast %58 : vector<1x1x256xf32> to vector<1x256xf32>
    %60 = vector.broadcast %59 : vector<1x256xf32> to vector<8x256xf32>
    %61 = arith.mulf %60, %55 : vector<8x256xf32>
    %cst_56 = arith.constant dense<0.000000e+00> : vector<8x256xf32>
    %62 = tpu.matmul %57, %61, %cst_56 {dimension_numbers = #tpu.dot_dimension_numbers<[1], [0], [0], [1], [0, 0, 1, 1], [], []>} : vector<8x8xf32>, vector<8x256xf32>, vector<8x256xf32> -> vector<8x256xf32>
    %63 = arith.addf %54, %62 : vector<8x256xf32>
    %c241_i32 = arith.constant 241 : i32
    %64 = tpu.dynamic_rotate %1 by %c241_i32 dim 1 : vector<8x256xf32>, i32 -> vector<8x256xf32>
    %c0_57 = arith.constant 0 : index
    %c6 = arith.constant 6 : index
    %c0_58 = arith.constant 0 : index
    %c0_59 = arith.constant 0 : index
    %65 = vector.load %arg3[%c0_57, %c6, %c0_58, %c0_59] : memref<8x9x8x8xf32, #tpu.memory_space<vmem>>, vector<1x1x8x8xf32>
    %66 = vector.shape_cast %65 : vector<1x1x8x8xf32> to vector<8x8xf32>
    %c6_60 = arith.constant 6 : index
    %c0_61 = arith.constant 0 : index
    %c0_62 = arith.constant 0 : index
    %67 = vector.load %arg2[%c6_60, %c0_61, %c0_62] : memref<10x1x256xf32, #tpu.memory_space<vmem>>, vector<1x1x256xf32>
    %68 = vector.shape_cast %67 : vector<1x1x256xf32> to vector<1x256xf32>
    %69 = vector.broadcast %68 : vector<1x256xf32> to vector<8x256xf32>
    %70 = arith.mulf %69, %64 : vector<8x256xf32>
    %cst_63 = arith.constant dense<0.000000e+00> : vector<8x256xf32>
    %71 = tpu.matmul %66, %70, %cst_63 {dimension_numbers = #tpu.dot_dimension_numbers<[1], [0], [0], [1], [0, 0, 1, 1], [], []>} : vector<8x8xf32>, vector<8x256xf32>, vector<8x256xf32> -> vector<8x256xf32>
    %72 = arith.addf %63, %71 : vector<8x256xf32>
    %c240_i32 = arith.constant 240 : i32
    %73 = tpu.dynamic_rotate %1 by %c240_i32 dim 1 : vector<8x256xf32>, i32 -> vector<8x256xf32>
    %c0_64 = arith.constant 0 : index
    %c7_65 = arith.constant 7 : index
    %c0_66 = arith.constant 0 : index
    %c0_67 = arith.constant 0 : index
    %74 = vector.load %arg3[%c0_64, %c7_65, %c0_66, %c0_67] : memref<8x9x8x8xf32, #tpu.memory_space<vmem>>, vector<1x1x8x8xf32>
    %75 = vector.shape_cast %74 : vector<1x1x8x8xf32> to vector<8x8xf32>
    %c7_68 = arith.constant 7 : index
    %c0_69 = arith.constant 0 : index
    %c0_70 = arith.constant 0 : index
    %76 = vector.load %arg2[%c7_68, %c0_69, %c0_70] : memref<10x1x256xf32, #tpu.memory_space<vmem>>, vector<1x1x256xf32>
    %77 = vector.shape_cast %76 : vector<1x1x256xf32> to vector<1x256xf32>
    %78 = vector.broadcast %77 : vector<1x256xf32> to vector<8x256xf32>
    %79 = arith.mulf %78, %73 : vector<8x256xf32>
    %cst_71 = arith.constant dense<0.000000e+00> : vector<8x256xf32>
    %80 = tpu.matmul %75, %79, %cst_71 {dimension_numbers = #tpu.dot_dimension_numbers<[1], [0], [0], [1], [0, 0, 1, 1], [], []>} : vector<8x8xf32>, vector<8x256xf32>, vector<8x256xf32> -> vector<8x256xf32>
    %81 = arith.addf %72, %80 : vector<8x256xf32>
    %c239_i32 = arith.constant 239 : i32
    %82 = tpu.dynamic_rotate %1 by %c239_i32 dim 1 : vector<8x256xf32>, i32 -> vector<8x256xf32>
    %c0_72 = arith.constant 0 : index
    %c8 = arith.constant 8 : index
    %c0_73 = arith.constant 0 : index
    %c0_74 = arith.constant 0 : index
    %83 = vector.load %arg3[%c0_72, %c8, %c0_73, %c0_74] : memref<8x9x8x8xf32, #tpu.memory_space<vmem>>, vector<1x1x8x8xf32>
    %84 = vector.shape_cast %83 : vector<1x1x8x8xf32> to vector<8x8xf32>
    %c8_75 = arith.constant 8 : index
    %c0_76 = arith.constant 0 : index
    %c0_77 = arith.constant 0 : index
    %85 = vector.load %arg2[%c8_75, %c0_76, %c0_77] : memref<10x1x256xf32, #tpu.memory_space<vmem>>, vector<1x1x256xf32>
    %86 = vector.shape_cast %85 : vector<1x1x256xf32> to vector<1x256xf32>
    %87 = vector.broadcast %86 : vector<1x256xf32> to vector<8x256xf32>
    %88 = arith.mulf %87, %82 : vector<8x256xf32>
    %cst_78 = arith.constant dense<0.000000e+00> : vector<8x256xf32>
    %89 = tpu.matmul %84, %88, %cst_78 {dimension_numbers = #tpu.dot_dimension_numbers<[1], [0], [0], [1], [0, 0, 1, 1], [], []>} : vector<8x8xf32>, vector<8x256xf32>, vector<8x256xf32> -> vector<8x256xf32>
    %90 = arith.addf %81, %89 : vector<8x256xf32>
    %c0_79 = arith.constant 0 : index
    %c0_80 = arith.constant 0 : index
    %c0_81 = arith.constant 0 : index
    %c0_82 = arith.constant 0 : index
    %91 = vector.load %arg4[%c0_79, %c0_80, %c0_81, %c0_82] : memref<8x3x8x1xf32, #tpu.memory_space<vmem>>, vector<1x1x8x1xf32>
    %92 = vector.shape_cast %91 : vector<1x1x8x1xf32> to vector<8x1xf32>
    %93 = vector.broadcast %92 : vector<8x1xf32> to vector<8x256xf32>
    %94 = arith.addf %90, %93 : vector<8x256xf32>
    %c0_83 = arith.constant 0 : index
    %c1_84 = arith.constant 1 : index
    %c0_85 = arith.constant 0 : index
    %c0_86 = arith.constant 0 : index
    %95 = vector.load %arg4[%c0_83, %c1_84, %c0_85, %c0_86] : memref<8x3x8x1xf32, #tpu.memory_space<vmem>>, vector<1x1x8x1xf32>
    %96 = vector.shape_cast %95 : vector<1x1x8x1xf32> to vector<8x1xf32>
    %c0_87 = arith.constant 0 : index
    %c2_88 = arith.constant 2 : index
    %c0_89 = arith.constant 0 : index
    %c0_90 = arith.constant 0 : index
    %97 = vector.load %arg4[%c0_87, %c2_88, %c0_89, %c0_90] : memref<8x3x8x1xf32, #tpu.memory_space<vmem>>, vector<1x1x8x1xf32>
    %98 = vector.shape_cast %97 : vector<1x1x8x1xf32> to vector<8x1xf32>
    %cst_91 = arith.constant dense<0.000000e+00> : vector<8xf32>
    %99 = vector.multi_reduction <add>, %94, %cst_91 [1] : vector<8x256xf32> to vector<8xf32>
    %100 = vector.shape_cast %99 : vector<8xf32> to vector<8x1xf32>
    %cst_92 = arith.constant 2.560000e+02 : f32
    %101 = vector.broadcast %cst_92 : f32 to vector<8x1xf32>
    %102 = arith.divf %100, %101 : vector<8x1xf32>
    %103 = vector.broadcast %102 : vector<8x1xf32> to vector<8x256xf32>
    %104 = arith.subf %94, %103 : vector<8x256xf32>
    %105 = arith.mulf %104, %104 : vector<8x256xf32>
    %cst_93 = arith.constant dense<0.000000e+00> : vector<8xf32>
    %106 = vector.multi_reduction <add>, %105, %cst_93 [1] : vector<8x256xf32> to vector<8xf32>
    %107 = vector.shape_cast %106 : vector<8xf32> to vector<8x1xf32>
    %cst_94 = arith.constant 2.560000e+02 : f32
    %108 = vector.broadcast %cst_94 : f32 to vector<8x1xf32>
    %109 = arith.divf %107, %108 : vector<8x1xf32>
    %110 = vector.broadcast %102 : vector<8x1xf32> to vector<8x256xf32>
    %111 = arith.subf %94, %110 : vector<8x256xf32>
    %cst_95 = arith.constant 9.99999974E-6 : f32
    %112 = vector.broadcast %cst_95 : f32 to vector<8x1xf32>
    %113 = arith.addf %109, %112 : vector<8x1xf32>
    %114 = math.rsqrt %113 : vector<8x1xf32>
    %115 = vector.broadcast %114 : vector<8x1xf32> to vector<8x256xf32>
    %116 = arith.mulf %111, %115 : vector<8x256xf32>
    %117 = vector.broadcast %96 : vector<8x1xf32> to vector<8x256xf32>
    %118 = arith.mulf %116, %117 : vector<8x256xf32>
    %119 = vector.broadcast %98 : vector<8x1xf32> to vector<8x256xf32>
    %120 = arith.addf %118, %119 : vector<8x256xf32>
    %cst_96 = arith.constant 0.000000e+00 : f32
    %121 = vector.broadcast %cst_96 : f32 to vector<8x256xf32>
    %122 = arith.subf %121, %120 : vector<8x256xf32>
    %123 = math.exp %122 : vector<8x256xf32>
    %cst_97 = arith.constant 1.000000e+00 : f32
    %124 = vector.broadcast %cst_97 : f32 to vector<8x256xf32>
    %125 = arith.addf %124, %123 : vector<8x256xf32>
    %126 = tpu.reciprocal %125 {approx = true} : vector<8x256xf32> -> vector<8x256xf32>
    %127 = arith.mulf %120, %126 : vector<8x256xf32>
    %c17_i32_98 = arith.constant 17 : i32
    %128 = tpu.dynamic_rotate %127 by %c17_i32_98 dim 1 : vector<8x256xf32>, i32 -> vector<8x256xf32>
    %c1_99 = arith.constant 1 : index
    %c0_100 = arith.constant 0 : index
    %c0_101 = arith.constant 0 : index
    %c0_102 = arith.constant 0 : index
    %129 = vector.load %arg3[%c1_99, %c0_100, %c0_101, %c0_102] : memref<8x9x8x8xf32, #tpu.memory_space<vmem>>, vector<1x1x8x8xf32>
    %130 = vector.shape_cast %129 : vector<1x1x8x8xf32> to vector<8x8xf32>
    %c0_103 = arith.constant 0 : index
    %c0_104 = arith.constant 0 : index
    %c0_105 = arith.constant 0 : index
    %131 = vector.load %arg2[%c0_103, %c0_104, %c0_105] : memref<10x1x256xf32, #tpu.memory_space<vmem>>, vector<1x1x256xf32>
    %132 = vector.shape_cast %131 : vector<1x1x256xf32> to vector<1x256xf32>
    %133 = vector.broadcast %132 : vector<1x256xf32> to vector<8x256xf32>
    %134 = arith.mulf %133, %128 : vector<8x256xf32>
    %cst_106 = arith.constant dense<0.000000e+00> : vector<8x256xf32>
    %135 = tpu.matmul %130, %134, %cst_106 {dimension_numbers = #tpu.dot_dimension_numbers<[1], [0], [0], [1], [0, 0, 1, 1], [], []>} : vector<8x8xf32>, vector<8x256xf32>, vector<8x256xf32> -> vector<8x256xf32>
    %c16_i32_107 = arith.constant 16 : i32
    %136 = tpu.dynamic_rotate %127 by %c16_i32_107 dim 1 : vector<8x256xf32>, i32 -> vector<8x256xf32>
    %c1_108 = arith.constant 1 : index
    %c1_109 = arith.constant 1 : index
    %c0_110 = arith.constant 0 : index
    %c0_111 = arith.constant 0 : index
    %137 = vector.load %arg3[%c1_108, %c1_109, %c0_110, %c0_111] : memref<8x9x8x8xf32, #tpu.memory_space<vmem>>, vector<1x1x8x8xf32>
    %138 = vector.shape_cast %137 : vector<1x1x8x8xf32> to vector<8x8xf32>
    %c1_112 = arith.constant 1 : index
    %c0_113 = arith.constant 0 : index
    %c0_114 = arith.constant 0 : index
    %139 = vector.load %arg2[%c1_112, %c0_113, %c0_114] : memref<10x1x256xf32, #tpu.memory_space<vmem>>, vector<1x1x256xf32>
    %140 = vector.shape_cast %139 : vector<1x1x256xf32> to vector<1x256xf32>
    %141 = vector.broadcast %140 : vector<1x256xf32> to vector<8x256xf32>
    %142 = arith.mulf %141, %136 : vector<8x256xf32>
    %cst_115 = arith.constant dense<0.000000e+00> : vector<8x256xf32>
    %143 = tpu.matmul %138, %142, %cst_115 {dimension_numbers = #tpu.dot_dimension_numbers<[1], [0], [0], [1], [0, 0, 1, 1], [], []>} : vector<8x8xf32>, vector<8x256xf32>, vector<8x256xf32> -> vector<8x256xf32>
    %144 = arith.addf %135, %143 : vector<8x256xf32>
    %c15_i32_116 = arith.constant 15 : i32
    %145 = tpu.dynamic_rotate %127 by %c15_i32_116 dim 1 : vector<8x256xf32>, i32 -> vector<8x256xf32>
    %c1_117 = arith.constant 1 : index
    %c2_118 = arith.constant 2 : index
    %c0_119 = arith.constant 0 : index
    %c0_120 = arith.constant 0 : index
    %146 = vector.load %arg3[%c1_117, %c2_118, %c0_119, %c0_120] : memref<8x9x8x8xf32, #tpu.memory_space<vmem>>, vector<1x1x8x8xf32>
    %147 = vector.shape_cast %146 : vector<1x1x8x8xf32> to vector<8x8xf32>
    %c2_121 = arith.constant 2 : index
    %c0_122 = arith.constant 0 : index
    %c0_123 = arith.constant 0 : index
    %148 = vector.load %arg2[%c2_121, %c0_122, %c0_123] : memref<10x1x256xf32, #tpu.memory_space<vmem>>, vector<1x1x256xf32>
    %149 = vector.shape_cast %148 : vector<1x1x256xf32> to vector<1x256xf32>
    %150 = vector.broadcast %149 : vector<1x256xf32> to vector<8x256xf32>
    %151 = arith.mulf %150, %145 : vector<8x256xf32>
    %cst_124 = arith.constant dense<0.000000e+00> : vector<8x256xf32>
    %152 = tpu.matmul %147, %151, %cst_124 {dimension_numbers = #tpu.dot_dimension_numbers<[1], [0], [0], [1], [0, 0, 1, 1], [], []>} : vector<8x8xf32>, vector<8x256xf32>, vector<8x256xf32> -> vector<8x256xf32>
    %153 = arith.addf %144, %152 : vector<8x256xf32>
    %c1_i32_125 = arith.constant 1 : i32
    %154 = tpu.dynamic_rotate %127 by %c1_i32_125 dim 1 : vector<8x256xf32>, i32 -> vector<8x256xf32>
    %c1_126 = arith.constant 1 : index
    %c3_127 = arith.constant 3 : index
    %c0_128 = arith.constant 0 : index
    %c0_129 = arith.constant 0 : index
    %155 = vector.load %arg3[%c1_126, %c3_127, %c0_128, %c0_129] : memref<8x9x8x8xf32, #tpu.memory_space<vmem>>, vector<1x1x8x8xf32>
    %156 = vector.shape_cast %155 : vector<1x1x8x8xf32> to vector<8x8xf32>
    %c3_130 = arith.constant 3 : index
    %c0_131 = arith.constant 0 : index
    %c0_132 = arith.constant 0 : index
    %157 = vector.load %arg2[%c3_130, %c0_131, %c0_132] : memref<10x1x256xf32, #tpu.memory_space<vmem>>, vector<1x1x256xf32>
    %158 = vector.shape_cast %157 : vector<1x1x256xf32> to vector<1x256xf32>
    %159 = vector.broadcast %158 : vector<1x256xf32> to vector<8x256xf32>
    %160 = arith.mulf %159, %154 : vector<8x256xf32>
    %cst_133 = arith.constant dense<0.000000e+00> : vector<8x256xf32>
    %161 = tpu.matmul %156, %160, %cst_133 {dimension_numbers = #tpu.dot_dimension_numbers<[1], [0], [0], [1], [0, 0, 1, 1], [], []>} : vector<8x8xf32>, vector<8x256xf32>, vector<8x256xf32> -> vector<8x256xf32>
    %162 = arith.addf %153, %161 : vector<8x256xf32>
    %c1_134 = arith.constant 1 : index
    %c4_135 = arith.constant 4 : index
    %c0_136 = arith.constant 0 : index
    %c0_137 = arith.constant 0 : index
    %163 = vector.load %arg3[%c1_134, %c4_135, %c0_136, %c0_137] : memref<8x9x8x8xf32, #tpu.memory_space<vmem>>, vector<1x1x8x8xf32>
    %164 = vector.shape_cast %163 : vector<1x1x8x8xf32> to vector<8x8xf32>
    %c4_138 = arith.constant 4 : index
    %c0_139 = arith.constant 0 : index
    %c0_140 = arith.constant 0 : index
    %165 = vector.load %arg2[%c4_138, %c0_139, %c0_140] : memref<10x1x256xf32, #tpu.memory_space<vmem>>, vector<1x1x256xf32>
    %166 = vector.shape_cast %165 : vector<1x1x256xf32> to vector<1x256xf32>
    %167 = vector.broadcast %166 : vector<1x256xf32> to vector<8x256xf32>
    %168 = arith.mulf %167, %127 : vector<8x256xf32>
    %cst_141 = arith.constant dense<0.000000e+00> : vector<8x256xf32>
    %169 = tpu.matmul %164, %168, %cst_141 {dimension_numbers = #tpu.dot_dimension_numbers<[1], [0], [0], [1], [0, 0, 1, 1], [], []>} : vector<8x8xf32>, vector<8x256xf32>, vector<8x256xf32> -> vector<8x256xf32>
    %170 = arith.addf %162, %169 : vector<8x256xf32>
    %c255_i32_142 = arith.constant 255 : i32
    %171 = tpu.dynamic_rotate %127 by %c255_i32_142 dim 1 : vector<8x256xf32>, i32 -> vector<8x256xf32>
    %c1_143 = arith.constant 1 : index
    %c5_144 = arith.constant 5 : index
    %c0_145 = arith.constant 0 : index
    %c0_146 = arith.constant 0 : index
    %172 = vector.load %arg3[%c1_143, %c5_144, %c0_145, %c0_146] : memref<8x9x8x8xf32, #tpu.memory_space<vmem>>, vector<1x1x8x8xf32>
    %173 = vector.shape_cast %172 : vector<1x1x8x8xf32> to vector<8x8xf32>
    %c5_147 = arith.constant 5 : index
    %c0_148 = arith.constant 0 : index
    %c0_149 = arith.constant 0 : index
    %174 = vector.load %arg2[%c5_147, %c0_148, %c0_149] : memref<10x1x256xf32, #tpu.memory_space<vmem>>, vector<1x1x256xf32>
    %175 = vector.shape_cast %174 : vector<1x1x256xf32> to vector<1x256xf32>
    %176 = vector.broadcast %175 : vector<1x256xf32> to vector<8x256xf32>
    %177 = arith.mulf %176, %171 : vector<8x256xf32>
    %cst_150 = arith.constant dense<0.000000e+00> : vector<8x256xf32>
    %178 = tpu.matmul %173, %177, %cst_150 {dimension_numbers = #tpu.dot_dimension_numbers<[1], [0], [0], [1], [0, 0, 1, 1], [], []>} : vector<8x8xf32>, vector<8x256xf32>, vector<8x256xf32> -> vector<8x256xf32>
    %179 = arith.addf %170, %178 : vector<8x256xf32>
    %c241_i32_151 = arith.constant 241 : i32
    %180 = tpu.dynamic_rotate %127 by %c241_i32_151 dim 1 : vector<8x256xf32>, i32 -> vector<8x256xf32>
    %c1_152 = arith.constant 1 : index
    %c6_153 = arith.constant 6 : index
    %c0_154 = arith.constant 0 : index
    %c0_155 = arith.constant 0 : index
    %181 = vector.load %arg3[%c1_152, %c6_153, %c0_154, %c0_155] : memref<8x9x8x8xf32, #tpu.memory_space<vmem>>, vector<1x1x8x8xf32>
    %182 = vector.shape_cast %181 : vector<1x1x8x8xf32> to vector<8x8xf32>
    %c6_156 = arith.constant 6 : index
    %c0_157 = arith.constant 0 : index
    %c0_158 = arith.constant 0 : index
    %183 = vector.load %arg2[%c6_156, %c0_157, %c0_158] : memref<10x1x256xf32, #tpu.memory_space<vmem>>, vector<1x1x256xf32>
    %184 = vector.shape_cast %183 : vector<1x1x256xf32> to vector<1x256xf32>
    %185 = vector.broadcast %184 : vector<1x256xf32> to vector<8x256xf32>
    %186 = arith.mulf %185, %180 : vector<8x256xf32>
    %cst_159 = arith.constant dense<0.000000e+00> : vector<8x256xf32>
    %187 = tpu.matmul %182, %186, %cst_159 {dimension_numbers = #tpu.dot_dimension_numbers<[1], [0], [0], [1], [0, 0, 1, 1], [], []>} : vector<8x8xf32>, vector<8x256xf32>, vector<8x256xf32> -> vector<8x256xf32>
    %188 = arith.addf %179, %187 : vector<8x256xf32>
    %c240_i32_160 = arith.constant 240 : i32
    %189 = tpu.dynamic_rotate %127 by %c240_i32_160 dim 1 : vector<8x256xf32>, i32 -> vector<8x256xf32>
    %c1_161 = arith.constant 1 : index
    %c7_162 = arith.constant 7 : index
    %c0_163 = arith.constant 0 : index
    %c0_164 = arith.constant 0 : index
    %190 = vector.load %arg3[%c1_161, %c7_162, %c0_163, %c0_164] : memref<8x9x8x8xf32, #tpu.memory_space<vmem>>, vector<1x1x8x8xf32>
    %191 = vector.shape_cast %190 : vector<1x1x8x8xf32> to vector<8x8xf32>
    %c7_165 = arith.constant 7 : index
    %c0_166 = arith.constant 0 : index
    %c0_167 = arith.constant 0 : index
    %192 = vector.load %arg2[%c7_165, %c0_166, %c0_167] : memref<10x1x256xf32, #tpu.memory_space<vmem>>, vector<1x1x256xf32>
    %193 = vector.shape_cast %192 : vector<1x1x256xf32> to vector<1x256xf32>
    %194 = vector.broadcast %193 : vector<1x256xf32> to vector<8x256xf32>
    %195 = arith.mulf %194, %189 : vector<8x256xf32>
    %cst_168 = arith.constant dense<0.000000e+00> : vector<8x256xf32>
    %196 = tpu.matmul %191, %195, %cst_168 {dimension_numbers = #tpu.dot_dimension_numbers<[1], [0], [0], [1], [0, 0, 1, 1], [], []>} : vector<8x8xf32>, vector<8x256xf32>, vector<8x256xf32> -> vector<8x256xf32>
    %197 = arith.addf %188, %196 : vector<8x256xf32>
    %c239_i32_169 = arith.constant 239 : i32
    %198 = tpu.dynamic_rotate %127 by %c239_i32_169 dim 1 : vector<8x256xf32>, i32 -> vector<8x256xf32>
    %c1_170 = arith.constant 1 : index
    %c8_171 = arith.constant 8 : index
    %c0_172 = arith.constant 0 : index
    %c0_173 = arith.constant 0 : index
    %199 = vector.load %arg3[%c1_170, %c8_171, %c0_172, %c0_173] : memref<8x9x8x8xf32, #tpu.memory_space<vmem>>, vector<1x1x8x8xf32>
    %200 = vector.shape_cast %199 : vector<1x1x8x8xf32> to vector<8x8xf32>
    %c8_174 = arith.constant 8 : index
    %c0_175 = arith.constant 0 : index
    %c0_176 = arith.constant 0 : index
    %201 = vector.load %arg2[%c8_174, %c0_175, %c0_176] : memref<10x1x256xf32, #tpu.memory_space<vmem>>, vector<1x1x256xf32>
    %202 = vector.shape_cast %201 : vector<1x1x256xf32> to vector<1x256xf32>
    %203 = vector.broadcast %202 : vector<1x256xf32> to vector<8x256xf32>
    %204 = arith.mulf %203, %198 : vector<8x256xf32>
    %cst_177 = arith.constant dense<0.000000e+00> : vector<8x256xf32>
    %205 = tpu.matmul %200, %204, %cst_177 {dimension_numbers = #tpu.dot_dimension_numbers<[1], [0], [0], [1], [0, 0, 1, 1], [], []>} : vector<8x8xf32>, vector<8x256xf32>, vector<8x256xf32> -> vector<8x256xf32>
    %206 = arith.addf %197, %205 : vector<8x256xf32>
    %c1_178 = arith.constant 1 : index
    %c0_179 = arith.constant 0 : index
    %c0_180 = arith.constant 0 : index
    %c0_181 = arith.constant 0 : index
    %207 = vector.load %arg4[%c1_178, %c0_179, %c0_180, %c0_181] : memref<8x3x8x1xf32, #tpu.memory_space<vmem>>, vector<1x1x8x1xf32>
    %208 = vector.shape_cast %207 : vector<1x1x8x1xf32> to vector<8x1xf32>
    %209 = vector.broadcast %208 : vector<8x1xf32> to vector<8x256xf32>
    %210 = arith.addf %206, %209 : vector<8x256xf32>
    %c1_182 = arith.constant 1 : index
    %c1_183 = arith.constant 1 : index
    %c0_184 = arith.constant 0 : index
    %c0_185 = arith.constant 0 : index
    %211 = vector.load %arg4[%c1_182, %c1_183, %c0_184, %c0_185] : memref<8x3x8x1xf32, #tpu.memory_space<vmem>>, vector<1x1x8x1xf32>
    %212 = vector.shape_cast %211 : vector<1x1x8x1xf32> to vector<8x1xf32>
    %c1_186 = arith.constant 1 : index
    %c2_187 = arith.constant 2 : index
    %c0_188 = arith.constant 0 : index
    %c0_189 = arith.constant 0 : index
    %213 = vector.load %arg4[%c1_186, %c2_187, %c0_188, %c0_189] : memref<8x3x8x1xf32, #tpu.memory_space<vmem>>, vector<1x1x8x1xf32>
    %214 = vector.shape_cast %213 : vector<1x1x8x1xf32> to vector<8x1xf32>
    %cst_190 = arith.constant dense<0.000000e+00> : vector<8xf32>
    %215 = vector.multi_reduction <add>, %210, %cst_190 [1] : vector<8x256xf32> to vector<8xf32>
    %216 = vector.shape_cast %215 : vector<8xf32> to vector<8x1xf32>
    %cst_191 = arith.constant 2.560000e+02 : f32
    %217 = vector.broadcast %cst_191 : f32 to vector<8x1xf32>
    %218 = arith.divf %216, %217 : vector<8x1xf32>
    %219 = vector.broadcast %218 : vector<8x1xf32> to vector<8x256xf32>
    %220 = arith.subf %210, %219 : vector<8x256xf32>
    %221 = arith.mulf %220, %220 : vector<8x256xf32>
    %cst_192 = arith.constant dense<0.000000e+00> : vector<8xf32>
    %222 = vector.multi_reduction <add>, %221, %cst_192 [1] : vector<8x256xf32> to vector<8xf32>
    %223 = vector.shape_cast %222 : vector<8xf32> to vector<8x1xf32>
    %cst_193 = arith.constant 2.560000e+02 : f32
    %224 = vector.broadcast %cst_193 : f32 to vector<8x1xf32>
    %225 = arith.divf %223, %224 : vector<8x1xf32>
    %226 = vector.broadcast %218 : vector<8x1xf32> to vector<8x256xf32>
    %227 = arith.subf %210, %226 : vector<8x256xf32>
    %cst_194 = arith.constant 9.99999974E-6 : f32
    %228 = vector.broadcast %cst_194 : f32 to vector<8x1xf32>
    %229 = arith.addf %225, %228 : vector<8x1xf32>
    %230 = math.rsqrt %229 : vector<8x1xf32>
    %231 = vector.broadcast %230 : vector<8x1xf32> to vector<8x256xf32>
    %232 = arith.mulf %227, %231 : vector<8x256xf32>
    %233 = vector.broadcast %212 : vector<8x1xf32> to vector<8x256xf32>
    %234 = arith.mulf %232, %233 : vector<8x256xf32>
    %235 = vector.broadcast %214 : vector<8x1xf32> to vector<8x256xf32>
    %236 = arith.addf %234, %235 : vector<8x256xf32>
    %cst_195 = arith.constant 0.000000e+00 : f32
    %237 = vector.broadcast %cst_195 : f32 to vector<8x256xf32>
    %238 = arith.subf %237, %236 : vector<8x256xf32>
    %239 = math.exp %238 : vector<8x256xf32>
    %cst_196 = arith.constant 1.000000e+00 : f32
    %240 = vector.broadcast %cst_196 : f32 to vector<8x256xf32>
    %241 = arith.addf %240, %239 : vector<8x256xf32>
    %242 = tpu.reciprocal %241 {approx = true} : vector<8x256xf32> -> vector<8x256xf32>
    %243 = arith.mulf %236, %242 : vector<8x256xf32>
    %244 = arith.addf %243, %1 : vector<8x256xf32>
    %c17_i32_197 = arith.constant 17 : i32
    %245 = tpu.dynamic_rotate %244 by %c17_i32_197 dim 1 : vector<8x256xf32>, i32 -> vector<8x256xf32>
    %c2_198 = arith.constant 2 : index
    %c0_199 = arith.constant 0 : index
    %c0_200 = arith.constant 0 : index
    %c0_201 = arith.constant 0 : index
    %246 = vector.load %arg3[%c2_198, %c0_199, %c0_200, %c0_201] : memref<8x9x8x8xf32, #tpu.memory_space<vmem>>, vector<1x1x8x8xf32>
    %247 = vector.shape_cast %246 : vector<1x1x8x8xf32> to vector<8x8xf32>
    %c0_202 = arith.constant 0 : index
    %c0_203 = arith.constant 0 : index
    %c0_204 = arith.constant 0 : index
    %248 = vector.load %arg2[%c0_202, %c0_203, %c0_204] : memref<10x1x256xf32, #tpu.memory_space<vmem>>, vector<1x1x256xf32>
    %249 = vector.shape_cast %248 : vector<1x1x256xf32> to vector<1x256xf32>
    %250 = vector.broadcast %249 : vector<1x256xf32> to vector<8x256xf32>
    %251 = arith.mulf %250, %245 : vector<8x256xf32>
    %cst_205 = arith.constant dense<0.000000e+00> : vector<8x256xf32>
    %252 = tpu.matmul %247, %251, %cst_205 {dimension_numbers = #tpu.dot_dimension_numbers<[1], [0], [0], [1], [0, 0, 1, 1], [], []>} : vector<8x8xf32>, vector<8x256xf32>, vector<8x256xf32> -> vector<8x256xf32>
    %c16_i32_206 = arith.constant 16 : i32
    %253 = tpu.dynamic_rotate %244 by %c16_i32_206 dim 1 : vector<8x256xf32>, i32 -> vector<8x256xf32>
    %c2_207 = arith.constant 2 : index
    %c1_208 = arith.constant 1 : index
    %c0_209 = arith.constant 0 : index
    %c0_210 = arith.constant 0 : index
    %254 = vector.load %arg3[%c2_207, %c1_208, %c0_209, %c0_210] : memref<8x9x8x8xf32, #tpu.memory_space<vmem>>, vector<1x1x8x8xf32>
    %255 = vector.shape_cast %254 : vector<1x1x8x8xf32> to vector<8x8xf32>
    %c1_211 = arith.constant 1 : index
    %c0_212 = arith.constant 0 : index
    %c0_213 = arith.constant 0 : index
    %256 = vector.load %arg2[%c1_211, %c0_212, %c0_213] : memref<10x1x256xf32, #tpu.memory_space<vmem>>, vector<1x1x256xf32>
    %257 = vector.shape_cast %256 : vector<1x1x256xf32> to vector<1x256xf32>
    %258 = vector.broadcast %257 : vector<1x256xf32> to vector<8x256xf32>
    %259 = arith.mulf %258, %253 : vector<8x256xf32>
    %cst_214 = arith.constant dense<0.000000e+00> : vector<8x256xf32>
    %260 = tpu.matmul %255, %259, %cst_214 {dimension_numbers = #tpu.dot_dimension_numbers<[1], [0], [0], [1], [0, 0, 1, 1], [], []>} : vector<8x8xf32>, vector<8x256xf32>, vector<8x256xf32> -> vector<8x256xf32>
    %261 = arith.addf %252, %260 : vector<8x256xf32>
    %c15_i32_215 = arith.constant 15 : i32
    %262 = tpu.dynamic_rotate %244 by %c15_i32_215 dim 1 : vector<8x256xf32>, i32 -> vector<8x256xf32>
    %c2_216 = arith.constant 2 : index
    %c2_217 = arith.constant 2 : index
    %c0_218 = arith.constant 0 : index
    %c0_219 = arith.constant 0 : index
    %263 = vector.load %arg3[%c2_216, %c2_217, %c0_218, %c0_219] : memref<8x9x8x8xf32, #tpu.memory_space<vmem>>, vector<1x1x8x8xf32>
    %264 = vector.shape_cast %263 : vector<1x1x8x8xf32> to vector<8x8xf32>
    %c2_220 = arith.constant 2 : index
    %c0_221 = arith.constant 0 : index
    %c0_222 = arith.constant 0 : index
    %265 = vector.load %arg2[%c2_220, %c0_221, %c0_222] : memref<10x1x256xf32, #tpu.memory_space<vmem>>, vector<1x1x256xf32>
    %266 = vector.shape_cast %265 : vector<1x1x256xf32> to vector<1x256xf32>
    %267 = vector.broadcast %266 : vector<1x256xf32> to vector<8x256xf32>
    %268 = arith.mulf %267, %262 : vector<8x256xf32>
    %cst_223 = arith.constant dense<0.000000e+00> : vector<8x256xf32>
    %269 = tpu.matmul %264, %268, %cst_223 {dimension_numbers = #tpu.dot_dimension_numbers<[1], [0], [0], [1], [0, 0, 1, 1], [], []>} : vector<8x8xf32>, vector<8x256xf32>, vector<8x256xf32> -> vector<8x256xf32>
    %270 = arith.addf %261, %269 : vector<8x256xf32>
    %c1_i32_224 = arith.constant 1 : i32
    %271 = tpu.dynamic_rotate %244 by %c1_i32_224 dim 1 : vector<8x256xf32>, i32 -> vector<8x256xf32>
    %c2_225 = arith.constant 2 : index
    %c3_226 = arith.constant 3 : index
    %c0_227 = arith.constant 0 : index
    %c0_228 = arith.constant 0 : index
    %272 = vector.load %arg3[%c2_225, %c3_226, %c0_227, %c0_228] : memref<8x9x8x8xf32, #tpu.memory_space<vmem>>, vector<1x1x8x8xf32>
    %273 = vector.shape_cast %272 : vector<1x1x8x8xf32> to vector<8x8xf32>
    %c3_229 = arith.constant 3 : index
    %c0_230 = arith.constant 0 : index
    %c0_231 = arith.constant 0 : index
    %274 = vector.load %arg2[%c3_229, %c0_230, %c0_231] : memref<10x1x256xf32, #tpu.memory_space<vmem>>, vector<1x1x256xf32>
    %275 = vector.shape_cast %274 : vector<1x1x256xf32> to vector<1x256xf32>
    %276 = vector.broadcast %275 : vector<1x256xf32> to vector<8x256xf32>
    %277 = arith.mulf %276, %271 : vector<8x256xf32>
    %cst_232 = arith.constant dense<0.000000e+00> : vector<8x256xf32>
    %278 = tpu.matmul %273, %277, %cst_232 {dimension_numbers = #tpu.dot_dimension_numbers<[1], [0], [0], [1], [0, 0, 1, 1], [], []>} : vector<8x8xf32>, vector<8x256xf32>, vector<8x256xf32> -> vector<8x256xf32>
    %279 = arith.addf %270, %278 : vector<8x256xf32>
    %c2_233 = arith.constant 2 : index
    %c4_234 = arith.constant 4 : index
    %c0_235 = arith.constant 0 : index
    %c0_236 = arith.constant 0 : index
    %280 = vector.load %arg3[%c2_233, %c4_234, %c0_235, %c0_236] : memref<8x9x8x8xf32, #tpu.memory_space<vmem>>, vector<1x1x8x8xf32>
    %281 = vector.shape_cast %280 : vector<1x1x8x8xf32> to vector<8x8xf32>
    %c4_237 = arith.constant 4 : index
    %c0_238 = arith.constant 0 : index
    %c0_239 = arith.constant 0 : index
    %282 = vector.load %arg2[%c4_237, %c0_238, %c0_239] : memref<10x1x256xf32, #tpu.memory_space<vmem>>, vector<1x1x256xf32>
    %283 = vector.shape_cast %282 : vector<1x1x256xf32> to vector<1x256xf32>
    %284 = vector.broadcast %283 : vector<1x256xf32> to vector<8x256xf32>
    %285 = arith.mulf %284, %244 : vector<8x256xf32>
    %cst_240 = arith.constant dense<0.000000e+00> : vector<8x256xf32>
    %286 = tpu.matmul %281, %285, %cst_240 {dimension_numbers = #tpu.dot_dimension_numbers<[1], [0], [0], [1], [0, 0, 1, 1], [], []>} : vector<8x8xf32>, vector<8x256xf32>, vector<8x256xf32> -> vector<8x256xf32>
    %287 = arith.addf %279, %286 : vector<8x256xf32>
    %c255_i32_241 = arith.constant 255 : i32
    %288 = tpu.dynamic_rotate %244 by %c255_i32_241 dim 1 : vector<8x256xf32>, i32 -> vector<8x256xf32>
    %c2_242 = arith.constant 2 : index
    %c5_243 = arith.constant 5 : index
    %c0_244 = arith.constant 0 : index
    %c0_245 = arith.constant 0 : index
    %289 = vector.load %arg3[%c2_242, %c5_243, %c0_244, %c0_245] : memref<8x9x8x8xf32, #tpu.memory_space<vmem>>, vector<1x1x8x8xf32>
    %290 = vector.shape_cast %289 : vector<1x1x8x8xf32> to vector<8x8xf32>
    %c5_246 = arith.constant 5 : index
    %c0_247 = arith.constant 0 : index
    %c0_248 = arith.constant 0 : index
    %291 = vector.load %arg2[%c5_246, %c0_247, %c0_248] : memref<10x1x256xf32, #tpu.memory_space<vmem>>, vector<1x1x256xf32>
    %292 = vector.shape_cast %291 : vector<1x1x256xf32> to vector<1x256xf32>
    %293 = vector.broadcast %292 : vector<1x256xf32> to vector<8x256xf32>
    %294 = arith.mulf %293, %288 : vector<8x256xf32>
    %cst_249 = arith.constant dense<0.000000e+00> : vector<8x256xf32>
    %295 = tpu.matmul %290, %294, %cst_249 {dimension_numbers = #tpu.dot_dimension_numbers<[1], [0], [0], [1], [0, 0, 1, 1], [], []>} : vector<8x8xf32>, vector<8x256xf32>, vector<8x256xf32> -> vector<8x256xf32>
    %296 = arith.addf %287, %295 : vector<8x256xf32>
    %c241_i32_250 = arith.constant 241 : i32
    %297 = tpu.dynamic_rotate %244 by %c241_i32_250 dim 1 : vector<8x256xf32>, i32 -> vector<8x256xf32>
    %c2_251 = arith.constant 2 : index
    %c6_252 = arith.constant 6 : index
    %c0_253 = arith.constant 0 : index
    %c0_254 = arith.constant 0 : index
    %298 = vector.load %arg3[%c2_251, %c6_252, %c0_253, %c0_254] : memref<8x9x8x8xf32, #tpu.memory_space<vmem>>, vector<1x1x8x8xf32>
    %299 = vector.shape_cast %298 : vector<1x1x8x8xf32> to vector<8x8xf32>
    %c6_255 = arith.constant 6 : index
    %c0_256 = arith.constant 0 : index
    %c0_257 = arith.constant 0 : index
    %300 = vector.load %arg2[%c6_255, %c0_256, %c0_257] : memref<10x1x256xf32, #tpu.memory_space<vmem>>, vector<1x1x256xf32>
    %301 = vector.shape_cast %300 : vector<1x1x256xf32> to vector<1x256xf32>
    %302 = vector.broadcast %301 : vector<1x256xf32> to vector<8x256xf32>
    %303 = arith.mulf %302, %297 : vector<8x256xf32>
    %cst_258 = arith.constant dense<0.000000e+00> : vector<8x256xf32>
    %304 = tpu.matmul %299, %303, %cst_258 {dimension_numbers = #tpu.dot_dimension_numbers<[1], [0], [0], [1], [0, 0, 1, 1], [], []>} : vector<8x8xf32>, vector<8x256xf32>, vector<8x256xf32> -> vector<8x256xf32>
    %305 = arith.addf %296, %304 : vector<8x256xf32>
    %c240_i32_259 = arith.constant 240 : i32
    %306 = tpu.dynamic_rotate %244 by %c240_i32_259 dim 1 : vector<8x256xf32>, i32 -> vector<8x256xf32>
    %c2_260 = arith.constant 2 : index
    %c7_261 = arith.constant 7 : index
    %c0_262 = arith.constant 0 : index
    %c0_263 = arith.constant 0 : index
    %307 = vector.load %arg3[%c2_260, %c7_261, %c0_262, %c0_263] : memref<8x9x8x8xf32, #tpu.memory_space<vmem>>, vector<1x1x8x8xf32>
    %308 = vector.shape_cast %307 : vector<1x1x8x8xf32> to vector<8x8xf32>
    %c7_264 = arith.constant 7 : index
    %c0_265 = arith.constant 0 : index
    %c0_266 = arith.constant 0 : index
    %309 = vector.load %arg2[%c7_264, %c0_265, %c0_266] : memref<10x1x256xf32, #tpu.memory_space<vmem>>, vector<1x1x256xf32>
    %310 = vector.shape_cast %309 : vector<1x1x256xf32> to vector<1x256xf32>
    %311 = vector.broadcast %310 : vector<1x256xf32> to vector<8x256xf32>
    %312 = arith.mulf %311, %306 : vector<8x256xf32>
    %cst_267 = arith.constant dense<0.000000e+00> : vector<8x256xf32>
    %313 = tpu.matmul %308, %312, %cst_267 {dimension_numbers = #tpu.dot_dimension_numbers<[1], [0], [0], [1], [0, 0, 1, 1], [], []>} : vector<8x8xf32>, vector<8x256xf32>, vector<8x256xf32> -> vector<8x256xf32>
    %314 = arith.addf %305, %313 : vector<8x256xf32>
    %c239_i32_268 = arith.constant 239 : i32
    %315 = tpu.dynamic_rotate %244 by %c239_i32_268 dim 1 : vector<8x256xf32>, i32 -> vector<8x256xf32>
    %c2_269 = arith.constant 2 : index
    %c8_270 = arith.constant 8 : index
    %c0_271 = arith.constant 0 : index
    %c0_272 = arith.constant 0 : index
    %316 = vector.load %arg3[%c2_269, %c8_270, %c0_271, %c0_272] : memref<8x9x8x8xf32, #tpu.memory_space<vmem>>, vector<1x1x8x8xf32>
    %317 = vector.shape_cast %316 : vector<1x1x8x8xf32> to vector<8x8xf32>
    %c8_273 = arith.constant 8 : index
    %c0_274 = arith.constant 0 : index
    %c0_275 = arith.constant 0 : index
    %318 = vector.load %arg2[%c8_273, %c0_274, %c0_275] : memref<10x1x256xf32, #tpu.memory_space<vmem>>, vector<1x1x256xf32>
    %319 = vector.shape_cast %318 : vector<1x1x256xf32> to vector<1x256xf32>
    %320 = vector.broadcast %319 : vector<1x256xf32> to vector<8x256xf32>
    %321 = arith.mulf %320, %315 : vector<8x256xf32>
    %cst_276 = arith.constant dense<0.000000e+00> : vector<8x256xf32>
    %322 = tpu.matmul %317, %321, %cst_276 {dimension_numbers = #tpu.dot_dimension_numbers<[1], [0], [0], [1], [0, 0, 1, 1], [], []>} : vector<8x8xf32>, vector<8x256xf32>, vector<8x256xf32> -> vector<8x256xf32>
    %323 = arith.addf %314, %322 : vector<8x256xf32>
    %c2_277 = arith.constant 2 : index
    %c0_278 = arith.constant 0 : index
    %c0_279 = arith.constant 0 : index
    %c0_280 = arith.constant 0 : index
    %324 = vector.load %arg4[%c2_277, %c0_278, %c0_279, %c0_280] : memref<8x3x8x1xf32, #tpu.memory_space<vmem>>, vector<1x1x8x1xf32>
    %325 = vector.shape_cast %324 : vector<1x1x8x1xf32> to vector<8x1xf32>
    %326 = vector.broadcast %325 : vector<8x1xf32> to vector<8x256xf32>
    %327 = arith.addf %323, %326 : vector<8x256xf32>
    %c2_281 = arith.constant 2 : index
    %c1_282 = arith.constant 1 : index
    %c0_283 = arith.constant 0 : index
    %c0_284 = arith.constant 0 : index
    %328 = vector.load %arg4[%c2_281, %c1_282, %c0_283, %c0_284] : memref<8x3x8x1xf32, #tpu.memory_space<vmem>>, vector<1x1x8x1xf32>
    %329 = vector.shape_cast %328 : vector<1x1x8x1xf32> to vector<8x1xf32>
    %c2_285 = arith.constant 2 : index
    %c2_286 = arith.constant 2 : index
    %c0_287 = arith.constant 0 : index
    %c0_288 = arith.constant 0 : index
    %330 = vector.load %arg4[%c2_285, %c2_286, %c0_287, %c0_288] : memref<8x3x8x1xf32, #tpu.memory_space<vmem>>, vector<1x1x8x1xf32>
    %331 = vector.shape_cast %330 : vector<1x1x8x1xf32> to vector<8x1xf32>
    %cst_289 = arith.constant dense<0.000000e+00> : vector<8xf32>
    %332 = vector.multi_reduction <add>, %327, %cst_289 [1] : vector<8x256xf32> to vector<8xf32>
    %333 = vector.shape_cast %332 : vector<8xf32> to vector<8x1xf32>
    %cst_290 = arith.constant 2.560000e+02 : f32
    %334 = vector.broadcast %cst_290 : f32 to vector<8x1xf32>
    %335 = arith.divf %333, %334 : vector<8x1xf32>
    %336 = vector.broadcast %335 : vector<8x1xf32> to vector<8x256xf32>
    %337 = arith.subf %327, %336 : vector<8x256xf32>
    %338 = arith.mulf %337, %337 : vector<8x256xf32>
    %cst_291 = arith.constant dense<0.000000e+00> : vector<8xf32>
    %339 = vector.multi_reduction <add>, %338, %cst_291 [1] : vector<8x256xf32> to vector<8xf32>
    %340 = vector.shape_cast %339 : vector<8xf32> to vector<8x1xf32>
    %cst_292 = arith.constant 2.560000e+02 : f32
    %341 = vector.broadcast %cst_292 : f32 to vector<8x1xf32>
    %342 = arith.divf %340, %341 : vector<8x1xf32>
    %343 = vector.broadcast %335 : vector<8x1xf32> to vector<8x256xf32>
    %344 = arith.subf %327, %343 : vector<8x256xf32>
    %cst_293 = arith.constant 9.99999974E-6 : f32
    %345 = vector.broadcast %cst_293 : f32 to vector<8x1xf32>
    %346 = arith.addf %342, %345 : vector<8x1xf32>
    %347 = math.rsqrt %346 : vector<8x1xf32>
    %348 = vector.broadcast %347 : vector<8x1xf32> to vector<8x256xf32>
    %349 = arith.mulf %344, %348 : vector<8x256xf32>
    %350 = vector.broadcast %329 : vector<8x1xf32> to vector<8x256xf32>
    %351 = arith.mulf %349, %350 : vector<8x256xf32>
    %352 = vector.broadcast %331 : vector<8x1xf32> to vector<8x256xf32>
    %353 = arith.addf %351, %352 : vector<8x256xf32>
    %cst_294 = arith.constant 0.000000e+00 : f32
    %354 = vector.broadcast %cst_294 : f32 to vector<8x256xf32>
    %355 = arith.subf %354, %353 : vector<8x256xf32>
    %356 = math.exp %355 : vector<8x256xf32>
    %cst_295 = arith.constant 1.000000e+00 : f32
    %357 = vector.broadcast %cst_295 : f32 to vector<8x256xf32>
    %358 = arith.addf %357, %356 : vector<8x256xf32>
    %359 = tpu.reciprocal %358 {approx = true} : vector<8x256xf32> -> vector<8x256xf32>
    %360 = arith.mulf %353, %359 : vector<8x256xf32>
    %c17_i32_296 = arith.constant 17 : i32
    %361 = tpu.dynamic_rotate %360 by %c17_i32_296 dim 1 : vector<8x256xf32>, i32 -> vector<8x256xf32>
    %c3_297 = arith.constant 3 : index
    %c0_298 = arith.constant 0 : index
    %c0_299 = arith.constant 0 : index
    %c0_300 = arith.constant 0 : index
    %362 = vector.load %arg3[%c3_297, %c0_298, %c0_299, %c0_300] : memref<8x9x8x8xf32, #tpu.memory_space<vmem>>, vector<1x1x8x8xf32>
    %363 = vector.shape_cast %362 : vector<1x1x8x8xf32> to vector<8x8xf32>
    %c0_301 = arith.constant 0 : index
    %c0_302 = arith.constant 0 : index
    %c0_303 = arith.constant 0 : index
    %364 = vector.load %arg2[%c0_301, %c0_302, %c0_303] : memref<10x1x256xf32, #tpu.memory_space<vmem>>, vector<1x1x256xf32>
    %365 = vector.shape_cast %364 : vector<1x1x256xf32> to vector<1x256xf32>
    %366 = vector.broadcast %365 : vector<1x256xf32> to vector<8x256xf32>
    %367 = arith.mulf %366, %361 : vector<8x256xf32>
    %cst_304 = arith.constant dense<0.000000e+00> : vector<8x256xf32>
    %368 = tpu.matmul %363, %367, %cst_304 {dimension_numbers = #tpu.dot_dimension_numbers<[1], [0], [0], [1], [0, 0, 1, 1], [], []>} : vector<8x8xf32>, vector<8x256xf32>, vector<8x256xf32> -> vector<8x256xf32>
    %c16_i32_305 = arith.constant 16 : i32
    %369 = tpu.dynamic_rotate %360 by %c16_i32_305 dim 1 : vector<8x256xf32>, i32 -> vector<8x256xf32>
    %c3_306 = arith.constant 3 : index
    %c1_307 = arith.constant 1 : index
    %c0_308 = arith.constant 0 : index
    %c0_309 = arith.constant 0 : index
    %370 = vector.load %arg3[%c3_306, %c1_307, %c0_308, %c0_309] : memref<8x9x8x8xf32, #tpu.memory_space<vmem>>, vector<1x1x8x8xf32>
    %371 = vector.shape_cast %370 : vector<1x1x8x8xf32> to vector<8x8xf32>
    %c1_310 = arith.constant 1 : index
    %c0_311 = arith.constant 0 : index
    %c0_312 = arith.constant 0 : index
    %372 = vector.load %arg2[%c1_310, %c0_311, %c0_312] : memref<10x1x256xf32, #tpu.memory_space<vmem>>, vector<1x1x256xf32>
    %373 = vector.shape_cast %372 : vector<1x1x256xf32> to vector<1x256xf32>
    %374 = vector.broadcast %373 : vector<1x256xf32> to vector<8x256xf32>
    %375 = arith.mulf %374, %369 : vector<8x256xf32>
    %cst_313 = arith.constant dense<0.000000e+00> : vector<8x256xf32>
    %376 = tpu.matmul %371, %375, %cst_313 {dimension_numbers = #tpu.dot_dimension_numbers<[1], [0], [0], [1], [0, 0, 1, 1], [], []>} : vector<8x8xf32>, vector<8x256xf32>, vector<8x256xf32> -> vector<8x256xf32>
    %377 = arith.addf %368, %376 : vector<8x256xf32>
    %c15_i32_314 = arith.constant 15 : i32
    %378 = tpu.dynamic_rotate %360 by %c15_i32_314 dim 1 : vector<8x256xf32>, i32 -> vector<8x256xf32>
    %c3_315 = arith.constant 3 : index
    %c2_316 = arith.constant 2 : index
    %c0_317 = arith.constant 0 : index
    %c0_318 = arith.constant 0 : index
    %379 = vector.load %arg3[%c3_315, %c2_316, %c0_317, %c0_318] : memref<8x9x8x8xf32, #tpu.memory_space<vmem>>, vector<1x1x8x8xf32>
    %380 = vector.shape_cast %379 : vector<1x1x8x8xf32> to vector<8x8xf32>
    %c2_319 = arith.constant 2 : index
    %c0_320 = arith.constant 0 : index
    %c0_321 = arith.constant 0 : index
    %381 = vector.load %arg2[%c2_319, %c0_320, %c0_321] : memref<10x1x256xf32, #tpu.memory_space<vmem>>, vector<1x1x256xf32>
    %382 = vector.shape_cast %381 : vector<1x1x256xf32> to vector<1x256xf32>
    %383 = vector.broadcast %382 : vector<1x256xf32> to vector<8x256xf32>
    %384 = arith.mulf %383, %378 : vector<8x256xf32>
    %cst_322 = arith.constant dense<0.000000e+00> : vector<8x256xf32>
    %385 = tpu.matmul %380, %384, %cst_322 {dimension_numbers = #tpu.dot_dimension_numbers<[1], [0], [0], [1], [0, 0, 1, 1], [], []>} : vector<8x8xf32>, vector<8x256xf32>, vector<8x256xf32> -> vector<8x256xf32>
    %386 = arith.addf %377, %385 : vector<8x256xf32>
    %c1_i32_323 = arith.constant 1 : i32
    %387 = tpu.dynamic_rotate %360 by %c1_i32_323 dim 1 : vector<8x256xf32>, i32 -> vector<8x256xf32>
    %c3_324 = arith.constant 3 : index
    %c3_325 = arith.constant 3 : index
    %c0_326 = arith.constant 0 : index
    %c0_327 = arith.constant 0 : index
    %388 = vector.load %arg3[%c3_324, %c3_325, %c0_326, %c0_327] : memref<8x9x8x8xf32, #tpu.memory_space<vmem>>, vector<1x1x8x8xf32>
    %389 = vector.shape_cast %388 : vector<1x1x8x8xf32> to vector<8x8xf32>
    %c3_328 = arith.constant 3 : index
    %c0_329 = arith.constant 0 : index
    %c0_330 = arith.constant 0 : index
    %390 = vector.load %arg2[%c3_328, %c0_329, %c0_330] : memref<10x1x256xf32, #tpu.memory_space<vmem>>, vector<1x1x256xf32>
    %391 = vector.shape_cast %390 : vector<1x1x256xf32> to vector<1x256xf32>
    %392 = vector.broadcast %391 : vector<1x256xf32> to vector<8x256xf32>
    %393 = arith.mulf %392, %387 : vector<8x256xf32>
    %cst_331 = arith.constant dense<0.000000e+00> : vector<8x256xf32>
    %394 = tpu.matmul %389, %393, %cst_331 {dimension_numbers = #tpu.dot_dimension_numbers<[1], [0], [0], [1], [0, 0, 1, 1], [], []>} : vector<8x8xf32>, vector<8x256xf32>, vector<8x256xf32> -> vector<8x256xf32>
    %395 = arith.addf %386, %394 : vector<8x256xf32>
    %c3_332 = arith.constant 3 : index
    %c4_333 = arith.constant 4 : index
    %c0_334 = arith.constant 0 : index
    %c0_335 = arith.constant 0 : index
    %396 = vector.load %arg3[%c3_332, %c4_333, %c0_334, %c0_335] : memref<8x9x8x8xf32, #tpu.memory_space<vmem>>, vector<1x1x8x8xf32>
    %397 = vector.shape_cast %396 : vector<1x1x8x8xf32> to vector<8x8xf32>
    %c4_336 = arith.constant 4 : index
    %c0_337 = arith.constant 0 : index
    %c0_338 = arith.constant 0 : index
    %398 = vector.load %arg2[%c4_336, %c0_337, %c0_338] : memref<10x1x256xf32, #tpu.memory_space<vmem>>, vector<1x1x256xf32>
    %399 = vector.shape_cast %398 : vector<1x1x256xf32> to vector<1x256xf32>
    %400 = vector.broadcast %399 : vector<1x256xf32> to vector<8x256xf32>
    %401 = arith.mulf %400, %360 : vector<8x256xf32>
    %cst_339 = arith.constant dense<0.000000e+00> : vector<8x256xf32>
    %402 = tpu.matmul %397, %401, %cst_339 {dimension_numbers = #tpu.dot_dimension_numbers<[1], [0], [0], [1], [0, 0, 1, 1], [], []>} : vector<8x8xf32>, vector<8x256xf32>, vector<8x256xf32> -> vector<8x256xf32>
    %403 = arith.addf %395, %402 : vector<8x256xf32>
    %c255_i32_340 = arith.constant 255 : i32
    %404 = tpu.dynamic_rotate %360 by %c255_i32_340 dim 1 : vector<8x256xf32>, i32 -> vector<8x256xf32>
    %c3_341 = arith.constant 3 : index
    %c5_342 = arith.constant 5 : index
    %c0_343 = arith.constant 0 : index
    %c0_344 = arith.constant 0 : index
    %405 = vector.load %arg3[%c3_341, %c5_342, %c0_343, %c0_344] : memref<8x9x8x8xf32, #tpu.memory_space<vmem>>, vector<1x1x8x8xf32>
    %406 = vector.shape_cast %405 : vector<1x1x8x8xf32> to vector<8x8xf32>
    %c5_345 = arith.constant 5 : index
    %c0_346 = arith.constant 0 : index
    %c0_347 = arith.constant 0 : index
    %407 = vector.load %arg2[%c5_345, %c0_346, %c0_347] : memref<10x1x256xf32, #tpu.memory_space<vmem>>, vector<1x1x256xf32>
    %408 = vector.shape_cast %407 : vector<1x1x256xf32> to vector<1x256xf32>
    %409 = vector.broadcast %408 : vector<1x256xf32> to vector<8x256xf32>
    %410 = arith.mulf %409, %404 : vector<8x256xf32>
    %cst_348 = arith.constant dense<0.000000e+00> : vector<8x256xf32>
    %411 = tpu.matmul %406, %410, %cst_348 {dimension_numbers = #tpu.dot_dimension_numbers<[1], [0], [0], [1], [0, 0, 1, 1], [], []>} : vector<8x8xf32>, vector<8x256xf32>, vector<8x256xf32> -> vector<8x256xf32>
    %412 = arith.addf %403, %411 : vector<8x256xf32>
    %c241_i32_349 = arith.constant 241 : i32
    %413 = tpu.dynamic_rotate %360 by %c241_i32_349 dim 1 : vector<8x256xf32>, i32 -> vector<8x256xf32>
    %c3_350 = arith.constant 3 : index
    %c6_351 = arith.constant 6 : index
    %c0_352 = arith.constant 0 : index
    %c0_353 = arith.constant 0 : index
    %414 = vector.load %arg3[%c3_350, %c6_351, %c0_352, %c0_353] : memref<8x9x8x8xf32, #tpu.memory_space<vmem>>, vector<1x1x8x8xf32>
    %415 = vector.shape_cast %414 : vector<1x1x8x8xf32> to vector<8x8xf32>
    %c6_354 = arith.constant 6 : index
    %c0_355 = arith.constant 0 : index
    %c0_356 = arith.constant 0 : index
    %416 = vector.load %arg2[%c6_354, %c0_355, %c0_356] : memref<10x1x256xf32, #tpu.memory_space<vmem>>, vector<1x1x256xf32>
    %417 = vector.shape_cast %416 : vector<1x1x256xf32> to vector<1x256xf32>
    %418 = vector.broadcast %417 : vector<1x256xf32> to vector<8x256xf32>
    %419 = arith.mulf %418, %413 : vector<8x256xf32>
    %cst_357 = arith.constant dense<0.000000e+00> : vector<8x256xf32>
    %420 = tpu.matmul %415, %419, %cst_357 {dimension_numbers = #tpu.dot_dimension_numbers<[1], [0], [0], [1], [0, 0, 1, 1], [], []>} : vector<8x8xf32>, vector<8x256xf32>, vector<8x256xf32> -> vector<8x256xf32>
    %421 = arith.addf %412, %420 : vector<8x256xf32>
    %c240_i32_358 = arith.constant 240 : i32
    %422 = tpu.dynamic_rotate %360 by %c240_i32_358 dim 1 : vector<8x256xf32>, i32 -> vector<8x256xf32>
    %c3_359 = arith.constant 3 : index
    %c7_360 = arith.constant 7 : index
    %c0_361 = arith.constant 0 : index
    %c0_362 = arith.constant 0 : index
    %423 = vector.load %arg3[%c3_359, %c7_360, %c0_361, %c0_362] : memref<8x9x8x8xf32, #tpu.memory_space<vmem>>, vector<1x1x8x8xf32>
    %424 = vector.shape_cast %423 : vector<1x1x8x8xf32> to vector<8x8xf32>
    %c7_363 = arith.constant 7 : index
    %c0_364 = arith.constant 0 : index
    %c0_365 = arith.constant 0 : index
    %425 = vector.load %arg2[%c7_363, %c0_364, %c0_365] : memref<10x1x256xf32, #tpu.memory_space<vmem>>, vector<1x1x256xf32>
    %426 = vector.shape_cast %425 : vector<1x1x256xf32> to vector<1x256xf32>
    %427 = vector.broadcast %426 : vector<1x256xf32> to vector<8x256xf32>
    %428 = arith.mulf %427, %422 : vector<8x256xf32>
    %cst_366 = arith.constant dense<0.000000e+00> : vector<8x256xf32>
    %429 = tpu.matmul %424, %428, %cst_366 {dimension_numbers = #tpu.dot_dimension_numbers<[1], [0], [0], [1], [0, 0, 1, 1], [], []>} : vector<8x8xf32>, vector<8x256xf32>, vector<8x256xf32> -> vector<8x256xf32>
    %430 = arith.addf %421, %429 : vector<8x256xf32>
    %c239_i32_367 = arith.constant 239 : i32
    %431 = tpu.dynamic_rotate %360 by %c239_i32_367 dim 1 : vector<8x256xf32>, i32 -> vector<8x256xf32>
    %c3_368 = arith.constant 3 : index
    %c8_369 = arith.constant 8 : index
    %c0_370 = arith.constant 0 : index
    %c0_371 = arith.constant 0 : index
    %432 = vector.load %arg3[%c3_368, %c8_369, %c0_370, %c0_371] : memref<8x9x8x8xf32, #tpu.memory_space<vmem>>, vector<1x1x8x8xf32>
    %433 = vector.shape_cast %432 : vector<1x1x8x8xf32> to vector<8x8xf32>
    %c8_372 = arith.constant 8 : index
    %c0_373 = arith.constant 0 : index
    %c0_374 = arith.constant 0 : index
    %434 = vector.load %arg2[%c8_372, %c0_373, %c0_374] : memref<10x1x256xf32, #tpu.memory_space<vmem>>, vector<1x1x256xf32>
    %435 = vector.shape_cast %434 : vector<1x1x256xf32> to vector<1x256xf32>
    %436 = vector.broadcast %435 : vector<1x256xf32> to vector<8x256xf32>
    %437 = arith.mulf %436, %431 : vector<8x256xf32>
    %cst_375 = arith.constant dense<0.000000e+00> : vector<8x256xf32>
    %438 = tpu.matmul %433, %437, %cst_375 {dimension_numbers = #tpu.dot_dimension_numbers<[1], [0], [0], [1], [0, 0, 1, 1], [], []>} : vector<8x8xf32>, vector<8x256xf32>, vector<8x256xf32> -> vector<8x256xf32>
    %439 = arith.addf %430, %438 : vector<8x256xf32>
    %c3_376 = arith.constant 3 : index
    %c0_377 = arith.constant 0 : index
    %c0_378 = arith.constant 0 : index
    %c0_379 = arith.constant 0 : index
    %440 = vector.load %arg4[%c3_376, %c0_377, %c0_378, %c0_379] : memref<8x3x8x1xf32, #tpu.memory_space<vmem>>, vector<1x1x8x1xf32>
    %441 = vector.shape_cast %440 : vector<1x1x8x1xf32> to vector<8x1xf32>
    %442 = vector.broadcast %441 : vector<8x1xf32> to vector<8x256xf32>
    %443 = arith.addf %439, %442 : vector<8x256xf32>
    %c3_380 = arith.constant 3 : index
    %c1_381 = arith.constant 1 : index
    %c0_382 = arith.constant 0 : index
    %c0_383 = arith.constant 0 : index
    %444 = vector.load %arg4[%c3_380, %c1_381, %c0_382, %c0_383] : memref<8x3x8x1xf32, #tpu.memory_space<vmem>>, vector<1x1x8x1xf32>
    %445 = vector.shape_cast %444 : vector<1x1x8x1xf32> to vector<8x1xf32>
    %c3_384 = arith.constant 3 : index
    %c2_385 = arith.constant 2 : index
    %c0_386 = arith.constant 0 : index
    %c0_387 = arith.constant 0 : index
    %446 = vector.load %arg4[%c3_384, %c2_385, %c0_386, %c0_387] : memref<8x3x8x1xf32, #tpu.memory_space<vmem>>, vector<1x1x8x1xf32>
    %447 = vector.shape_cast %446 : vector<1x1x8x1xf32> to vector<8x1xf32>
    %cst_388 = arith.constant dense<0.000000e+00> : vector<8xf32>
    %448 = vector.multi_reduction <add>, %443, %cst_388 [1] : vector<8x256xf32> to vector<8xf32>
    %449 = vector.shape_cast %448 : vector<8xf32> to vector<8x1xf32>
    %cst_389 = arith.constant 2.560000e+02 : f32
    %450 = vector.broadcast %cst_389 : f32 to vector<8x1xf32>
    %451 = arith.divf %449, %450 : vector<8x1xf32>
    %452 = vector.broadcast %451 : vector<8x1xf32> to vector<8x256xf32>
    %453 = arith.subf %443, %452 : vector<8x256xf32>
    %454 = arith.mulf %453, %453 : vector<8x256xf32>
    %cst_390 = arith.constant dense<0.000000e+00> : vector<8xf32>
    %455 = vector.multi_reduction <add>, %454, %cst_390 [1] : vector<8x256xf32> to vector<8xf32>
    %456 = vector.shape_cast %455 : vector<8xf32> to vector<8x1xf32>
    %cst_391 = arith.constant 2.560000e+02 : f32
    %457 = vector.broadcast %cst_391 : f32 to vector<8x1xf32>
    %458 = arith.divf %456, %457 : vector<8x1xf32>
    %459 = vector.broadcast %451 : vector<8x1xf32> to vector<8x256xf32>
    %460 = arith.subf %443, %459 : vector<8x256xf32>
    %cst_392 = arith.constant 9.99999974E-6 : f32
    %461 = vector.broadcast %cst_392 : f32 to vector<8x1xf32>
    %462 = arith.addf %458, %461 : vector<8x1xf32>
    %463 = math.rsqrt %462 : vector<8x1xf32>
    %464 = vector.broadcast %463 : vector<8x1xf32> to vector<8x256xf32>
    %465 = arith.mulf %460, %464 : vector<8x256xf32>
    %466 = vector.broadcast %445 : vector<8x1xf32> to vector<8x256xf32>
    %467 = arith.mulf %465, %466 : vector<8x256xf32>
    %468 = vector.broadcast %447 : vector<8x1xf32> to vector<8x256xf32>
    %469 = arith.addf %467, %468 : vector<8x256xf32>
    %cst_393 = arith.constant 0.000000e+00 : f32
    %470 = vector.broadcast %cst_393 : f32 to vector<8x256xf32>
    %471 = arith.subf %470, %469 : vector<8x256xf32>
    %472 = math.exp %471 : vector<8x256xf32>
    %cst_394 = arith.constant 1.000000e+00 : f32
    %473 = vector.broadcast %cst_394 : f32 to vector<8x256xf32>
    %474 = arith.addf %473, %472 : vector<8x256xf32>
    %475 = tpu.reciprocal %474 {approx = true} : vector<8x256xf32> -> vector<8x256xf32>
    %476 = arith.mulf %469, %475 : vector<8x256xf32>
    %477 = arith.addf %476, %244 : vector<8x256xf32>
    %c17_i32_395 = arith.constant 17 : i32
    %478 = tpu.dynamic_rotate %477 by %c17_i32_395 dim 1 : vector<8x256xf32>, i32 -> vector<8x256xf32>
    %c4_396 = arith.constant 4 : index
    %c0_397 = arith.constant 0 : index
    %c0_398 = arith.constant 0 : index
    %c0_399 = arith.constant 0 : index
    %479 = vector.load %arg3[%c4_396, %c0_397, %c0_398, %c0_399] : memref<8x9x8x8xf32, #tpu.memory_space<vmem>>, vector<1x1x8x8xf32>
    %480 = vector.shape_cast %479 : vector<1x1x8x8xf32> to vector<8x8xf32>
    %c0_400 = arith.constant 0 : index
    %c0_401 = arith.constant 0 : index
    %c0_402 = arith.constant 0 : index
    %481 = vector.load %arg2[%c0_400, %c0_401, %c0_402] : memref<10x1x256xf32, #tpu.memory_space<vmem>>, vector<1x1x256xf32>
    %482 = vector.shape_cast %481 : vector<1x1x256xf32> to vector<1x256xf32>
    %483 = vector.broadcast %482 : vector<1x256xf32> to vector<8x256xf32>
    %484 = arith.mulf %483, %478 : vector<8x256xf32>
    %cst_403 = arith.constant dense<0.000000e+00> : vector<8x256xf32>
    %485 = tpu.matmul %480, %484, %cst_403 {dimension_numbers = #tpu.dot_dimension_numbers<[1], [0], [0], [1], [0, 0, 1, 1], [], []>} : vector<8x8xf32>, vector<8x256xf32>, vector<8x256xf32> -> vector<8x256xf32>
    %c16_i32_404 = arith.constant 16 : i32
    %486 = tpu.dynamic_rotate %477 by %c16_i32_404 dim 1 : vector<8x256xf32>, i32 -> vector<8x256xf32>
    %c4_405 = arith.constant 4 : index
    %c1_406 = arith.constant 1 : index
    %c0_407 = arith.constant 0 : index
    %c0_408 = arith.constant 0 : index
    %487 = vector.load %arg3[%c4_405, %c1_406, %c0_407, %c0_408] : memref<8x9x8x8xf32, #tpu.memory_space<vmem>>, vector<1x1x8x8xf32>
    %488 = vector.shape_cast %487 : vector<1x1x8x8xf32> to vector<8x8xf32>
    %c1_409 = arith.constant 1 : index
    %c0_410 = arith.constant 0 : index
    %c0_411 = arith.constant 0 : index
    %489 = vector.load %arg2[%c1_409, %c0_410, %c0_411] : memref<10x1x256xf32, #tpu.memory_space<vmem>>, vector<1x1x256xf32>
    %490 = vector.shape_cast %489 : vector<1x1x256xf32> to vector<1x256xf32>
    %491 = vector.broadcast %490 : vector<1x256xf32> to vector<8x256xf32>
    %492 = arith.mulf %491, %486 : vector<8x256xf32>
    %cst_412 = arith.constant dense<0.000000e+00> : vector<8x256xf32>
    %493 = tpu.matmul %488, %492, %cst_412 {dimension_numbers = #tpu.dot_dimension_numbers<[1], [0], [0], [1], [0, 0, 1, 1], [], []>} : vector<8x8xf32>, vector<8x256xf32>, vector<8x256xf32> -> vector<8x256xf32>
    %494 = arith.addf %485, %493 : vector<8x256xf32>
    %c15_i32_413 = arith.constant 15 : i32
    %495 = tpu.dynamic_rotate %477 by %c15_i32_413 dim 1 : vector<8x256xf32>, i32 -> vector<8x256xf32>
    %c4_414 = arith.constant 4 : index
    %c2_415 = arith.constant 2 : index
    %c0_416 = arith.constant 0 : index
    %c0_417 = arith.constant 0 : index
    %496 = vector.load %arg3[%c4_414, %c2_415, %c0_416, %c0_417] : memref<8x9x8x8xf32, #tpu.memory_space<vmem>>, vector<1x1x8x8xf32>
    %497 = vector.shape_cast %496 : vector<1x1x8x8xf32> to vector<8x8xf32>
    %c2_418 = arith.constant 2 : index
    %c0_419 = arith.constant 0 : index
    %c0_420 = arith.constant 0 : index
    %498 = vector.load %arg2[%c2_418, %c0_419, %c0_420] : memref<10x1x256xf32, #tpu.memory_space<vmem>>, vector<1x1x256xf32>
    %499 = vector.shape_cast %498 : vector<1x1x256xf32> to vector<1x256xf32>
    %500 = vector.broadcast %499 : vector<1x256xf32> to vector<8x256xf32>
    %501 = arith.mulf %500, %495 : vector<8x256xf32>
    %cst_421 = arith.constant dense<0.000000e+00> : vector<8x256xf32>
    %502 = tpu.matmul %497, %501, %cst_421 {dimension_numbers = #tpu.dot_dimension_numbers<[1], [0], [0], [1], [0, 0, 1, 1], [], []>} : vector<8x8xf32>, vector<8x256xf32>, vector<8x256xf32> -> vector<8x256xf32>
    %503 = arith.addf %494, %502 : vector<8x256xf32>
    %c1_i32_422 = arith.constant 1 : i32
    %504 = tpu.dynamic_rotate %477 by %c1_i32_422 dim 1 : vector<8x256xf32>, i32 -> vector<8x256xf32>
    %c4_423 = arith.constant 4 : index
    %c3_424 = arith.constant 3 : index
    %c0_425 = arith.constant 0 : index
    %c0_426 = arith.constant 0 : index
    %505 = vector.load %arg3[%c4_423, %c3_424, %c0_425, %c0_426] : memref<8x9x8x8xf32, #tpu.memory_space<vmem>>, vector<1x1x8x8xf32>
    %506 = vector.shape_cast %505 : vector<1x1x8x8xf32> to vector<8x8xf32>
    %c3_427 = arith.constant 3 : index
    %c0_428 = arith.constant 0 : index
    %c0_429 = arith.constant 0 : index
    %507 = vector.load %arg2[%c3_427, %c0_428, %c0_429] : memref<10x1x256xf32, #tpu.memory_space<vmem>>, vector<1x1x256xf32>
    %508 = vector.shape_cast %507 : vector<1x1x256xf32> to vector<1x256xf32>
    %509 = vector.broadcast %508 : vector<1x256xf32> to vector<8x256xf32>
    %510 = arith.mulf %509, %504 : vector<8x256xf32>
    %cst_430 = arith.constant dense<0.000000e+00> : vector<8x256xf32>
    %511 = tpu.matmul %506, %510, %cst_430 {dimension_numbers = #tpu.dot_dimension_numbers<[1], [0], [0], [1], [0, 0, 1, 1], [], []>} : vector<8x8xf32>, vector<8x256xf32>, vector<8x256xf32> -> vector<8x256xf32>
    %512 = arith.addf %503, %511 : vector<8x256xf32>
    %c4_431 = arith.constant 4 : index
    %c4_432 = arith.constant 4 : index
    %c0_433 = arith.constant 0 : index
    %c0_434 = arith.constant 0 : index
    %513 = vector.load %arg3[%c4_431, %c4_432, %c0_433, %c0_434] : memref<8x9x8x8xf32, #tpu.memory_space<vmem>>, vector<1x1x8x8xf32>
    %514 = vector.shape_cast %513 : vector<1x1x8x8xf32> to vector<8x8xf32>
    %c4_435 = arith.constant 4 : index
    %c0_436 = arith.constant 0 : index
    %c0_437 = arith.constant 0 : index
    %515 = vector.load %arg2[%c4_435, %c0_436, %c0_437] : memref<10x1x256xf32, #tpu.memory_space<vmem>>, vector<1x1x256xf32>
    %516 = vector.shape_cast %515 : vector<1x1x256xf32> to vector<1x256xf32>
    %517 = vector.broadcast %516 : vector<1x256xf32> to vector<8x256xf32>
    %518 = arith.mulf %517, %477 : vector<8x256xf32>
    %cst_438 = arith.constant dense<0.000000e+00> : vector<8x256xf32>
    %519 = tpu.matmul %514, %518, %cst_438 {dimension_numbers = #tpu.dot_dimension_numbers<[1], [0], [0], [1], [0, 0, 1, 1], [], []>} : vector<8x8xf32>, vector<8x256xf32>, vector<8x256xf32> -> vector<8x256xf32>
    %520 = arith.addf %512, %519 : vector<8x256xf32>
    %c255_i32_439 = arith.constant 255 : i32
    %521 = tpu.dynamic_rotate %477 by %c255_i32_439 dim 1 : vector<8x256xf32>, i32 -> vector<8x256xf32>
    %c4_440 = arith.constant 4 : index
    %c5_441 = arith.constant 5 : index
    %c0_442 = arith.constant 0 : index
    %c0_443 = arith.constant 0 : index
    %522 = vector.load %arg3[%c4_440, %c5_441, %c0_442, %c0_443] : memref<8x9x8x8xf32, #tpu.memory_space<vmem>>, vector<1x1x8x8xf32>
    %523 = vector.shape_cast %522 : vector<1x1x8x8xf32> to vector<8x8xf32>
    %c5_444 = arith.constant 5 : index
    %c0_445 = arith.constant 0 : index
    %c0_446 = arith.constant 0 : index
    %524 = vector.load %arg2[%c5_444, %c0_445, %c0_446] : memref<10x1x256xf32, #tpu.memory_space<vmem>>, vector<1x1x256xf32>
    %525 = vector.shape_cast %524 : vector<1x1x256xf32> to vector<1x256xf32>
    %526 = vector.broadcast %525 : vector<1x256xf32> to vector<8x256xf32>
    %527 = arith.mulf %526, %521 : vector<8x256xf32>
    %cst_447 = arith.constant dense<0.000000e+00> : vector<8x256xf32>
    %528 = tpu.matmul %523, %527, %cst_447 {dimension_numbers = #tpu.dot_dimension_numbers<[1], [0], [0], [1], [0, 0, 1, 1], [], []>} : vector<8x8xf32>, vector<8x256xf32>, vector<8x256xf32> -> vector<8x256xf32>
    %529 = arith.addf %520, %528 : vector<8x256xf32>
    %c241_i32_448 = arith.constant 241 : i32
    %530 = tpu.dynamic_rotate %477 by %c241_i32_448 dim 1 : vector<8x256xf32>, i32 -> vector<8x256xf32>
    %c4_449 = arith.constant 4 : index
    %c6_450 = arith.constant 6 : index
    %c0_451 = arith.constant 0 : index
    %c0_452 = arith.constant 0 : index
    %531 = vector.load %arg3[%c4_449, %c6_450, %c0_451, %c0_452] : memref<8x9x8x8xf32, #tpu.memory_space<vmem>>, vector<1x1x8x8xf32>
    %532 = vector.shape_cast %531 : vector<1x1x8x8xf32> to vector<8x8xf32>
    %c6_453 = arith.constant 6 : index
    %c0_454 = arith.constant 0 : index
    %c0_455 = arith.constant 0 : index
    %533 = vector.load %arg2[%c6_453, %c0_454, %c0_455] : memref<10x1x256xf32, #tpu.memory_space<vmem>>, vector<1x1x256xf32>
    %534 = vector.shape_cast %533 : vector<1x1x256xf32> to vector<1x256xf32>
    %535 = vector.broadcast %534 : vector<1x256xf32> to vector<8x256xf32>
    %536 = arith.mulf %535, %530 : vector<8x256xf32>
    %cst_456 = arith.constant dense<0.000000e+00> : vector<8x256xf32>
    %537 = tpu.matmul %532, %536, %cst_456 {dimension_numbers = #tpu.dot_dimension_numbers<[1], [0], [0], [1], [0, 0, 1, 1], [], []>} : vector<8x8xf32>, vector<8x256xf32>, vector<8x256xf32> -> vector<8x256xf32>
    %538 = arith.addf %529, %537 : vector<8x256xf32>
    %c240_i32_457 = arith.constant 240 : i32
    %539 = tpu.dynamic_rotate %477 by %c240_i32_457 dim 1 : vector<8x256xf32>, i32 -> vector<8x256xf32>
    %c4_458 = arith.constant 4 : index
    %c7_459 = arith.constant 7 : index
    %c0_460 = arith.constant 0 : index
    %c0_461 = arith.constant 0 : index
    %540 = vector.load %arg3[%c4_458, %c7_459, %c0_460, %c0_461] : memref<8x9x8x8xf32, #tpu.memory_space<vmem>>, vector<1x1x8x8xf32>
    %541 = vector.shape_cast %540 : vector<1x1x8x8xf32> to vector<8x8xf32>
    %c7_462 = arith.constant 7 : index
    %c0_463 = arith.constant 0 : index
    %c0_464 = arith.constant 0 : index
    %542 = vector.load %arg2[%c7_462, %c0_463, %c0_464] : memref<10x1x256xf32, #tpu.memory_space<vmem>>, vector<1x1x256xf32>
    %543 = vector.shape_cast %542 : vector<1x1x256xf32> to vector<1x256xf32>
    %544 = vector.broadcast %543 : vector<1x256xf32> to vector<8x256xf32>
    %545 = arith.mulf %544, %539 : vector<8x256xf32>
    %cst_465 = arith.constant dense<0.000000e+00> : vector<8x256xf32>
    %546 = tpu.matmul %541, %545, %cst_465 {dimension_numbers = #tpu.dot_dimension_numbers<[1], [0], [0], [1], [0, 0, 1, 1], [], []>} : vector<8x8xf32>, vector<8x256xf32>, vector<8x256xf32> -> vector<8x256xf32>
    %547 = arith.addf %538, %546 : vector<8x256xf32>
    %c239_i32_466 = arith.constant 239 : i32
    %548 = tpu.dynamic_rotate %477 by %c239_i32_466 dim 1 : vector<8x256xf32>, i32 -> vector<8x256xf32>
    %c4_467 = arith.constant 4 : index
    %c8_468 = arith.constant 8 : index
    %c0_469 = arith.constant 0 : index
    %c0_470 = arith.constant 0 : index
    %549 = vector.load %arg3[%c4_467, %c8_468, %c0_469, %c0_470] : memref<8x9x8x8xf32, #tpu.memory_space<vmem>>, vector<1x1x8x8xf32>
    %550 = vector.shape_cast %549 : vector<1x1x8x8xf32> to vector<8x8xf32>
    %c8_471 = arith.constant 8 : index
    %c0_472 = arith.constant 0 : index
    %c0_473 = arith.constant 0 : index
    %551 = vector.load %arg2[%c8_471, %c0_472, %c0_473] : memref<10x1x256xf32, #tpu.memory_space<vmem>>, vector<1x1x256xf32>
    %552 = vector.shape_cast %551 : vector<1x1x256xf32> to vector<1x256xf32>
    %553 = vector.broadcast %552 : vector<1x256xf32> to vector<8x256xf32>
    %554 = arith.mulf %553, %548 : vector<8x256xf32>
    %cst_474 = arith.constant dense<0.000000e+00> : vector<8x256xf32>
    %555 = tpu.matmul %550, %554, %cst_474 {dimension_numbers = #tpu.dot_dimension_numbers<[1], [0], [0], [1], [0, 0, 1, 1], [], []>} : vector<8x8xf32>, vector<8x256xf32>, vector<8x256xf32> -> vector<8x256xf32>
    %556 = arith.addf %547, %555 : vector<8x256xf32>
    %c4_475 = arith.constant 4 : index
    %c0_476 = arith.constant 0 : index
    %c0_477 = arith.constant 0 : index
    %c0_478 = arith.constant 0 : index
    %557 = vector.load %arg4[%c4_475, %c0_476, %c0_477, %c0_478] : memref<8x3x8x1xf32, #tpu.memory_space<vmem>>, vector<1x1x8x1xf32>
    %558 = vector.shape_cast %557 : vector<1x1x8x1xf32> to vector<8x1xf32>
    %559 = vector.broadcast %558 : vector<8x1xf32> to vector<8x256xf32>
    %560 = arith.addf %556, %559 : vector<8x256xf32>
    %c4_479 = arith.constant 4 : index
    %c1_480 = arith.constant 1 : index
    %c0_481 = arith.constant 0 : index
    %c0_482 = arith.constant 0 : index
    %561 = vector.load %arg4[%c4_479, %c1_480, %c0_481, %c0_482] : memref<8x3x8x1xf32, #tpu.memory_space<vmem>>, vector<1x1x8x1xf32>
    %562 = vector.shape_cast %561 : vector<1x1x8x1xf32> to vector<8x1xf32>
    %c4_483 = arith.constant 4 : index
    %c2_484 = arith.constant 2 : index
    %c0_485 = arith.constant 0 : index
    %c0_486 = arith.constant 0 : index
    %563 = vector.load %arg4[%c4_483, %c2_484, %c0_485, %c0_486] : memref<8x3x8x1xf32, #tpu.memory_space<vmem>>, vector<1x1x8x1xf32>
    %564 = vector.shape_cast %563 : vector<1x1x8x1xf32> to vector<8x1xf32>
    %cst_487 = arith.constant dense<0.000000e+00> : vector<8xf32>
    %565 = vector.multi_reduction <add>, %560, %cst_487 [1] : vector<8x256xf32> to vector<8xf32>
    %566 = vector.shape_cast %565 : vector<8xf32> to vector<8x1xf32>
    %cst_488 = arith.constant 2.560000e+02 : f32
    %567 = vector.broadcast %cst_488 : f32 to vector<8x1xf32>
    %568 = arith.divf %566, %567 : vector<8x1xf32>
    %569 = vector.broadcast %568 : vector<8x1xf32> to vector<8x256xf32>
    %570 = arith.subf %560, %569 : vector<8x256xf32>
    %571 = arith.mulf %570, %570 : vector<8x256xf32>
    %cst_489 = arith.constant dense<0.000000e+00> : vector<8xf32>
    %572 = vector.multi_reduction <add>, %571, %cst_489 [1] : vector<8x256xf32> to vector<8xf32>
    %573 = vector.shape_cast %572 : vector<8xf32> to vector<8x1xf32>
    %cst_490 = arith.constant 2.560000e+02 : f32
    %574 = vector.broadcast %cst_490 : f32 to vector<8x1xf32>
    %575 = arith.divf %573, %574 : vector<8x1xf32>
    %576 = vector.broadcast %568 : vector<8x1xf32> to vector<8x256xf32>
    %577 = arith.subf %560, %576 : vector<8x256xf32>
    %cst_491 = arith.constant 9.99999974E-6 : f32
    %578 = vector.broadcast %cst_491 : f32 to vector<8x1xf32>
    %579 = arith.addf %575, %578 : vector<8x1xf32>
    %580 = math.rsqrt %579 : vector<8x1xf32>
    %581 = vector.broadcast %580 : vector<8x1xf32> to vector<8x256xf32>
    %582 = arith.mulf %577, %581 : vector<8x256xf32>
    %583 = vector.broadcast %562 : vector<8x1xf32> to vector<8x256xf32>
    %584 = arith.mulf %582, %583 : vector<8x256xf32>
    %585 = vector.broadcast %564 : vector<8x1xf32> to vector<8x256xf32>
    %586 = arith.addf %584, %585 : vector<8x256xf32>
    %cst_492 = arith.constant 0.000000e+00 : f32
    %587 = vector.broadcast %cst_492 : f32 to vector<8x256xf32>
    %588 = arith.subf %587, %586 : vector<8x256xf32>
    %589 = math.exp %588 : vector<8x256xf32>
    %cst_493 = arith.constant 1.000000e+00 : f32
    %590 = vector.broadcast %cst_493 : f32 to vector<8x256xf32>
    %591 = arith.addf %590, %589 : vector<8x256xf32>
    %592 = tpu.reciprocal %591 {approx = true} : vector<8x256xf32> -> vector<8x256xf32>
    %593 = arith.mulf %586, %592 : vector<8x256xf32>
    %c17_i32_494 = arith.constant 17 : i32
    %594 = tpu.dynamic_rotate %593 by %c17_i32_494 dim 1 : vector<8x256xf32>, i32 -> vector<8x256xf32>
    %c5_495 = arith.constant 5 : index
    %c0_496 = arith.constant 0 : index
    %c0_497 = arith.constant 0 : index
    %c0_498 = arith.constant 0 : index
    %595 = vector.load %arg3[%c5_495, %c0_496, %c0_497, %c0_498] : memref<8x9x8x8xf32, #tpu.memory_space<vmem>>, vector<1x1x8x8xf32>
    %596 = vector.shape_cast %595 : vector<1x1x8x8xf32> to vector<8x8xf32>
    %c0_499 = arith.constant 0 : index
    %c0_500 = arith.constant 0 : index
    %c0_501 = arith.constant 0 : index
    %597 = vector.load %arg2[%c0_499, %c0_500, %c0_501] : memref<10x1x256xf32, #tpu.memory_space<vmem>>, vector<1x1x256xf32>
    %598 = vector.shape_cast %597 : vector<1x1x256xf32> to vector<1x256xf32>
    %599 = vector.broadcast %598 : vector<1x256xf32> to vector<8x256xf32>
    %600 = arith.mulf %599, %594 : vector<8x256xf32>
    %cst_502 = arith.constant dense<0.000000e+00> : vector<8x256xf32>
    %601 = tpu.matmul %596, %600, %cst_502 {dimension_numbers = #tpu.dot_dimension_numbers<[1], [0], [0], [1], [0, 0, 1, 1], [], []>} : vector<8x8xf32>, vector<8x256xf32>, vector<8x256xf32> -> vector<8x256xf32>
    %c16_i32_503 = arith.constant 16 : i32
    %602 = tpu.dynamic_rotate %593 by %c16_i32_503 dim 1 : vector<8x256xf32>, i32 -> vector<8x256xf32>
    %c5_504 = arith.constant 5 : index
    %c1_505 = arith.constant 1 : index
    %c0_506 = arith.constant 0 : index
    %c0_507 = arith.constant 0 : index
    %603 = vector.load %arg3[%c5_504, %c1_505, %c0_506, %c0_507] : memref<8x9x8x8xf32, #tpu.memory_space<vmem>>, vector<1x1x8x8xf32>
    %604 = vector.shape_cast %603 : vector<1x1x8x8xf32> to vector<8x8xf32>
    %c1_508 = arith.constant 1 : index
    %c0_509 = arith.constant 0 : index
    %c0_510 = arith.constant 0 : index
    %605 = vector.load %arg2[%c1_508, %c0_509, %c0_510] : memref<10x1x256xf32, #tpu.memory_space<vmem>>, vector<1x1x256xf32>
    %606 = vector.shape_cast %605 : vector<1x1x256xf32> to vector<1x256xf32>
    %607 = vector.broadcast %606 : vector<1x256xf32> to vector<8x256xf32>
    %608 = arith.mulf %607, %602 : vector<8x256xf32>
    %cst_511 = arith.constant dense<0.000000e+00> : vector<8x256xf32>
    %609 = tpu.matmul %604, %608, %cst_511 {dimension_numbers = #tpu.dot_dimension_numbers<[1], [0], [0], [1], [0, 0, 1, 1], [], []>} : vector<8x8xf32>, vector<8x256xf32>, vector<8x256xf32> -> vector<8x256xf32>
    %610 = arith.addf %601, %609 : vector<8x256xf32>
    %c15_i32_512 = arith.constant 15 : i32
    %611 = tpu.dynamic_rotate %593 by %c15_i32_512 dim 1 : vector<8x256xf32>, i32 -> vector<8x256xf32>
    %c5_513 = arith.constant 5 : index
    %c2_514 = arith.constant 2 : index
    %c0_515 = arith.constant 0 : index
    %c0_516 = arith.constant 0 : index
    %612 = vector.load %arg3[%c5_513, %c2_514, %c0_515, %c0_516] : memref<8x9x8x8xf32, #tpu.memory_space<vmem>>, vector<1x1x8x8xf32>
    %613 = vector.shape_cast %612 : vector<1x1x8x8xf32> to vector<8x8xf32>
    %c2_517 = arith.constant 2 : index
    %c0_518 = arith.constant 0 : index
    %c0_519 = arith.constant 0 : index
    %614 = vector.load %arg2[%c2_517, %c0_518, %c0_519] : memref<10x1x256xf32, #tpu.memory_space<vmem>>, vector<1x1x256xf32>
    %615 = vector.shape_cast %614 : vector<1x1x256xf32> to vector<1x256xf32>
    %616 = vector.broadcast %615 : vector<1x256xf32> to vector<8x256xf32>
    %617 = arith.mulf %616, %611 : vector<8x256xf32>
    %cst_520 = arith.constant dense<0.000000e+00> : vector<8x256xf32>
    %618 = tpu.matmul %613, %617, %cst_520 {dimension_numbers = #tpu.dot_dimension_numbers<[1], [0], [0], [1], [0, 0, 1, 1], [], []>} : vector<8x8xf32>, vector<8x256xf32>, vector<8x256xf32> -> vector<8x256xf32>
    %619 = arith.addf %610, %618 : vector<8x256xf32>
    %c1_i32_521 = arith.constant 1 : i32
    %620 = tpu.dynamic_rotate %593 by %c1_i32_521 dim 1 : vector<8x256xf32>, i32 -> vector<8x256xf32>
    %c5_522 = arith.constant 5 : index
    %c3_523 = arith.constant 3 : index
    %c0_524 = arith.constant 0 : index
    %c0_525 = arith.constant 0 : index
    %621 = vector.load %arg3[%c5_522, %c3_523, %c0_524, %c0_525] : memref<8x9x8x8xf32, #tpu.memory_space<vmem>>, vector<1x1x8x8xf32>
    %622 = vector.shape_cast %621 : vector<1x1x8x8xf32> to vector<8x8xf32>
    %c3_526 = arith.constant 3 : index
    %c0_527 = arith.constant 0 : index
    %c0_528 = arith.constant 0 : index
    %623 = vector.load %arg2[%c3_526, %c0_527, %c0_528] : memref<10x1x256xf32, #tpu.memory_space<vmem>>, vector<1x1x256xf32>
    %624 = vector.shape_cast %623 : vector<1x1x256xf32> to vector<1x256xf32>
    %625 = vector.broadcast %624 : vector<1x256xf32> to vector<8x256xf32>
    %626 = arith.mulf %625, %620 : vector<8x256xf32>
    %cst_529 = arith.constant dense<0.000000e+00> : vector<8x256xf32>
    %627 = tpu.matmul %622, %626, %cst_529 {dimension_numbers = #tpu.dot_dimension_numbers<[1], [0], [0], [1], [0, 0, 1, 1], [], []>} : vector<8x8xf32>, vector<8x256xf32>, vector<8x256xf32> -> vector<8x256xf32>
    %628 = arith.addf %619, %627 : vector<8x256xf32>
    %c5_530 = arith.constant 5 : index
    %c4_531 = arith.constant 4 : index
    %c0_532 = arith.constant 0 : index
    %c0_533 = arith.constant 0 : index
    %629 = vector.load %arg3[%c5_530, %c4_531, %c0_532, %c0_533] : memref<8x9x8x8xf32, #tpu.memory_space<vmem>>, vector<1x1x8x8xf32>
    %630 = vector.shape_cast %629 : vector<1x1x8x8xf32> to vector<8x8xf32>
    %c4_534 = arith.constant 4 : index
    %c0_535 = arith.constant 0 : index
    %c0_536 = arith.constant 0 : index
    %631 = vector.load %arg2[%c4_534, %c0_535, %c0_536] : memref<10x1x256xf32, #tpu.memory_space<vmem>>, vector<1x1x256xf32>
    %632 = vector.shape_cast %631 : vector<1x1x256xf32> to vector<1x256xf32>
    %633 = vector.broadcast %632 : vector<1x256xf32> to vector<8x256xf32>
    %634 = arith.mulf %633, %593 : vector<8x256xf32>
    %cst_537 = arith.constant dense<0.000000e+00> : vector<8x256xf32>
    %635 = tpu.matmul %630, %634, %cst_537 {dimension_numbers = #tpu.dot_dimension_numbers<[1], [0], [0], [1], [0, 0, 1, 1], [], []>} : vector<8x8xf32>, vector<8x256xf32>, vector<8x256xf32> -> vector<8x256xf32>
    %636 = arith.addf %628, %635 : vector<8x256xf32>
    %c255_i32_538 = arith.constant 255 : i32
    %637 = tpu.dynamic_rotate %593 by %c255_i32_538 dim 1 : vector<8x256xf32>, i32 -> vector<8x256xf32>
    %c5_539 = arith.constant 5 : index
    %c5_540 = arith.constant 5 : index
    %c0_541 = arith.constant 0 : index
    %c0_542 = arith.constant 0 : index
    %638 = vector.load %arg3[%c5_539, %c5_540, %c0_541, %c0_542] : memref<8x9x8x8xf32, #tpu.memory_space<vmem>>, vector<1x1x8x8xf32>
    %639 = vector.shape_cast %638 : vector<1x1x8x8xf32> to vector<8x8xf32>
    %c5_543 = arith.constant 5 : index
    %c0_544 = arith.constant 0 : index
    %c0_545 = arith.constant 0 : index
    %640 = vector.load %arg2[%c5_543, %c0_544, %c0_545] : memref<10x1x256xf32, #tpu.memory_space<vmem>>, vector<1x1x256xf32>
    %641 = vector.shape_cast %640 : vector<1x1x256xf32> to vector<1x256xf32>
    %642 = vector.broadcast %641 : vector<1x256xf32> to vector<8x256xf32>
    %643 = arith.mulf %642, %637 : vector<8x256xf32>
    %cst_546 = arith.constant dense<0.000000e+00> : vector<8x256xf32>
    %644 = tpu.matmul %639, %643, %cst_546 {dimension_numbers = #tpu.dot_dimension_numbers<[1], [0], [0], [1], [0, 0, 1, 1], [], []>} : vector<8x8xf32>, vector<8x256xf32>, vector<8x256xf32> -> vector<8x256xf32>
    %645 = arith.addf %636, %644 : vector<8x256xf32>
    %c241_i32_547 = arith.constant 241 : i32
    %646 = tpu.dynamic_rotate %593 by %c241_i32_547 dim 1 : vector<8x256xf32>, i32 -> vector<8x256xf32>
    %c5_548 = arith.constant 5 : index
    %c6_549 = arith.constant 6 : index
    %c0_550 = arith.constant 0 : index
    %c0_551 = arith.constant 0 : index
    %647 = vector.load %arg3[%c5_548, %c6_549, %c0_550, %c0_551] : memref<8x9x8x8xf32, #tpu.memory_space<vmem>>, vector<1x1x8x8xf32>
    %648 = vector.shape_cast %647 : vector<1x1x8x8xf32> to vector<8x8xf32>
    %c6_552 = arith.constant 6 : index
    %c0_553 = arith.constant 0 : index
    %c0_554 = arith.constant 0 : index
    %649 = vector.load %arg2[%c6_552, %c0_553, %c0_554] : memref<10x1x256xf32, #tpu.memory_space<vmem>>, vector<1x1x256xf32>
    %650 = vector.shape_cast %649 : vector<1x1x256xf32> to vector<1x256xf32>
    %651 = vector.broadcast %650 : vector<1x256xf32> to vector<8x256xf32>
    %652 = arith.mulf %651, %646 : vector<8x256xf32>
    %cst_555 = arith.constant dense<0.000000e+00> : vector<8x256xf32>
    %653 = tpu.matmul %648, %652, %cst_555 {dimension_numbers = #tpu.dot_dimension_numbers<[1], [0], [0], [1], [0, 0, 1, 1], [], []>} : vector<8x8xf32>, vector<8x256xf32>, vector<8x256xf32> -> vector<8x256xf32>
    %654 = arith.addf %645, %653 : vector<8x256xf32>
    %c240_i32_556 = arith.constant 240 : i32
    %655 = tpu.dynamic_rotate %593 by %c240_i32_556 dim 1 : vector<8x256xf32>, i32 -> vector<8x256xf32>
    %c5_557 = arith.constant 5 : index
    %c7_558 = arith.constant 7 : index
    %c0_559 = arith.constant 0 : index
    %c0_560 = arith.constant 0 : index
    %656 = vector.load %arg3[%c5_557, %c7_558, %c0_559, %c0_560] : memref<8x9x8x8xf32, #tpu.memory_space<vmem>>, vector<1x1x8x8xf32>
    %657 = vector.shape_cast %656 : vector<1x1x8x8xf32> to vector<8x8xf32>
    %c7_561 = arith.constant 7 : index
    %c0_562 = arith.constant 0 : index
    %c0_563 = arith.constant 0 : index
    %658 = vector.load %arg2[%c7_561, %c0_562, %c0_563] : memref<10x1x256xf32, #tpu.memory_space<vmem>>, vector<1x1x256xf32>
    %659 = vector.shape_cast %658 : vector<1x1x256xf32> to vector<1x256xf32>
    %660 = vector.broadcast %659 : vector<1x256xf32> to vector<8x256xf32>
    %661 = arith.mulf %660, %655 : vector<8x256xf32>
    %cst_564 = arith.constant dense<0.000000e+00> : vector<8x256xf32>
    %662 = tpu.matmul %657, %661, %cst_564 {dimension_numbers = #tpu.dot_dimension_numbers<[1], [0], [0], [1], [0, 0, 1, 1], [], []>} : vector<8x8xf32>, vector<8x256xf32>, vector<8x256xf32> -> vector<8x256xf32>
    %663 = arith.addf %654, %662 : vector<8x256xf32>
    %c239_i32_565 = arith.constant 239 : i32
    %664 = tpu.dynamic_rotate %593 by %c239_i32_565 dim 1 : vector<8x256xf32>, i32 -> vector<8x256xf32>
    %c5_566 = arith.constant 5 : index
    %c8_567 = arith.constant 8 : index
    %c0_568 = arith.constant 0 : index
    %c0_569 = arith.constant 0 : index
    %665 = vector.load %arg3[%c5_566, %c8_567, %c0_568, %c0_569] : memref<8x9x8x8xf32, #tpu.memory_space<vmem>>, vector<1x1x8x8xf32>
    %666 = vector.shape_cast %665 : vector<1x1x8x8xf32> to vector<8x8xf32>
    %c8_570 = arith.constant 8 : index
    %c0_571 = arith.constant 0 : index
    %c0_572 = arith.constant 0 : index
    %667 = vector.load %arg2[%c8_570, %c0_571, %c0_572] : memref<10x1x256xf32, #tpu.memory_space<vmem>>, vector<1x1x256xf32>
    %668 = vector.shape_cast %667 : vector<1x1x256xf32> to vector<1x256xf32>
    %669 = vector.broadcast %668 : vector<1x256xf32> to vector<8x256xf32>
    %670 = arith.mulf %669, %664 : vector<8x256xf32>
    %cst_573 = arith.constant dense<0.000000e+00> : vector<8x256xf32>
    %671 = tpu.matmul %666, %670, %cst_573 {dimension_numbers = #tpu.dot_dimension_numbers<[1], [0], [0], [1], [0, 0, 1, 1], [], []>} : vector<8x8xf32>, vector<8x256xf32>, vector<8x256xf32> -> vector<8x256xf32>
    %672 = arith.addf %663, %671 : vector<8x256xf32>
    %c5_574 = arith.constant 5 : index
    %c0_575 = arith.constant 0 : index
    %c0_576 = arith.constant 0 : index
    %c0_577 = arith.constant 0 : index
    %673 = vector.load %arg4[%c5_574, %c0_575, %c0_576, %c0_577] : memref<8x3x8x1xf32, #tpu.memory_space<vmem>>, vector<1x1x8x1xf32>
    %674 = vector.shape_cast %673 : vector<1x1x8x1xf32> to vector<8x1xf32>
    %675 = vector.broadcast %674 : vector<8x1xf32> to vector<8x256xf32>
    %676 = arith.addf %672, %675 : vector<8x256xf32>
    %c5_578 = arith.constant 5 : index
    %c1_579 = arith.constant 1 : index
    %c0_580 = arith.constant 0 : index
    %c0_581 = arith.constant 0 : index
    %677 = vector.load %arg4[%c5_578, %c1_579, %c0_580, %c0_581] : memref<8x3x8x1xf32, #tpu.memory_space<vmem>>, vector<1x1x8x1xf32>
    %678 = vector.shape_cast %677 : vector<1x1x8x1xf32> to vector<8x1xf32>
    %c5_582 = arith.constant 5 : index
    %c2_583 = arith.constant 2 : index
    %c0_584 = arith.constant 0 : index
    %c0_585 = arith.constant 0 : index
    %679 = vector.load %arg4[%c5_582, %c2_583, %c0_584, %c0_585] : memref<8x3x8x1xf32, #tpu.memory_space<vmem>>, vector<1x1x8x1xf32>
    %680 = vector.shape_cast %679 : vector<1x1x8x1xf32> to vector<8x1xf32>
    %cst_586 = arith.constant dense<0.000000e+00> : vector<8xf32>
    %681 = vector.multi_reduction <add>, %676, %cst_586 [1] : vector<8x256xf32> to vector<8xf32>
    %682 = vector.shape_cast %681 : vector<8xf32> to vector<8x1xf32>
    %cst_587 = arith.constant 2.560000e+02 : f32
    %683 = vector.broadcast %cst_587 : f32 to vector<8x1xf32>
    %684 = arith.divf %682, %683 : vector<8x1xf32>
    %685 = vector.broadcast %684 : vector<8x1xf32> to vector<8x256xf32>
    %686 = arith.subf %676, %685 : vector<8x256xf32>
    %687 = arith.mulf %686, %686 : vector<8x256xf32>
    %cst_588 = arith.constant dense<0.000000e+00> : vector<8xf32>
    %688 = vector.multi_reduction <add>, %687, %cst_588 [1] : vector<8x256xf32> to vector<8xf32>
    %689 = vector.shape_cast %688 : vector<8xf32> to vector<8x1xf32>
    %cst_589 = arith.constant 2.560000e+02 : f32
    %690 = vector.broadcast %cst_589 : f32 to vector<8x1xf32>
    %691 = arith.divf %689, %690 : vector<8x1xf32>
    %692 = vector.broadcast %684 : vector<8x1xf32> to vector<8x256xf32>
    %693 = arith.subf %676, %692 : vector<8x256xf32>
    %cst_590 = arith.constant 9.99999974E-6 : f32
    %694 = vector.broadcast %cst_590 : f32 to vector<8x1xf32>
    %695 = arith.addf %691, %694 : vector<8x1xf32>
    %696 = math.rsqrt %695 : vector<8x1xf32>
    %697 = vector.broadcast %696 : vector<8x1xf32> to vector<8x256xf32>
    %698 = arith.mulf %693, %697 : vector<8x256xf32>
    %699 = vector.broadcast %678 : vector<8x1xf32> to vector<8x256xf32>
    %700 = arith.mulf %698, %699 : vector<8x256xf32>
    %701 = vector.broadcast %680 : vector<8x1xf32> to vector<8x256xf32>
    %702 = arith.addf %700, %701 : vector<8x256xf32>
    %cst_591 = arith.constant 0.000000e+00 : f32
    %703 = vector.broadcast %cst_591 : f32 to vector<8x256xf32>
    %704 = arith.subf %703, %702 : vector<8x256xf32>
    %705 = math.exp %704 : vector<8x256xf32>
    %cst_592 = arith.constant 1.000000e+00 : f32
    %706 = vector.broadcast %cst_592 : f32 to vector<8x256xf32>
    %707 = arith.addf %706, %705 : vector<8x256xf32>
    %708 = tpu.reciprocal %707 {approx = true} : vector<8x256xf32> -> vector<8x256xf32>
    %709 = arith.mulf %702, %708 : vector<8x256xf32>
    %710 = arith.addf %709, %477 : vector<8x256xf32>
    %c1_i32_593 = arith.constant 1 : i32
    %711 = tpu.dynamic_rotate %710 by %c1_i32_593 dim 1 : vector<8x256xf32>, i32 -> vector<8x256xf32>
    %712 = vector.broadcast %3 : vector<1x256xf32> to vector<8x256xf32>
    %713 = arith.mulf %712, %711 : vector<8x256xf32>
    %714 = arith.addf %713, %710 : vector<8x256xf32>
    %c255_i32_594 = arith.constant 255 : i32
    %715 = tpu.dynamic_rotate %710 by %c255_i32_594 dim 1 : vector<8x256xf32>, i32 -> vector<8x256xf32>
    %716 = vector.broadcast %5 : vector<1x256xf32> to vector<8x256xf32>
    %717 = arith.mulf %716, %715 : vector<8x256xf32>
    %718 = arith.addf %714, %717 : vector<8x256xf32>
    %c16_i32_595 = arith.constant 16 : i32
    %719 = tpu.dynamic_rotate %718 by %c16_i32_595 dim 1 : vector<8x256xf32>, i32 -> vector<8x256xf32>
    %720 = vector.broadcast %7 : vector<1x256xf32> to vector<8x256xf32>
    %721 = arith.mulf %720, %719 : vector<8x256xf32>
    %722 = arith.addf %721, %718 : vector<8x256xf32>
    %c240_i32_596 = arith.constant 240 : i32
    %723 = tpu.dynamic_rotate %718 by %c240_i32_596 dim 1 : vector<8x256xf32>, i32 -> vector<8x256xf32>
    %724 = vector.broadcast %9 : vector<1x256xf32> to vector<8x256xf32>
    %725 = arith.mulf %724, %723 : vector<8x256xf32>
    %726 = arith.addf %722, %725 : vector<8x256xf32>
    %cst_597 = arith.constant 0.111111112 : f32
    %727 = vector.broadcast %cst_597 : f32 to vector<8x256xf32>
    %728 = arith.mulf %726, %727 : vector<8x256xf32>
    %729 = arith.subf %710, %728 : vector<8x256xf32>
    %730 = arith.mulf %729, %729 : vector<8x256xf32>
    %c1_i32_598 = arith.constant 1 : i32
    %731 = tpu.dynamic_rotate %730 by %c1_i32_598 dim 1 : vector<8x256xf32>, i32 -> vector<8x256xf32>
    %732 = vector.broadcast %3 : vector<1x256xf32> to vector<8x256xf32>
    %733 = arith.mulf %732, %731 : vector<8x256xf32>
    %734 = arith.addf %733, %730 : vector<8x256xf32>
    %c255_i32_599 = arith.constant 255 : i32
    %735 = tpu.dynamic_rotate %730 by %c255_i32_599 dim 1 : vector<8x256xf32>, i32 -> vector<8x256xf32>
    %736 = vector.broadcast %5 : vector<1x256xf32> to vector<8x256xf32>
    %737 = arith.mulf %736, %735 : vector<8x256xf32>
    %738 = arith.addf %734, %737 : vector<8x256xf32>
    %c16_i32_600 = arith.constant 16 : i32
    %739 = tpu.dynamic_rotate %738 by %c16_i32_600 dim 1 : vector<8x256xf32>, i32 -> vector<8x256xf32>
    %740 = vector.broadcast %7 : vector<1x256xf32> to vector<8x256xf32>
    %741 = arith.mulf %740, %739 : vector<8x256xf32>
    %742 = arith.addf %741, %738 : vector<8x256xf32>
    %c240_i32_601 = arith.constant 240 : i32
    %743 = tpu.dynamic_rotate %738 by %c240_i32_601 dim 1 : vector<8x256xf32>, i32 -> vector<8x256xf32>
    %744 = vector.broadcast %9 : vector<1x256xf32> to vector<8x256xf32>
    %745 = arith.mulf %744, %743 : vector<8x256xf32>
    %746 = arith.addf %742, %745 : vector<8x256xf32>
    %cst_602 = arith.constant 0.111111112 : f32
    %747 = vector.broadcast %cst_602 : f32 to vector<8x256xf32>
    %748 = arith.mulf %746, %747 : vector<8x256xf32>
    %cst_603 = arith.constant dense<0.000000e+00> : vector<256xf32>
    %749 = vector.multi_reduction <add>, %748, %cst_603 [0] : vector<8x256xf32> to vector<256xf32>
    %750 = vector.shape_cast %749 : vector<256xf32> to vector<1x256xf32>
    %cst_604 = arith.constant 8.000000e+00 : f32
    %751 = vector.broadcast %cst_604 : f32 to vector<1x256xf32>
    %752 = arith.divf %750, %751 : vector<1x256xf32>
    %cst_605 = arith.constant 1.000000e+00 : f32
    %753 = vector.broadcast %cst_605 : f32 to vector<1x256xf32>
    %754 = arith.addf %753, %752 : vector<1x256xf32>
    %755 = tpu.reciprocal %754 {approx = true} : vector<1x256xf32> -> vector<1x256xf32>
    %c241_i32_606 = arith.constant 241 : i32
    %756 = tpu.dynamic_rotate %710 by %c241_i32_606 dim 1 : vector<8x256xf32>, i32 -> vector<8x256xf32>
    %757 = vector.broadcast %11 : vector<1x256xf32> to vector<8x256xf32>
    %758 = arith.mulf %757, %756 : vector<8x256xf32>
    %cst_607 = arith.constant 1.000000e+00 : f32
    %759 = vector.broadcast %cst_607 : f32 to vector<1x256xf32>
    %760 = arith.subf %759, %11 : vector<1x256xf32>
    %761 = vector.broadcast %760 : vector<1x256xf32> to vector<8x256xf32>
    %762 = arith.mulf %761, %711 : vector<8x256xf32>
    %763 = arith.addf %758, %762 : vector<8x256xf32>
    %764 = arith.subf %710, %763 : vector<8x256xf32>
    %c16_i32_608 = arith.constant 16 : i32
    %765 = tpu.dynamic_rotate %710 by %c16_i32_608 dim 1 : vector<8x256xf32>, i32 -> vector<8x256xf32>
    %766 = arith.subf %710, %765 : vector<8x256xf32>
    %767 = arith.mulf %764, %764 : vector<8x256xf32>
    %768 = arith.mulf %766, %766 : vector<8x256xf32>
    %769 = arith.addf %767, %768 : vector<8x256xf32>
    %770 = math.sqrt %769 : vector<8x256xf32>
    %cst_609 = arith.constant dense<0.000000e+00> : vector<256xf32>
    %771 = vector.multi_reduction <add>, %770, %cst_609 [0] : vector<8x256xf32> to vector<256xf32>
    %772 = vector.shape_cast %771 : vector<256xf32> to vector<1x256xf32>
    %cst_610 = arith.constant 8.000000e+00 : f32
    %773 = vector.broadcast %cst_610 : f32 to vector<1x256xf32>
    %774 = arith.divf %772, %773 : vector<1x256xf32>
    %775 = vector.broadcast %774 : vector<1x256xf32> to vector<8x256xf32>
    %776 = arith.subf %770, %775 : vector<8x256xf32>
    %777 = arith.mulf %776, %776 : vector<8x256xf32>
    %cst_611 = arith.constant dense<0.000000e+00> : vector<256xf32>
    %778 = vector.multi_reduction <add>, %777, %cst_611 [0] : vector<8x256xf32> to vector<256xf32>
    %779 = vector.shape_cast %778 : vector<256xf32> to vector<1x256xf32>
    %cst_612 = arith.constant 0.142857149 : f32
    %780 = vector.broadcast %cst_612 : f32 to vector<1x256xf32>
    %781 = arith.mulf %779, %780 : vector<1x256xf32>
    %782 = math.sqrt %781 : vector<1x256xf32>
    %cst_613 = arith.constant 1.000000e+00 : f32
    %783 = vector.broadcast %cst_613 : f32 to vector<1x256xf32>
    %784 = arith.addf %783, %782 : vector<1x256xf32>
    %785 = tpu.reciprocal %784 {approx = true} : vector<1x256xf32> -> vector<1x256xf32>
    %c0_614 = arith.constant 0 : index
    %c0_615 = arith.constant 0 : index
    %786 = vector.load %arg6[%c0_614, %c0_615] : memref<4x3xf32, #tpu.memory_space<vmem>>, vector<4x3xf32>
    %787 = vector.extract_strided_slice %786 {offsets = [0, 0], sizes = [4, 1], strides = [1, 1]} : vector<4x3xf32> to vector<4x1xf32>
    %788 = vector.extract_strided_slice %786 {offsets = [0, 1], sizes = [4, 1], strides = [1, 1]} : vector<4x3xf32> to vector<4x1xf32>
    %789 = vector.extract_strided_slice %786 {offsets = [0, 2], sizes = [1, 1], strides = [1, 1]} : vector<4x3xf32> to vector<1x1xf32>
    %c0_616 = arith.constant 0 : index
    %c0_617 = arith.constant 0 : index
    %790 = vector.load %arg5[%c0_616, %c0_617] : memref<4x8xf32, #tpu.memory_space<vmem>>, vector<4x8xf32>
    %cst_618 = arith.constant dense<0.000000e+00> : vector<4x256xf32>
    %791 = tpu.matmul %790, %710, %cst_618 {dimension_numbers = #tpu.dot_dimension_numbers<[1], [0], [0], [1], [0, 0, 1, 1], [], []>} : vector<4x8xf32>, vector<8x256xf32>, vector<4x256xf32> -> vector<4x256xf32>
    %792 = vector.broadcast %787 : vector<4x1xf32> to vector<4x256xf32>
    %793 = arith.addf %791, %792 : vector<4x256xf32>
    %cst_619 = arith.constant 0.000000e+00 : f32
    %794 = vector.broadcast %cst_619 : f32 to vector<4x256xf32>
    %795 = arith.subf %794, %793 : vector<4x256xf32>
    %796 = math.exp %795 : vector<4x256xf32>
    %cst_620 = arith.constant 1.000000e+00 : f32
    %797 = vector.broadcast %cst_620 : f32 to vector<4x256xf32>
    %798 = arith.addf %797, %796 : vector<4x256xf32>
    %799 = tpu.reciprocal %798 {approx = true} : vector<4x256xf32> -> vector<4x256xf32>
    %800 = arith.mulf %793, %799 : vector<4x256xf32>
    %801 = vector.broadcast %788 : vector<4x1xf32> to vector<4x256xf32>
    %802 = arith.mulf %800, %801 : vector<4x256xf32>
    %cst_621 = arith.constant dense<0.000000e+00> : vector<256xf32>
    %803 = vector.multi_reduction <add>, %802, %cst_621 [0] : vector<4x256xf32> to vector<256xf32>
    %804 = vector.shape_cast %803 : vector<256xf32> to vector<1x256xf32>
    %805 = vector.broadcast %789 : vector<1x1xf32> to vector<1x256xf32>
    %806 = arith.addf %804, %805 : vector<1x256xf32>
    %cst_622 = arith.constant 0.000000e+00 : f32
    %807 = vector.broadcast %cst_622 : f32 to vector<1x256xf32>
    %808 = arith.subf %807, %806 : vector<1x256xf32>
    %809 = math.exp %808 : vector<1x256xf32>
    %cst_623 = arith.constant 1.000000e+00 : f32
    %810 = vector.broadcast %cst_623 : f32 to vector<1x256xf32>
    %811 = arith.addf %810, %809 : vector<1x256xf32>
    %812 = tpu.reciprocal %811 {approx = true} : vector<1x256xf32> -> vector<1x256xf32>
    %813 = arith.addf %755, %785 : vector<1x256xf32>
    %814 = arith.addf %813, %812 : vector<1x256xf32>
    %cst_624 = arith.constant 0.333333343 : f32
    %815 = vector.broadcast %cst_624 : f32 to vector<1x256xf32>
    %816 = arith.mulf %814, %815 : vector<1x256xf32>
    %c17_i32_625 = arith.constant 17 : i32
    %817 = tpu.dynamic_rotate %710 by %c17_i32_625 dim 1 : vector<8x256xf32>, i32 -> vector<8x256xf32>
    %c6_626 = arith.constant 6 : index
    %c0_627 = arith.constant 0 : index
    %c0_628 = arith.constant 0 : index
    %c0_629 = arith.constant 0 : index
    %818 = vector.load %arg3[%c6_626, %c0_627, %c0_628, %c0_629] : memref<8x9x8x8xf32, #tpu.memory_space<vmem>>, vector<1x1x8x8xf32>
    %819 = vector.shape_cast %818 : vector<1x1x8x8xf32> to vector<8x8xf32>
    %c0_630 = arith.constant 0 : index
    %c0_631 = arith.constant 0 : index
    %c0_632 = arith.constant 0 : index
    %820 = vector.load %arg2[%c0_630, %c0_631, %c0_632] : memref<10x1x256xf32, #tpu.memory_space<vmem>>, vector<1x1x256xf32>
    %821 = vector.shape_cast %820 : vector<1x1x256xf32> to vector<1x256xf32>
    %822 = vector.broadcast %821 : vector<1x256xf32> to vector<8x256xf32>
    %823 = arith.mulf %822, %817 : vector<8x256xf32>
    %cst_633 = arith.constant dense<0.000000e+00> : vector<8x256xf32>
    %824 = tpu.matmul %819, %823, %cst_633 {dimension_numbers = #tpu.dot_dimension_numbers<[1], [0], [0], [1], [0, 0, 1, 1], [], []>} : vector<8x8xf32>, vector<8x256xf32>, vector<8x256xf32> -> vector<8x256xf32>
    %c16_i32_634 = arith.constant 16 : i32
    %825 = tpu.dynamic_rotate %710 by %c16_i32_634 dim 1 : vector<8x256xf32>, i32 -> vector<8x256xf32>
    %c6_635 = arith.constant 6 : index
    %c1_636 = arith.constant 1 : index
    %c0_637 = arith.constant 0 : index
    %c0_638 = arith.constant 0 : index
    %826 = vector.load %arg3[%c6_635, %c1_636, %c0_637, %c0_638] : memref<8x9x8x8xf32, #tpu.memory_space<vmem>>, vector<1x1x8x8xf32>
    %827 = vector.shape_cast %826 : vector<1x1x8x8xf32> to vector<8x8xf32>
    %c1_639 = arith.constant 1 : index
    %c0_640 = arith.constant 0 : index
    %c0_641 = arith.constant 0 : index
    %828 = vector.load %arg2[%c1_639, %c0_640, %c0_641] : memref<10x1x256xf32, #tpu.memory_space<vmem>>, vector<1x1x256xf32>
    %829 = vector.shape_cast %828 : vector<1x1x256xf32> to vector<1x256xf32>
    %830 = vector.broadcast %829 : vector<1x256xf32> to vector<8x256xf32>
    %831 = arith.mulf %830, %825 : vector<8x256xf32>
    %cst_642 = arith.constant dense<0.000000e+00> : vector<8x256xf32>
    %832 = tpu.matmul %827, %831, %cst_642 {dimension_numbers = #tpu.dot_dimension_numbers<[1], [0], [0], [1], [0, 0, 1, 1], [], []>} : vector<8x8xf32>, vector<8x256xf32>, vector<8x256xf32> -> vector<8x256xf32>
    %833 = arith.addf %824, %832 : vector<8x256xf32>
    %c15_i32_643 = arith.constant 15 : i32
    %834 = tpu.dynamic_rotate %710 by %c15_i32_643 dim 1 : vector<8x256xf32>, i32 -> vector<8x256xf32>
    %c6_644 = arith.constant 6 : index
    %c2_645 = arith.constant 2 : index
    %c0_646 = arith.constant 0 : index
    %c0_647 = arith.constant 0 : index
    %835 = vector.load %arg3[%c6_644, %c2_645, %c0_646, %c0_647] : memref<8x9x8x8xf32, #tpu.memory_space<vmem>>, vector<1x1x8x8xf32>
    %836 = vector.shape_cast %835 : vector<1x1x8x8xf32> to vector<8x8xf32>
    %c2_648 = arith.constant 2 : index
    %c0_649 = arith.constant 0 : index
    %c0_650 = arith.constant 0 : index
    %837 = vector.load %arg2[%c2_648, %c0_649, %c0_650] : memref<10x1x256xf32, #tpu.memory_space<vmem>>, vector<1x1x256xf32>
    %838 = vector.shape_cast %837 : vector<1x1x256xf32> to vector<1x256xf32>
    %839 = vector.broadcast %838 : vector<1x256xf32> to vector<8x256xf32>
    %840 = arith.mulf %839, %834 : vector<8x256xf32>
    %cst_651 = arith.constant dense<0.000000e+00> : vector<8x256xf32>
    %841 = tpu.matmul %836, %840, %cst_651 {dimension_numbers = #tpu.dot_dimension_numbers<[1], [0], [0], [1], [0, 0, 1, 1], [], []>} : vector<8x8xf32>, vector<8x256xf32>, vector<8x256xf32> -> vector<8x256xf32>
    %842 = arith.addf %833, %841 : vector<8x256xf32>
    %c1_i32_652 = arith.constant 1 : i32
    %843 = tpu.dynamic_rotate %710 by %c1_i32_652 dim 1 : vector<8x256xf32>, i32 -> vector<8x256xf32>
    %c6_653 = arith.constant 6 : index
    %c3_654 = arith.constant 3 : index
    %c0_655 = arith.constant 0 : index
    %c0_656 = arith.constant 0 : index
    %844 = vector.load %arg3[%c6_653, %c3_654, %c0_655, %c0_656] : memref<8x9x8x8xf32, #tpu.memory_space<vmem>>, vector<1x1x8x8xf32>
    %845 = vector.shape_cast %844 : vector<1x1x8x8xf32> to vector<8x8xf32>
    %c3_657 = arith.constant 3 : index
    %c0_658 = arith.constant 0 : index
    %c0_659 = arith.constant 0 : index
    %846 = vector.load %arg2[%c3_657, %c0_658, %c0_659] : memref<10x1x256xf32, #tpu.memory_space<vmem>>, vector<1x1x256xf32>
    %847 = vector.shape_cast %846 : vector<1x1x256xf32> to vector<1x256xf32>
    %848 = vector.broadcast %847 : vector<1x256xf32> to vector<8x256xf32>
    %849 = arith.mulf %848, %843 : vector<8x256xf32>
    %cst_660 = arith.constant dense<0.000000e+00> : vector<8x256xf32>
    %850 = tpu.matmul %845, %849, %cst_660 {dimension_numbers = #tpu.dot_dimension_numbers<[1], [0], [0], [1], [0, 0, 1, 1], [], []>} : vector<8x8xf32>, vector<8x256xf32>, vector<8x256xf32> -> vector<8x256xf32>
    %851 = arith.addf %842, %850 : vector<8x256xf32>
    %c6_661 = arith.constant 6 : index
    %c4_662 = arith.constant 4 : index
    %c0_663 = arith.constant 0 : index
    %c0_664 = arith.constant 0 : index
    %852 = vector.load %arg3[%c6_661, %c4_662, %c0_663, %c0_664] : memref<8x9x8x8xf32, #tpu.memory_space<vmem>>, vector<1x1x8x8xf32>
    %853 = vector.shape_cast %852 : vector<1x1x8x8xf32> to vector<8x8xf32>
    %c4_665 = arith.constant 4 : index
    %c0_666 = arith.constant 0 : index
    %c0_667 = arith.constant 0 : index
    %854 = vector.load %arg2[%c4_665, %c0_666, %c0_667] : memref<10x1x256xf32, #tpu.memory_space<vmem>>, vector<1x1x256xf32>
    %855 = vector.shape_cast %854 : vector<1x1x256xf32> to vector<1x256xf32>
    %856 = vector.broadcast %855 : vector<1x256xf32> to vector<8x256xf32>
    %857 = arith.mulf %856, %710 : vector<8x256xf32>
    %cst_668 = arith.constant dense<0.000000e+00> : vector<8x256xf32>
    %858 = tpu.matmul %853, %857, %cst_668 {dimension_numbers = #tpu.dot_dimension_numbers<[1], [0], [0], [1], [0, 0, 1, 1], [], []>} : vector<8x8xf32>, vector<8x256xf32>, vector<8x256xf32> -> vector<8x256xf32>
    %859 = arith.addf %851, %858 : vector<8x256xf32>
    %c255_i32_669 = arith.constant 255 : i32
    %860 = tpu.dynamic_rotate %710 by %c255_i32_669 dim 1 : vector<8x256xf32>, i32 -> vector<8x256xf32>
    %c6_670 = arith.constant 6 : index
    %c5_671 = arith.constant 5 : index
    %c0_672 = arith.constant 0 : index
    %c0_673 = arith.constant 0 : index
    %861 = vector.load %arg3[%c6_670, %c5_671, %c0_672, %c0_673] : memref<8x9x8x8xf32, #tpu.memory_space<vmem>>, vector<1x1x8x8xf32>
    %862 = vector.shape_cast %861 : vector<1x1x8x8xf32> to vector<8x8xf32>
    %c5_674 = arith.constant 5 : index
    %c0_675 = arith.constant 0 : index
    %c0_676 = arith.constant 0 : index
    %863 = vector.load %arg2[%c5_674, %c0_675, %c0_676] : memref<10x1x256xf32, #tpu.memory_space<vmem>>, vector<1x1x256xf32>
    %864 = vector.shape_cast %863 : vector<1x1x256xf32> to vector<1x256xf32>
    %865 = vector.broadcast %864 : vector<1x256xf32> to vector<8x256xf32>
    %866 = arith.mulf %865, %860 : vector<8x256xf32>
    %cst_677 = arith.constant dense<0.000000e+00> : vector<8x256xf32>
    %867 = tpu.matmul %862, %866, %cst_677 {dimension_numbers = #tpu.dot_dimension_numbers<[1], [0], [0], [1], [0, 0, 1, 1], [], []>} : vector<8x8xf32>, vector<8x256xf32>, vector<8x256xf32> -> vector<8x256xf32>
    %868 = arith.addf %859, %867 : vector<8x256xf32>
    %c241_i32_678 = arith.constant 241 : i32
    %869 = tpu.dynamic_rotate %710 by %c241_i32_678 dim 1 : vector<8x256xf32>, i32 -> vector<8x256xf32>
    %c6_679 = arith.constant 6 : index
    %c6_680 = arith.constant 6 : index
    %c0_681 = arith.constant 0 : index
    %c0_682 = arith.constant 0 : index
    %870 = vector.load %arg3[%c6_679, %c6_680, %c0_681, %c0_682] : memref<8x9x8x8xf32, #tpu.memory_space<vmem>>, vector<1x1x8x8xf32>
    %871 = vector.shape_cast %870 : vector<1x1x8x8xf32> to vector<8x8xf32>
    %c6_683 = arith.constant 6 : index
    %c0_684 = arith.constant 0 : index
    %c0_685 = arith.constant 0 : index
    %872 = vector.load %arg2[%c6_683, %c0_684, %c0_685] : memref<10x1x256xf32, #tpu.memory_space<vmem>>, vector<1x1x256xf32>
    %873 = vector.shape_cast %872 : vector<1x1x256xf32> to vector<1x256xf32>
    %874 = vector.broadcast %873 : vector<1x256xf32> to vector<8x256xf32>
    %875 = arith.mulf %874, %869 : vector<8x256xf32>
    %cst_686 = arith.constant dense<0.000000e+00> : vector<8x256xf32>
    %876 = tpu.matmul %871, %875, %cst_686 {dimension_numbers = #tpu.dot_dimension_numbers<[1], [0], [0], [1], [0, 0, 1, 1], [], []>} : vector<8x8xf32>, vector<8x256xf32>, vector<8x256xf32> -> vector<8x256xf32>
    %877 = arith.addf %868, %876 : vector<8x256xf32>
    %c240_i32_687 = arith.constant 240 : i32
    %878 = tpu.dynamic_rotate %710 by %c240_i32_687 dim 1 : vector<8x256xf32>, i32 -> vector<8x256xf32>
    %c6_688 = arith.constant 6 : index
    %c7_689 = arith.constant 7 : index
    %c0_690 = arith.constant 0 : index
    %c0_691 = arith.constant 0 : index
    %879 = vector.load %arg3[%c6_688, %c7_689, %c0_690, %c0_691] : memref<8x9x8x8xf32, #tpu.memory_space<vmem>>, vector<1x1x8x8xf32>
    %880 = vector.shape_cast %879 : vector<1x1x8x8xf32> to vector<8x8xf32>
    %c7_692 = arith.constant 7 : index
    %c0_693 = arith.constant 0 : index
    %c0_694 = arith.constant 0 : index
    %881 = vector.load %arg2[%c7_692, %c0_693, %c0_694] : memref<10x1x256xf32, #tpu.memory_space<vmem>>, vector<1x1x256xf32>
    %882 = vector.shape_cast %881 : vector<1x1x256xf32> to vector<1x256xf32>
    %883 = vector.broadcast %882 : vector<1x256xf32> to vector<8x256xf32>
    %884 = arith.mulf %883, %878 : vector<8x256xf32>
    %cst_695 = arith.constant dense<0.000000e+00> : vector<8x256xf32>
    %885 = tpu.matmul %880, %884, %cst_695 {dimension_numbers = #tpu.dot_dimension_numbers<[1], [0], [0], [1], [0, 0, 1, 1], [], []>} : vector<8x8xf32>, vector<8x256xf32>, vector<8x256xf32> -> vector<8x256xf32>
    %886 = arith.addf %877, %885 : vector<8x256xf32>
    %c239_i32_696 = arith.constant 239 : i32
    %887 = tpu.dynamic_rotate %710 by %c239_i32_696 dim 1 : vector<8x256xf32>, i32 -> vector<8x256xf32>
    %c6_697 = arith.constant 6 : index
    %c8_698 = arith.constant 8 : index
    %c0_699 = arith.constant 0 : index
    %c0_700 = arith.constant 0 : index
    %888 = vector.load %arg3[%c6_697, %c8_698, %c0_699, %c0_700] : memref<8x9x8x8xf32, #tpu.memory_space<vmem>>, vector<1x1x8x8xf32>
    %889 = vector.shape_cast %888 : vector<1x1x8x8xf32> to vector<8x8xf32>
    %c8_701 = arith.constant 8 : index
    %c0_702 = arith.constant 0 : index
    %c0_703 = arith.constant 0 : index
    %890 = vector.load %arg2[%c8_701, %c0_702, %c0_703] : memref<10x1x256xf32, #tpu.memory_space<vmem>>, vector<1x1x256xf32>
    %891 = vector.shape_cast %890 : vector<1x1x256xf32> to vector<1x256xf32>
    %892 = vector.broadcast %891 : vector<1x256xf32> to vector<8x256xf32>
    %893 = arith.mulf %892, %887 : vector<8x256xf32>
    %cst_704 = arith.constant dense<0.000000e+00> : vector<8x256xf32>
    %894 = tpu.matmul %889, %893, %cst_704 {dimension_numbers = #tpu.dot_dimension_numbers<[1], [0], [0], [1], [0, 0, 1, 1], [], []>} : vector<8x8xf32>, vector<8x256xf32>, vector<8x256xf32> -> vector<8x256xf32>
    %895 = arith.addf %886, %894 : vector<8x256xf32>
    %c6_705 = arith.constant 6 : index
    %c0_706 = arith.constant 0 : index
    %c0_707 = arith.constant 0 : index
    %c0_708 = arith.constant 0 : index
    %896 = vector.load %arg4[%c6_705, %c0_706, %c0_707, %c0_708] : memref<8x3x8x1xf32, #tpu.memory_space<vmem>>, vector<1x1x8x1xf32>
    %897 = vector.shape_cast %896 : vector<1x1x8x1xf32> to vector<8x1xf32>
    %898 = vector.broadcast %897 : vector<8x1xf32> to vector<8x256xf32>
    %899 = arith.addf %895, %898 : vector<8x256xf32>
    %c6_709 = arith.constant 6 : index
    %c1_710 = arith.constant 1 : index
    %c0_711 = arith.constant 0 : index
    %c0_712 = arith.constant 0 : index
    %900 = vector.load %arg4[%c6_709, %c1_710, %c0_711, %c0_712] : memref<8x3x8x1xf32, #tpu.memory_space<vmem>>, vector<1x1x8x1xf32>
    %901 = vector.shape_cast %900 : vector<1x1x8x1xf32> to vector<8x1xf32>
    %c6_713 = arith.constant 6 : index
    %c2_714 = arith.constant 2 : index
    %c0_715 = arith.constant 0 : index
    %c0_716 = arith.constant 0 : index
    %902 = vector.load %arg4[%c6_713, %c2_714, %c0_715, %c0_716] : memref<8x3x8x1xf32, #tpu.memory_space<vmem>>, vector<1x1x8x1xf32>
    %903 = vector.shape_cast %902 : vector<1x1x8x1xf32> to vector<8x1xf32>
    %cst_717 = arith.constant dense<0.000000e+00> : vector<8xf32>
    %904 = vector.multi_reduction <add>, %899, %cst_717 [1] : vector<8x256xf32> to vector<8xf32>
    %905 = vector.shape_cast %904 : vector<8xf32> to vector<8x1xf32>
    %cst_718 = arith.constant 2.560000e+02 : f32
    %906 = vector.broadcast %cst_718 : f32 to vector<8x1xf32>
    %907 = arith.divf %905, %906 : vector<8x1xf32>
    %908 = vector.broadcast %907 : vector<8x1xf32> to vector<8x256xf32>
    %909 = arith.subf %899, %908 : vector<8x256xf32>
    %910 = arith.mulf %909, %909 : vector<8x256xf32>
    %cst_719 = arith.constant dense<0.000000e+00> : vector<8xf32>
    %911 = vector.multi_reduction <add>, %910, %cst_719 [1] : vector<8x256xf32> to vector<8xf32>
    %912 = vector.shape_cast %911 : vector<8xf32> to vector<8x1xf32>
    %cst_720 = arith.constant 2.560000e+02 : f32
    %913 = vector.broadcast %cst_720 : f32 to vector<8x1xf32>
    %914 = arith.divf %912, %913 : vector<8x1xf32>
    %915 = vector.broadcast %907 : vector<8x1xf32> to vector<8x256xf32>
    %916 = arith.subf %899, %915 : vector<8x256xf32>
    %cst_721 = arith.constant 9.99999974E-6 : f32
    %917 = vector.broadcast %cst_721 : f32 to vector<8x1xf32>
    %918 = arith.addf %914, %917 : vector<8x1xf32>
    %919 = math.rsqrt %918 : vector<8x1xf32>
    %920 = vector.broadcast %919 : vector<8x1xf32> to vector<8x256xf32>
    %921 = arith.mulf %916, %920 : vector<8x256xf32>
    %922 = vector.broadcast %901 : vector<8x1xf32> to vector<8x256xf32>
    %923 = arith.mulf %921, %922 : vector<8x256xf32>
    %924 = vector.broadcast %903 : vector<8x1xf32> to vector<8x256xf32>
    %925 = arith.addf %923, %924 : vector<8x256xf32>
    %cst_722 = arith.constant 0.000000e+00 : f32
    %926 = vector.broadcast %cst_722 : f32 to vector<8x256xf32>
    %927 = arith.subf %926, %925 : vector<8x256xf32>
    %928 = math.exp %927 : vector<8x256xf32>
    %cst_723 = arith.constant 1.000000e+00 : f32
    %929 = vector.broadcast %cst_723 : f32 to vector<8x256xf32>
    %930 = arith.addf %929, %928 : vector<8x256xf32>
    %931 = tpu.reciprocal %930 {approx = true} : vector<8x256xf32> -> vector<8x256xf32>
    %932 = arith.mulf %925, %931 : vector<8x256xf32>
    %c17_i32_724 = arith.constant 17 : i32
    %933 = tpu.dynamic_rotate %932 by %c17_i32_724 dim 1 : vector<8x256xf32>, i32 -> vector<8x256xf32>
    %c7_725 = arith.constant 7 : index
    %c0_726 = arith.constant 0 : index
    %c0_727 = arith.constant 0 : index
    %c0_728 = arith.constant 0 : index
    %934 = vector.load %arg3[%c7_725, %c0_726, %c0_727, %c0_728] : memref<8x9x8x8xf32, #tpu.memory_space<vmem>>, vector<1x1x8x8xf32>
    %935 = vector.shape_cast %934 : vector<1x1x8x8xf32> to vector<8x8xf32>
    %c0_729 = arith.constant 0 : index
    %c0_730 = arith.constant 0 : index
    %c0_731 = arith.constant 0 : index
    %936 = vector.load %arg2[%c0_729, %c0_730, %c0_731] : memref<10x1x256xf32, #tpu.memory_space<vmem>>, vector<1x1x256xf32>
    %937 = vector.shape_cast %936 : vector<1x1x256xf32> to vector<1x256xf32>
    %938 = vector.broadcast %937 : vector<1x256xf32> to vector<8x256xf32>
    %939 = arith.mulf %938, %933 : vector<8x256xf32>
    %cst_732 = arith.constant dense<0.000000e+00> : vector<8x256xf32>
    %940 = tpu.matmul %935, %939, %cst_732 {dimension_numbers = #tpu.dot_dimension_numbers<[1], [0], [0], [1], [0, 0, 1, 1], [], []>} : vector<8x8xf32>, vector<8x256xf32>, vector<8x256xf32> -> vector<8x256xf32>
    %c16_i32_733 = arith.constant 16 : i32
    %941 = tpu.dynamic_rotate %932 by %c16_i32_733 dim 1 : vector<8x256xf32>, i32 -> vector<8x256xf32>
    %c7_734 = arith.constant 7 : index
    %c1_735 = arith.constant 1 : index
    %c0_736 = arith.constant 0 : index
    %c0_737 = arith.constant 0 : index
    %942 = vector.load %arg3[%c7_734, %c1_735, %c0_736, %c0_737] : memref<8x9x8x8xf32, #tpu.memory_space<vmem>>, vector<1x1x8x8xf32>
    %943 = vector.shape_cast %942 : vector<1x1x8x8xf32> to vector<8x8xf32>
    %c1_738 = arith.constant 1 : index
    %c0_739 = arith.constant 0 : index
    %c0_740 = arith.constant 0 : index
    %944 = vector.load %arg2[%c1_738, %c0_739, %c0_740] : memref<10x1x256xf32, #tpu.memory_space<vmem>>, vector<1x1x256xf32>
    %945 = vector.shape_cast %944 : vector<1x1x256xf32> to vector<1x256xf32>
    %946 = vector.broadcast %945 : vector<1x256xf32> to vector<8x256xf32>
    %947 = arith.mulf %946, %941 : vector<8x256xf32>
    %cst_741 = arith.constant dense<0.000000e+00> : vector<8x256xf32>
    %948 = tpu.matmul %943, %947, %cst_741 {dimension_numbers = #tpu.dot_dimension_numbers<[1], [0], [0], [1], [0, 0, 1, 1], [], []>} : vector<8x8xf32>, vector<8x256xf32>, vector<8x256xf32> -> vector<8x256xf32>
    %949 = arith.addf %940, %948 : vector<8x256xf32>
    %c15_i32_742 = arith.constant 15 : i32
    %950 = tpu.dynamic_rotate %932 by %c15_i32_742 dim 1 : vector<8x256xf32>, i32 -> vector<8x256xf32>
    %c7_743 = arith.constant 7 : index
    %c2_744 = arith.constant 2 : index
    %c0_745 = arith.constant 0 : index
    %c0_746 = arith.constant 0 : index
    %951 = vector.load %arg3[%c7_743, %c2_744, %c0_745, %c0_746] : memref<8x9x8x8xf32, #tpu.memory_space<vmem>>, vector<1x1x8x8xf32>
    %952 = vector.shape_cast %951 : vector<1x1x8x8xf32> to vector<8x8xf32>
    %c2_747 = arith.constant 2 : index
    %c0_748 = arith.constant 0 : index
    %c0_749 = arith.constant 0 : index
    %953 = vector.load %arg2[%c2_747, %c0_748, %c0_749] : memref<10x1x256xf32, #tpu.memory_space<vmem>>, vector<1x1x256xf32>
    %954 = vector.shape_cast %953 : vector<1x1x256xf32> to vector<1x256xf32>
    %955 = vector.broadcast %954 : vector<1x256xf32> to vector<8x256xf32>
    %956 = arith.mulf %955, %950 : vector<8x256xf32>
    %cst_750 = arith.constant dense<0.000000e+00> : vector<8x256xf32>
    %957 = tpu.matmul %952, %956, %cst_750 {dimension_numbers = #tpu.dot_dimension_numbers<[1], [0], [0], [1], [0, 0, 1, 1], [], []>} : vector<8x8xf32>, vector<8x256xf32>, vector<8x256xf32> -> vector<8x256xf32>
    %958 = arith.addf %949, %957 : vector<8x256xf32>
    %c1_i32_751 = arith.constant 1 : i32
    %959 = tpu.dynamic_rotate %932 by %c1_i32_751 dim 1 : vector<8x256xf32>, i32 -> vector<8x256xf32>
    %c7_752 = arith.constant 7 : index
    %c3_753 = arith.constant 3 : index
    %c0_754 = arith.constant 0 : index
    %c0_755 = arith.constant 0 : index
    %960 = vector.load %arg3[%c7_752, %c3_753, %c0_754, %c0_755] : memref<8x9x8x8xf32, #tpu.memory_space<vmem>>, vector<1x1x8x8xf32>
    %961 = vector.shape_cast %960 : vector<1x1x8x8xf32> to vector<8x8xf32>
    %c3_756 = arith.constant 3 : index
    %c0_757 = arith.constant 0 : index
    %c0_758 = arith.constant 0 : index
    %962 = vector.load %arg2[%c3_756, %c0_757, %c0_758] : memref<10x1x256xf32, #tpu.memory_space<vmem>>, vector<1x1x256xf32>
    %963 = vector.shape_cast %962 : vector<1x1x256xf32> to vector<1x256xf32>
    %964 = vector.broadcast %963 : vector<1x256xf32> to vector<8x256xf32>
    %965 = arith.mulf %964, %959 : vector<8x256xf32>
    %cst_759 = arith.constant dense<0.000000e+00> : vector<8x256xf32>
    %966 = tpu.matmul %961, %965, %cst_759 {dimension_numbers = #tpu.dot_dimension_numbers<[1], [0], [0], [1], [0, 0, 1, 1], [], []>} : vector<8x8xf32>, vector<8x256xf32>, vector<8x256xf32> -> vector<8x256xf32>
    %967 = arith.addf %958, %966 : vector<8x256xf32>
    %c7_760 = arith.constant 7 : index
    %c4_761 = arith.constant 4 : index
    %c0_762 = arith.constant 0 : index
    %c0_763 = arith.constant 0 : index
    %968 = vector.load %arg3[%c7_760, %c4_761, %c0_762, %c0_763] : memref<8x9x8x8xf32, #tpu.memory_space<vmem>>, vector<1x1x8x8xf32>
    %969 = vector.shape_cast %968 : vector<1x1x8x8xf32> to vector<8x8xf32>
    %c4_764 = arith.constant 4 : index
    %c0_765 = arith.constant 0 : index
    %c0_766 = arith.constant 0 : index
    %970 = vector.load %arg2[%c4_764, %c0_765, %c0_766] : memref<10x1x256xf32, #tpu.memory_space<vmem>>, vector<1x1x256xf32>
    %971 = vector.shape_cast %970 : vector<1x1x256xf32> to vector<1x256xf32>
    %972 = vector.broadcast %971 : vector<1x256xf32> to vector<8x256xf32>
    %973 = arith.mulf %972, %932 : vector<8x256xf32>
    %cst_767 = arith.constant dense<0.000000e+00> : vector<8x256xf32>
    %974 = tpu.matmul %969, %973, %cst_767 {dimension_numbers = #tpu.dot_dimension_numbers<[1], [0], [0], [1], [0, 0, 1, 1], [], []>} : vector<8x8xf32>, vector<8x256xf32>, vector<8x256xf32> -> vector<8x256xf32>
    %975 = arith.addf %967, %974 : vector<8x256xf32>
    %c255_i32_768 = arith.constant 255 : i32
    %976 = tpu.dynamic_rotate %932 by %c255_i32_768 dim 1 : vector<8x256xf32>, i32 -> vector<8x256xf32>
    %c7_769 = arith.constant 7 : index
    %c5_770 = arith.constant 5 : index
    %c0_771 = arith.constant 0 : index
    %c0_772 = arith.constant 0 : index
    %977 = vector.load %arg3[%c7_769, %c5_770, %c0_771, %c0_772] : memref<8x9x8x8xf32, #tpu.memory_space<vmem>>, vector<1x1x8x8xf32>
    %978 = vector.shape_cast %977 : vector<1x1x8x8xf32> to vector<8x8xf32>
    %c5_773 = arith.constant 5 : index
    %c0_774 = arith.constant 0 : index
    %c0_775 = arith.constant 0 : index
    %979 = vector.load %arg2[%c5_773, %c0_774, %c0_775] : memref<10x1x256xf32, #tpu.memory_space<vmem>>, vector<1x1x256xf32>
    %980 = vector.shape_cast %979 : vector<1x1x256xf32> to vector<1x256xf32>
    %981 = vector.broadcast %980 : vector<1x256xf32> to vector<8x256xf32>
    %982 = arith.mulf %981, %976 : vector<8x256xf32>
    %cst_776 = arith.constant dense<0.000000e+00> : vector<8x256xf32>
    %983 = tpu.matmul %978, %982, %cst_776 {dimension_numbers = #tpu.dot_dimension_numbers<[1], [0], [0], [1], [0, 0, 1, 1], [], []>} : vector<8x8xf32>, vector<8x256xf32>, vector<8x256xf32> -> vector<8x256xf32>
    %984 = arith.addf %975, %983 : vector<8x256xf32>
    %c241_i32_777 = arith.constant 241 : i32
    %985 = tpu.dynamic_rotate %932 by %c241_i32_777 dim 1 : vector<8x256xf32>, i32 -> vector<8x256xf32>
    %c7_778 = arith.constant 7 : index
    %c6_779 = arith.constant 6 : index
    %c0_780 = arith.constant 0 : index
    %c0_781 = arith.constant 0 : index
    %986 = vector.load %arg3[%c7_778, %c6_779, %c0_780, %c0_781] : memref<8x9x8x8xf32, #tpu.memory_space<vmem>>, vector<1x1x8x8xf32>
    %987 = vector.shape_cast %986 : vector<1x1x8x8xf32> to vector<8x8xf32>
    %c6_782 = arith.constant 6 : index
    %c0_783 = arith.constant 0 : index
    %c0_784 = arith.constant 0 : index
    %988 = vector.load %arg2[%c6_782, %c0_783, %c0_784] : memref<10x1x256xf32, #tpu.memory_space<vmem>>, vector<1x1x256xf32>
    %989 = vector.shape_cast %988 : vector<1x1x256xf32> to vector<1x256xf32>
    %990 = vector.broadcast %989 : vector<1x256xf32> to vector<8x256xf32>
    %991 = arith.mulf %990, %985 : vector<8x256xf32>
    %cst_785 = arith.constant dense<0.000000e+00> : vector<8x256xf32>
    %992 = tpu.matmul %987, %991, %cst_785 {dimension_numbers = #tpu.dot_dimension_numbers<[1], [0], [0], [1], [0, 0, 1, 1], [], []>} : vector<8x8xf32>, vector<8x256xf32>, vector<8x256xf32> -> vector<8x256xf32>
    %993 = arith.addf %984, %992 : vector<8x256xf32>
    %c240_i32_786 = arith.constant 240 : i32
    %994 = tpu.dynamic_rotate %932 by %c240_i32_786 dim 1 : vector<8x256xf32>, i32 -> vector<8x256xf32>
    %c7_787 = arith.constant 7 : index
    %c7_788 = arith.constant 7 : index
    %c0_789 = arith.constant 0 : index
    %c0_790 = arith.constant 0 : index
    %995 = vector.load %arg3[%c7_787, %c7_788, %c0_789, %c0_790] : memref<8x9x8x8xf32, #tpu.memory_space<vmem>>, vector<1x1x8x8xf32>
    %996 = vector.shape_cast %995 : vector<1x1x8x8xf32> to vector<8x8xf32>
    %c7_791 = arith.constant 7 : index
    %c0_792 = arith.constant 0 : index
    %c0_793 = arith.constant 0 : index
    %997 = vector.load %arg2[%c7_791, %c0_792, %c0_793] : memref<10x1x256xf32, #tpu.memory_space<vmem>>, vector<1x1x256xf32>
    %998 = vector.shape_cast %997 : vector<1x1x256xf32> to vector<1x256xf32>
    %999 = vector.broadcast %998 : vector<1x256xf32> to vector<8x256xf32>
    %1000 = arith.mulf %999, %994 : vector<8x256xf32>
    %cst_794 = arith.constant dense<0.000000e+00> : vector<8x256xf32>
    %1001 = tpu.matmul %996, %1000, %cst_794 {dimension_numbers = #tpu.dot_dimension_numbers<[1], [0], [0], [1], [0, 0, 1, 1], [], []>} : vector<8x8xf32>, vector<8x256xf32>, vector<8x256xf32> -> vector<8x256xf32>
    %1002 = arith.addf %993, %1001 : vector<8x256xf32>
    %c239_i32_795 = arith.constant 239 : i32
    %1003 = tpu.dynamic_rotate %932 by %c239_i32_795 dim 1 : vector<8x256xf32>, i32 -> vector<8x256xf32>
    %c7_796 = arith.constant 7 : index
    %c8_797 = arith.constant 8 : index
    %c0_798 = arith.constant 0 : index
    %c0_799 = arith.constant 0 : index
    %1004 = vector.load %arg3[%c7_796, %c8_797, %c0_798, %c0_799] : memref<8x9x8x8xf32, #tpu.memory_space<vmem>>, vector<1x1x8x8xf32>
    %1005 = vector.shape_cast %1004 : vector<1x1x8x8xf32> to vector<8x8xf32>
    %c8_800 = arith.constant 8 : index
    %c0_801 = arith.constant 0 : index
    %c0_802 = arith.constant 0 : index
    %1006 = vector.load %arg2[%c8_800, %c0_801, %c0_802] : memref<10x1x256xf32, #tpu.memory_space<vmem>>, vector<1x1x256xf32>
    %1007 = vector.shape_cast %1006 : vector<1x1x256xf32> to vector<1x256xf32>
    %1008 = vector.broadcast %1007 : vector<1x256xf32> to vector<8x256xf32>
    %1009 = arith.mulf %1008, %1003 : vector<8x256xf32>
    %cst_803 = arith.constant dense<0.000000e+00> : vector<8x256xf32>
    %1010 = tpu.matmul %1005, %1009, %cst_803 {dimension_numbers = #tpu.dot_dimension_numbers<[1], [0], [0], [1], [0, 0, 1, 1], [], []>} : vector<8x8xf32>, vector<8x256xf32>, vector<8x256xf32> -> vector<8x256xf32>
    %1011 = arith.addf %1002, %1010 : vector<8x256xf32>
    %c7_804 = arith.constant 7 : index
    %c0_805 = arith.constant 0 : index
    %c0_806 = arith.constant 0 : index
    %c0_807 = arith.constant 0 : index
    %1012 = vector.load %arg4[%c7_804, %c0_805, %c0_806, %c0_807] : memref<8x3x8x1xf32, #tpu.memory_space<vmem>>, vector<1x1x8x1xf32>
    %1013 = vector.shape_cast %1012 : vector<1x1x8x1xf32> to vector<8x1xf32>
    %1014 = vector.broadcast %1013 : vector<8x1xf32> to vector<8x256xf32>
    %1015 = arith.addf %1011, %1014 : vector<8x256xf32>
    %cst_808 = arith.constant 1.000000e+00 : f32
    %1016 = vector.broadcast %cst_808 : f32 to vector<1x256xf32>
    %1017 = arith.subf %1016, %816 : vector<1x256xf32>
    %1018 = vector.broadcast %1017 : vector<1x256xf32> to vector<8x256xf32>
    %1019 = arith.mulf %1015, %1018 : vector<8x256xf32>
    %c0_809 = arith.constant 0 : index
    %c0_810 = arith.constant 0 : index
    %c0_811 = arith.constant 0 : index
    %1020 = vector.load %arg7[%c0_809, %c0_810, %c0_811] : memref<1x8x256xf32, #tpu.memory_space<vmem>>, vector<1x8x256xf32>
    %1021 = vector.shape_cast %1020 : vector<1x8x256xf32> to vector<8x256xf32>
    %1022 = vector.shape_cast %710 : vector<8x256xf32> to vector<1x8x256xf32>
    tpu.vector_store %arg7[%c0_809, %c0_810, %c0_811], %1022 {strides = array<i32>} : memref<1x8x256xf32, #tpu.memory_space<vmem>>, vector<1x8x256xf32>,
    %c0_812 = arith.constant 0 : index
    %c0_813 = arith.constant 0 : index
    %c0_814 = arith.constant 0 : index
    %1023 = vector.load %arg8[%c0_812, %c0_813, %c0_814] : memref<1x8x256xf32, #tpu.memory_space<vmem>>, vector<1x8x256xf32>
    %1024 = vector.shape_cast %1023 : vector<1x8x256xf32> to vector<8x256xf32>
    %1025 = vector.shape_cast %1019 : vector<8x256xf32> to vector<1x8x256xf32>
    tpu.vector_store %arg8[%c0_812, %c0_813, %c0_814], %1025 {strides = array<i32>} : memref<1x8x256xf32, #tpu.memory_space<vmem>>, vector<1x8x256xf32>,
    %1026 = tpu.concatenate %755, %785, %812, %816 in 0 : vector<1x256xf32>, vector<1x256xf32>, vector<1x256xf32>, vector<1x256xf32> -> vector<4x256xf32>
    %c0_815 = arith.constant 0 : index
    %c0_816 = arith.constant 0 : index
    %c0_817 = arith.constant 0 : index
    %1027 = vector.load %arg9[%c0_815, %c0_816, %c0_817] : memref<1x4x256xf32, #tpu.memory_space<vmem>>, vector<1x4x256xf32>
    %1028 = vector.shape_cast %1027 : vector<1x4x256xf32> to vector<4x256xf32>
    %1029 = vector.shape_cast %1026 : vector<4x256xf32> to vector<1x4x256xf32>
    tpu.vector_store %arg9[%c0_815, %c0_816, %c0_817], %1029 {strides = array<i32>} : memref<1x4x256xf32, #tpu.memory_space<vmem>>, vector<1x4x256xf32>,
    return
  }
  func.func @transform_0(%arg0: i32) -> (i32, i32, i32) {
    %c0_i32 = arith.constant 0 : i32
    %c0_i32_0 = arith.constant 0 : i32
    %c0_i32_1 = arith.constant 0 : i32
    return %arg0, %c0_i32, %c0_i32_0 : i32, i32, i32
  }
  func.func @transform_1(%arg0: i32) -> (i32, i32, i32) {
    %c0_i32 = arith.constant 0 : i32
    %c0_i32_0 = arith.constant 0 : i32
    %c0_i32_1 = arith.constant 0 : i32
    %c0_i32_2 = arith.constant 0 : i32
    return %c0_i32, %c0_i32_0, %c0_i32_1 : i32, i32, i32
  }
  func.func @transform_2(%arg0: i32) -> (i32, i32, i32, i32) {
    %c0_i32 = arith.constant 0 : i32
    %c0_i32_0 = arith.constant 0 : i32
    %c0_i32_1 = arith.constant 0 : i32
    %c0_i32_2 = arith.constant 0 : i32
    %c0_i32_3 = arith.constant 0 : i32
    return %c0_i32, %c0_i32_0, %c0_i32_1, %c0_i32_2 : i32, i32, i32, i32
  }
  func.func @transform_3(%arg0: i32) -> (i32, i32, i32, i32) {
    %c0_i32 = arith.constant 0 : i32
    %c0_i32_0 = arith.constant 0 : i32
    %c0_i32_1 = arith.constant 0 : i32
    %c0_i32_2 = arith.constant 0 : i32
    %c0_i32_3 = arith.constant 0 : i32
    return %c0_i32, %c0_i32_0, %c0_i32_1, %c0_i32_2 : i32, i32, i32, i32
  }
  func.func @transform_4(%arg0: i32) -> (i32, i32) {
    %c0_i32 = arith.constant 0 : i32
    %c0_i32_0 = arith.constant 0 : i32
    %c0_i32_1 = arith.constant 0 : i32
    return %c0_i32, %c0_i32_0 : i32, i32
  }
  func.func @transform_5(%arg0: i32) -> (i32, i32) {
    %c0_i32 = arith.constant 0 : i32
    %c0_i32_0 = arith.constant 0 : i32
    %c0_i32_1 = arith.constant 0 : i32
    return %c0_i32, %c0_i32_0 : i32, i32
  }
  func.func @transform_6(%arg0: i32) -> (i32, i32, i32) {
    %c0_i32 = arith.constant 0 : i32
    %c0_i32_0 = arith.constant 0 : i32
    %c0_i32_1 = arith.constant 0 : i32
    return %arg0, %c0_i32, %c0_i32_0 : i32, i32, i32
  }
  func.func @transform_7(%arg0: i32) -> (i32, i32, i32) {
    %c0_i32 = arith.constant 0 : i32
    %c0_i32_0 = arith.constant 0 : i32
    %c0_i32_1 = arith.constant 0 : i32
    return %arg0, %c0_i32, %c0_i32_0 : i32, i32, i32
  }
  func.func @transform_8(%arg0: i32) -> (i32, i32, i32) {
    %c0_i32 = arith.constant 0 : i32
    %c0_i32_0 = arith.constant 0 : i32
    %c0_i32_1 = arith.constant 0 : i32
    return %arg0, %c0_i32, %c0_i32_0 : i32, i32, i32
  }
}

</mosaic_0001>

<bundles_post_ra>
// kernel: self_reflection_forward.1
= control target key start
LH: loop header
LB: loop body
LE: loop exit
PB: predicated region body
PF: predicated region fallthrough
CT: control target
= control target key end

     0   :  { %14 = vsyncpa [#allocation3], 0  ;;  %s5702_s27 = smov 0   ;;  %s6863_s0 = inlined_call_operand.vmem [shape: f32[2,8,256], index: 0, kind: input, shape index: {}]   ;;  %s6864_s1 = inlined_call_operand.vmem [shape: f32[10,1,256], index: 1, kind: input, shape index: {}]   ;;  %s6865_s2 = inlined_call_operand.hbm [shape: f32[8,9,8,8], index: 2, kind: input, shape index: {}]   ;;  %s6866_s3 = inlined_call_operand.vmem [shape: f32[8,3,8,1], index: 3, kind: input, shape index: {}]   ;;  %s6867_s4 = inlined_call_operand.vmem [shape: f32[4,8], index: 4, kind: input, shape index: {}]   ;;  %s6868_s5 = inlined_call_operand.vmem [shape: f32[4,3], index: 5, kind: input, shape index: {}]   ;;  %s6869_s6 = inlined_call_operand.vmem [shape: f32[2,8,256], index: 6, kind: output, shape index: {0}]   ;;  %s6870_s7 = inlined_call_operand.vmem [shape: f32[2,8,256], index: 7, kind: output, shape index: {1}]   ;;  %s6871_s8 = inlined_call_operand.vmem [shape: f32[2,4,256], index: 8, kind: output, shape index: {2}]  }
   0x1 LB: > { %s248_s30 = sshll.u32 %s6865_s2, 4  ;;  %s5256_s9 = sadd.s32 4294967295, %s5639_s27   ;;  %s5639_s27 = sphi %s5702_s27, %s20_s27   ;;  %s249_s30 = int_to_ptr.hbm [resolvable:$true] %s248_s30 }
   0x2   : > { %p5258_p0 = scmp.ge.s32.totalorder %s5639_s27, 1  ;;  %p234_p1 = scmp.lt.s32.totalorder %s5639_s27, 3 }
   0x3   : > { %p5461_p2 = scmp.eq.s32.totalorder %s5256_s9, 0  ;;  %s5641_s10 = smov [#allocation2]  }
   0x4   : > { %p235_p3 = pnand %p5258_p0, %p234_p1  ;;  %s250_s11 = sshll.u32 %s5641_s10, 4  ;;  %s251_s11 = int_to_ptr.vmem [resolvable:$true] %s250_s11 }
   0x5   : > { %s5642_s12 = smov 128   ;;  %s5643_s13 = smov 8  }
   0x6   : > { %p5457_p4 = pneg %p235_p3  ;;  %283 = sbr.rel (%p235_p3) target bundleno = 4670 (0x123e), region = 44 }
   0x8   : > { %p5458_p5 = pnand %p5461_p2, %p5457_p4 }
   0xa   : > { %5460 = dma.hbm_to_vmem [thread:$0]  (!%p5458_p5), %s249_s30, 9216, %s251_s11, [#allocation3], %s5642_s12, %s5642_s12, %s5643_s13  }
   0xb   : > { %5634 = dma.done.wait (%p5461_p2), [#allocation3], 9216  }
   0xc   : > { %5636 = vsyncadd (%p5461_p2), [#allocation3], 4294958080  ;;  %p328_p6 = scmp.lt.s32.totalorder %s5256_s9, 1  ;;  %s5644_s18 = smov 16   ;;  %v364_v3 = vlaneseq  ;;  %v5273_v8 = vld [vmem:[%s6864_s1 + $0x2] sm:$0x3] }
   0xd   : > { %s5645_s19 = smov 17   ;;  %s5646_s20 = smov 15   ;;  %v370_v9 = vld [vmem:[%s6864_s1] sm:$0x3]  ;;  %v5280_v10 = vld [vmem:[%s6864_s1 + $0x4] sm:$0x3] }
   0xe   : > { %s6873_s9 = smov (!%p328_p6, %s5256_s9), 1  ;;  %s5647_s21 = smov 1   ;;  %v5758_v6 = vand.u32 127, %v364_v3  ;;  %v5771_v11 = vperm.slane %v5273_v8, 0  ;;  %v5285_v12 = vld [vmem:[%s6864_s1 + $0x8] sm:$0x3] }
   0xf   : > { %s5716_s14 = sshll.u32 %s6873_s9, 4  ;;  %s5648_s22 = smov 127   ;;  %v5776_v13 = vperm.slane %v5273_v8, 1  ;;  %v5779_v14 = vperm.slane %v370_v9, 0  ;;  %v5781_v15 = vperm.slane %v370_v9, 1  ;;  %v5783_v16 = vperm.slane %v5280_v10, 0 }
  0x10   : > { %s332_s17 = scalar_lea.vmem %s6863_s0, %s5716_s14  ;;  %s5649_s23 = smov 113   ;;  %vm485_vm0 = vcmp.lt.s32.totalorder %v5758_v6, 15  ;;  %vm382_vm1 = vcmp.lt.s32.totalorder %v5758_v6, 16  ;;  %vm366_vm2 = vcmp.lt.s32.totalorder %v5758_v6, 17  ;;  %v5785_v17 = vperm.slane %v5280_v10, 1  ;;  %v386_v32 = vld [vmem:[#allocation2 + $0x8] sm:$0xff] }
  0x11   : > { %v5722_v0 = vld [vmem:[%s332_s17] sm:$0xff]  ;;  %v5730_v1 = vld [vmem:[%s332_s17 + $0x8] sm:$0xff]  ;;  %s5650_s24 = smov 112   ;;  %s5651_s25 = smov 111   ;;  %v5791_v22 = vperm.slane %v5285_v12, 0  ;;  %v5793_v23 = vperm.slane %v5285_v12, 1 }
  0x12   : > { %378 = vrot.lane.b32.xlu1 %v5722_v0, %s5644_s18  ;;  %360 = vrot.lane.b32.xlu0 %v5722_v0, %s5645_s19  ;;  %vm394_vm3 = vcmask 64512   ;;  %v5271_v33 = vld [vmem:[%s6864_s1 + $0x6] sm:$0x3]  ;;  %vm548_vm4 = vcmp.lt.s32.totalorder %v5758_v6, 1  ;;  %v5290_v49 = vld [vmem:[%s6864_s1 + $0xc] sm:$0x3]  ;;  %s337_s28 = scalar_lea.vmem %s6869_s6, %s5716_s14 }
  0x13   : > { %481 = vrot.lane.b32.xlu2 %v5722_v0, %s5646_s20  ;;  %v369_v34 = vld [vmem:[#allocation2] sm:$0xff]  ;;  %v614_v38 = vmul.f32 %v5791_v22, %v5722_v0  ;;  %v615_v39 = vmul.f32 %v5793_v23, %v5730_v1  ;;  %v5819_v40 = vperm.slane %v5271_v33, 0  ;;  %v5821_v41 = vperm.slane %v5271_v33, 1  ;;  %v489_v51 = vld [vmem:[#allocation2 + $0x10] sm:$0xff]  ;;  %v5272_v52 = vld [vmem:[%s6864_s1 + $0xa] sm:$0x3] }
  0x14   : > { %v909_v44 = vld [vmem:[%s6866_s3] sm:$0xff]  ;;  %v5652_v50 = vmov 0   ;;  %v552_v53 = vld [vmem:[#allocation2 + $0x18] sm:$0xff]  ;;  %vm726_vm5 = vcmp.lt.s32.totalorder %v5758_v6, 113  ;;  %v5844_v54 = vperm.slane %v5290_v49, 0  ;;  %v5848_v56 = vperm.slane %v5290_v49, 1 }
  0x15   : > { %5487 = vset.pattern.permute.xlu1 %v5652_v50  ;;  %5488 = vset.pattern.permute.xlu0 %v5652_v50  ;;  %vm665_vm6 = vcmp.lt.s32.totalorder %v5758_v6, 127  ;;  %v5851_v57 = vperm.slane %v5272_v52, 0  ;;  %v5853_v58 = vperm.slane %v5272_v52, 1  ;;  %v5298_v61 = vld [vmem:[%s6866_s3 + $0x8] sm:$0xff]  ;;  %v606_v9 = vld [vmem:[#allocation2 + $0x20] sm:$0xff]  ;;  %vm789_vm7 = vcmp.lt.s32.totalorder %v5758_v6, 112 }
  0x16   : > { %5489 = vset.pattern.permute.xlu2 %v5652_v50  ;;  %v5274_v10 = vld [vmem:[%s6864_s1 + $0xe] sm:$0x3]  ;;  %vm850_vm8 = vcmp.lt.s32.totalorder %v5758_v6, 111 }
  0x17   : > { %v669_v12 = vld [vmem:[#allocation2 + $0x28] sm:$0xff] }
  0x1a   : > { %380 = vrot.lane.b32.xlu1 %v5730_v1, %s5644_s18  ;;  %362 = vrot.lane.b32.xlu0 %v5730_v1, %s5645_s19 }
  0x1b   : > { %483 = vrot.lane.b32.xlu2 %v5730_v1, %s5646_s20 }
  0x22   : > { %546 = vrot.lane.b32.xlu1 %v5730_v1, %s5647_s21  ;;  %544 = vrot.lane.b32.xlu0 %v5722_v0, %s5647_s21 }
  0x23   : > { %661 = vrot.lane.b32.xlu2 %v5722_v0, %s5648_s22 }
  0x2a   : > { %722 = vrot.lane.b32.xlu1 %v5722_v0, %s5649_s23  ;;  %663 = vrot.lane.b32.xlu0 %v5730_v1, %s5648_s22 }
  0x2b   : > { %724 = vrot.lane.b32.xlu2 %v5730_v1, %s5649_s23 }
  0x32   : > { %787 = vrot.lane.b32.xlu1 %v5730_v1, %s5650_s24  ;;  %785 = vrot.lane.b32.xlu0 %v5722_v0, %s5650_s24 }
  0x33   : > { %846 = vrot.lane.b32.xlu2 %v5722_v0, %s5651_s25 }
  0x3a   : > { %848 = vrot.lane.b32.xlu0 %v5730_v1, %s5651_s25  ;;  %912 = vperm.xlu1 %5487, %v909_v44  }
  0x42   : > { %955 = vperm.xlu1 %5487, %v5298_v61  }
  0x6d   : > { %v482_v2 = vpop.permute.xlu2 %481 }
  0x75   : > { %v484_v7 = vpop.permute.xlu2 %483 }
  0x76   : > { %v486_v18 = vsel %vm485_vm0, %v482_v2, %v484_v7  ;;  %v487_v19 = vsel %vm485_vm0, %v484_v7, %v482_v2 }
  0x77   : > { %v497_v35 = vmul.f32 %v5783_v16, %v487_v19  ;;  %v498_v36 = vmul.f32 %v5785_v17, %v486_v18  ;;  %v5878_v18 = vperm.slane %v5274_v10, 0  ;;  %v5880_v19 = vperm.slane %v5274_v10, 1 }
  0x7d   : > { %v662_v37 = vpop.permute.xlu2 %661 }
  0x84   : > { %v379_v4 = vpop.permute.xlu1 %378  ;;  %v361_v5 = vpop.permute.xlu0 %360 }
  0x85   : > { %v725_v55 = vpop.permute.xlu2 %724 }
  0x8c   : > { %v381_v20 = vpop.permute.xlu1 %380  ;;  %v363_v21 = vpop.permute.xlu0 %362 }
  0x8d   : > { %v384_v24 = vsel %vm382_vm1, %v381_v20, %v379_v4  ;;  %v383_v25 = vsel %vm382_vm1, %v379_v4, %v381_v20  ;;  %v368_v26 = vsel %vm366_vm2, %v363_v21, %v361_v5  ;;  %v367_v27 = vsel %vm366_vm2, %v361_v5, %v363_v21 }
  0x8e   : > { %v392_v28 = vmul.f32 %v5771_v11, %v384_v24  ;;  %v393_v29 = vmul.f32 %v5776_v13, %v383_v25  ;;  %v376_v30 = vmul.f32 %v5779_v14, %v368_v26  ;;  %v377_v31 = vmul.f32 %v5781_v15, %v367_v27  ;;  %v5299_v24 = vld [vmem:[%s6866_s3 + $0x10] sm:$0xff] }
  0x8f   : > { %962 = vperm.xlu1 %5487, %v5299_v24  }
  0x90   : > { %413 = vmatpush.msra.mxu0 %v392_v28  ;;  %433 = vmatpush.msra.mxu1 %v393_v29  ;;  %v730_v29 = vld [vmem:[#allocation2 + $0x30] sm:$0xff] }
  0x91   : > { %456 = vmatpush.msra.mxu2 %v376_v30  ;;  %476 = vmatpush.msra.mxu3 %v377_v31  ;;  %v5295_v30 = vld [vmem:[%s6864_s1 + $0x10] sm:$0x3]  ;;  %v793_v31 = vld [vmem:[#allocation2 + $0x38] sm:$0xff] }
  0x92   : > { %5276 = vmatmul.msk.f32.vlgmr.msra.gmra.mxu0 %vm394_vm3, %v386_v32  ;;  %5277 = vmatmul.msk.f32.vlgmr.msra.gmra.mxu1 %vm394_vm3, %v386_v32  ;;  %v847_v32 = vpop.permute.xlu2 %846  ;;  %v5899_v33 = vperm.slane %v5295_v30, 0 }
  0x93   : > { %5278 = vmatmul.msk.f32.vlgmr.msra.gmra.mxu2 %vm394_vm3, %v369_v34  ;;  %5279 = vmatmul.msk.f32.vlgmr.msra.gmra.mxu3 %vm394_vm3, %v369_v34  ;;  %v5901_v34 = vperm.slane %v5295_v30, 1 }
  0x94   : > { %517 = vmatpush.msrb.mxu0 %v497_v35  ;;  %537 = vmatpush.msrb.mxu1 %v498_v36  ;;  %v547_v42 = vpop.permute.xlu1 %546  ;;  %v545_v43 = vpop.permute.xlu0 %544 }
  0x95   : > { %v550_v45 = vsel %vm548_vm4, %v547_v42, %v545_v43  ;;  %v549_v46 = vsel %vm548_vm4, %v545_v43, %v547_v42  ;;  %v854_v42 = vld [vmem:[#allocation2 + $0x40] sm:$0xff] }
  0x96   : > { %634 = vmatpush.msra.mxu0 %v614_v38  ;;  %654 = vmatpush.msra.mxu1 %v615_v39  ;;  %v558_v47 = vmul.f32 %v5819_v40, %v550_v45  ;;  %v559_v48 = vmul.f32 %v5821_v41, %v549_v46 }
  0x98   : > { %578 = vmatpush.msrb.mxu2 %v558_v47  ;;  %598 = vmatpush.msrb.mxu3 %v559_v48 }
  0x9a   : > { %5281 = vmatmul.msk.f32.vlgmr.msrb.gmra.mxu0 %vm394_vm3, %v489_v51  ;;  %5282 = vmatmul.msk.f32.vlgmr.msrb.gmra.mxu1 %vm394_vm3, %v489_v51 }
  0x9b   : > { %5283 = vmatmul.msk.f32.vlgmr.msrb.gmra.mxu2 %vm394_vm3, %v552_v53  ;;  %5284 = vmatmul.msk.f32.vlgmr.msrb.gmra.mxu3 %vm394_vm3, %v552_v53 }
  0x9c   : > { %v723_v59 = vpop.permute.xlu1 %722  ;;  %v664_v60 = vpop.permute.xlu0 %663 }
  0x9d   : > { %v727_v62 = vsel %vm726_vm5, %v723_v59, %v725_v55  ;;  %v728_v63 = vsel %vm726_vm5, %v725_v55, %v723_v59  ;;  %v666_v2 = vsel %vm665_vm6, %v662_v37, %v664_v60  ;;  %v667_v3 = vsel %vm665_vm6, %v664_v60, %v662_v37 }
  0x9e   : > { %v738_v4 = vmul.f32 %v5844_v54, %v727_v62  ;;  %v739_v5 = vmul.f32 %v5848_v56, %v728_v63  ;;  %v675_v7 = vmul.f32 %v5851_v57, %v666_v2  ;;  %v676_v8 = vmul.f32 %v5853_v58, %v667_v3 }
  0xa0   : > { %695 = vmatpush.msra.mxu2 %v675_v7  ;;  %715 = vmatpush.msra.mxu3 %v676_v8 }
  0xa1   : > { %758 = vmatpush.msrb.mxu0 %v738_v4  ;;  %778 = vmatpush.msrb.mxu1 %v739_v5 }
  0xa2   : > { %5286 = vmatmul.msk.f32.vlgmr.msra.gmra.mxu0 %vm394_vm3, %v606_v9  ;;  %5287 = vmatmul.msk.f32.vlgmr.msra.gmra.mxu1 %vm394_vm3, %v606_v9 }
  0xa3   : > { %5288 = vmatmul.msk.f32.vlgmr.msra.gmra.mxu2 %vm394_vm3, %v669_v12  ;;  %5289 = vmatmul.msk.f32.vlgmr.msra.gmra.mxu3 %vm394_vm3, %v669_v12 }
  0xa4   : > { %v788_v20 = vpop.permute.xlu1 %787  ;;  %v786_v21 = vpop.permute.xlu0 %785 }
  0xa5   : > { %v790_v25 = vsel %vm789_vm7, %v786_v21, %v788_v20  ;;  %v791_v26 = vsel %vm789_vm7, %v788_v20, %v786_v21 }
  0xa6   : > { %v799_v27 = vmul.f32 %v5878_v18, %v790_v25  ;;  %v800_v28 = vmul.f32 %v5880_v19, %v791_v26 }
  0xa8   : > { %819 = vmatpush.msrb.mxu2 %v799_v27  ;;  %839 = vmatpush.msrb.mxu3 %v800_v28 }
  0xaa   : > { %5291 = vmatmul.msk.f32.vlgmr.msrb.gmra.mxu0 %vm394_vm3, %v730_v29  ;;  %5292 = vmatmul.msk.f32.vlgmr.msrb.gmra.mxu1 %vm394_vm3, %v730_v29 }
  0xab   : > { %5293 = vmatmul.msk.f32.vlgmr.msrb.gmra.mxu2 %vm394_vm3, %v793_v31  ;;  %5294 = vmatmul.msk.f32.vlgmr.msrb.gmra.mxu3 %vm394_vm3, %v793_v31 }
  0xac   : > { %v849_v35 = vpop.permute.xlu0 %848  ;;  %v913_v31 = vpop.permute.xlu1 %912 }
  0xad   : > { %v851_v36 = vsel %vm850_vm8, %v847_v32, %v849_v35  ;;  %v852_v37 = vsel %vm850_vm8, %v849_v35, %v847_v32 }
  0xae   : > { %v862_v38 = vmul.f32 %v5899_v33, %v851_v36  ;;  %v863_v39 = vmul.f32 %v5901_v34, %v852_v37  ;;  %v5653_v37 = vmov 256.0  }
  0xaf   : > { %5493 = vrcp.f32 %v5653_v37 }
  0xb0   : > { %882 = vmatpush.msra.mxu0 %v862_v38  ;;  %902 = vmatpush.msra.mxu1 %v863_v39 }
  0xb2   : > { %5296 = vmatmul.msk.f32.vlgmr.msra.gmra.mxu0 %vm394_vm3, %v854_v42  ;;  %5297 = vmatmul.msk.f32.vlgmr.msra.gmra.mxu1 %vm394_vm3, %v854_v42 }
  0xb5   : > { %v5494_v38 = vpop.eup %5493 }
  0xb6   : > { %v925_v39 = vmul.f32 256.0, %v5494_v38  ;;  %vm929_vm9 = vweird.f32 %v5494_v38 }
  0xb8   : > { %v926_v42 = vsub.f32 1.0, %v925_v39  ;;  %v5318_v39 = vld [vmem:[%s6866_s3 + $0x18] sm:$0xff] }
 0x10f   : > { %v415_v43 = vpop.f32.mrf.mxu0  ;;  %v435_v44 = vpop.f32.mrf.mxu1 }
 0x116   : > { %v458_v45 = vpop.f32.mrf.mxu2  ;;  %v478_v46 = vpop.f32.mrf.mxu3 }
 0x117   : > { %v519_v47 = vpop.f32.mrf.mxu0  ;;  %v539_v48 = vpop.f32.mrf.mxu1  ;;  %v459_v49 = vadd.f32 %v458_v45, %v415_v43  ;;  %v479_v51 = vadd.f32 %v478_v46, %v435_v44  ;;  %v927_v43 = vmul.f32 %v5494_v38, %v926_v42  ;;  %v5319_v42 = vld [vmem:[%s6866_s3 + $0x20] sm:$0xff] }
 0x119   : > { %v542_v60 = vadd.f32 %v519_v47, %v459_v49  ;;  %v543_v61 = vadd.f32 %v539_v48, %v479_v51  ;;  %v928_v44 = vadd.f32 %v5494_v38, %v927_v43  ;;  %v5320_v43 = vld [vmem:[%s6866_s3 + $0x28] sm:$0xff] }
 0x11b   : > { %v5913_v45 = vsel %vm929_vm9, %v5494_v38, %v928_v44 }
 0x11e   : > { %v580_v52 = vpop.f32.mrf.mxu2  ;;  %v600_v53 = vpop.f32.mrf.mxu3 }
 0x11f   : > { %v636_v55 = vpop.f32.mrf.mxu0  ;;  %v656_v59 = vpop.f32.mrf.mxu1  ;;  %v603_v62 = vadd.f32 %v580_v52, %v542_v60  ;;  %v604_v63 = vadd.f32 %v600_v53, %v543_v61 }
 0x121   : > { %v659_v4 = vadd.f32 %v636_v55, %v603_v62  ;;  %v660_v5 = vadd.f32 %v656_v59, %v604_v63 }
 0x126   : > { %v697_v2 = vpop.f32.mrf.mxu2  ;;  %v717_v3 = vpop.f32.mrf.mxu3 }
 0x127   : > { %v760_v7 = vpop.f32.mrf.mxu0  ;;  %v780_v8 = vpop.f32.mrf.mxu1  ;;  %v720_v9 = vadd.f32 %v697_v2, %v659_v4  ;;  %v721_v10 = vadd.f32 %v717_v3, %v660_v5 }
 0x128   : > { %v956_v2 = vpop.permute.xlu1 %955 }
 0x129   : > { %v783_v12 = vadd.f32 %v760_v7, %v720_v9  ;;  %v784_v20 = vadd.f32 %v780_v8, %v721_v10 }
 0x12e   : > { %v821_v21 = vpop.f32.mrf.mxu2  ;;  %v841_v24 = vpop.f32.mrf.mxu3 }
 0x12f   : > { %v844_v25 = vadd.f32 %v821_v21, %v783_v12  ;;  %v845_v26 = vadd.f32 %v841_v24, %v784_v20  ;;  %v884_v27 = vpop.f32.mrf.mxu0  ;;  %v904_v28 = vpop.f32.mrf.mxu1 }
 0x130   : > { %v963_v20 = vpop.permute.xlu1 %962 }
 0x131   : > { %v907_v29 = vadd.f32 %v884_v27, %v844_v25  ;;  %v908_v30 = vadd.f32 %v904_v28, %v845_v26 }
 0x133   : > { %v915_v32 = vadd.f32 %v913_v31, %v907_v29  ;;  %v916_v35 = vadd.f32 %v913_v31, %v908_v30 }
 0x135   : > { %v921_v36 = vadd.f32 %v916_v35, %v915_v32 }
 0x137   : > { %922 = vadd.xlane.f32.xlu2 %v921_v36 }
 0x1aa   : > { %v923_v46 = vpop.xlane.xlu2 %922 }
 0x1ab   : > { %v931_v47 = vmul.f32 %v5913_v45, %v923_v46 }
 0x1ad   : > { %v932_v48 = vsub.f32 %v915_v32, %v931_v47  ;;  %v933_v49 = vsub.f32 %v916_v35, %v931_v47 }
 0x1af   : > { %v934_v51 = vmul.f32 %v932_v48, %v932_v48  ;;  %v935_v52 = vmul.f32 %v933_v49, %v933_v49 }
 0x1b1   : > { %v936_v53 = vadd.f32 %v935_v52, %v934_v51 }
 0x1b3   : > { %937 = vadd.xlane.f32.xlu0 %v936_v53 }
 0x226   : > { %v938_v55 = vpop.xlane.xlu0 %937 }
 0x227   : > { %v939_v59 = vmul.f32 %v938_v55, %v5913_v45  ;;  %v996_v55 = vld [vmem:[#allocation2 + $0x50] sm:$0xff] }
 0x229   : > { %v940_v60 = vadd.f32 1e-05, %v939_v59 }
 0x22b   : > { %5495 = vrsqrt.f32 %v940_v60  ;;  %vm947_vm11 = vweird.f32 %v940_v60 }
 0x231   : > { %v5496_v61 = vpop.eup %5495 }
 0x232   : > { %v942_v62 = vmul.f32 %v5496_v61, %v940_v60  ;;  %vm948_vm10 = vweird.f32 %v5496_v61 }
 0x233   : > { %vm949_vm12 = vmor %vm947_vm11, %vm948_vm10 }
 0x234   : > { %v943_v63 = vmul.f32 %v5496_v61, %v942_v62 }
 0x236   : > { %v944_v3 = vmul.f32 0.5, %v943_v63 }
 0x238   : > { %v945_v4 = vsub.f32 1.5, %v944_v3 }
 0x23a   : > { %v946_v5 = vmul.f32 %v5496_v61, %v945_v4 }
 0x23c   : > { %v950_v7 = vsel %vm949_vm12, %v5496_v61, %v946_v5 }
 0x23d   : > { %v951_v8 = vmul.f32 %v950_v7, %v932_v48  ;;  %v952_v9 = vmul.f32 %v950_v7, %v933_v49 }
 0x23f   : > { %v958_v10 = vmul.f32 %v956_v2, %v951_v8  ;;  %v959_v12 = vmul.f32 %v956_v2, %v952_v9  ;;  %v1092_v9 = vld [vmem:[#allocation2 + $0x58] sm:$0xff] }
 0x241   : > { %v965_v21 = vadd.f32 %v963_v20, %v958_v10  ;;  %v966_v24 = vadd.f32 %v963_v20, %v959_v12 }
 0x243   : > { %v967_v25 = vsub.f32 0.0, %v965_v21  ;;  %v968_v26 = vsub.f32 0.0, %v966_v24 }
 0x245   : > { %v969_v27 = vmul.f32 1.442695, %v967_v25  ;;  %v971_v28 = vmul.f32 1.442695, %v968_v26 }
 0x247   : > { %5497 = vpow2.f32 %v969_v27  ;;  %v986_v27 = vld [vmem:[#allocation2 + $0x48] sm:$0xff] }
 0x248   : > { %5499 = vpow2.f32 %v971_v28  ;;  %v1196_v28 = vld [vmem:[#allocation2 + $0x68] sm:$0xff] }
 0x24d   : > { %v5498_v29 = vpop.eup %5497 }
 0x24e   : > { %v5500_v30 = vpop.eup %5499  ;;  %v973_v31 = vadd.f32 1.0, %v5498_v29 }
 0x24f   : > { %v974_v32 = vadd.f32 1.0, %v5500_v30  ;;  %v1306_v30 = vld [vmem:[#allocation2 + $0x78] sm:$0xff] }
 0x250   : > { %5501 = vrcp.f32 %v973_v31 }
 0x251   : > { %5503 = vrcp.f32 %v974_v32 }
 0x256   : > { %v5502_v35 = vpop.eup %5501 }
 0x257   : > { %v5504_v36 = vpop.eup %5503  ;;  %v977_v37 = vmul.f32 %v5502_v35, %v965_v21 }
 0x258   : > { %v978_v38 = vmul.f32 %v5504_v36, %v966_v24 }
 0x259   : > { %989 = vrot.lane.b32.xlu1 %v977_v37, %s5644_s18  ;;  %v1197_v7 = vmul.f32 %v977_v37, %v5791_v22 }
 0x25a   : > { %981 = vrot.lane.b32.xlu0 %v978_v38, %s5645_s19  ;;  %1087 = vrot.lane.b32.xlu2 %v978_v38, %s5646_s20  ;;  %v1198_v8 = vmul.f32 %v978_v38, %v5793_v23 }
 0x261   : > { %991 = vrot.lane.b32.xlu1 %v978_v38, %s5644_s18 }
 0x262   : > { %1301 = vrot.lane.b32.xlu0 %v978_v38, %s5649_s23  ;;  %1299 = vrot.lane.b32.xlu2 %v977_v37, %s5649_s23 }
 0x269   : > { %1085 = vrot.lane.b32.xlu1 %v977_v37, %s5646_s20 }
 0x26a   : > { %1409 = vrot.lane.b32.xlu0 %v977_v37, %s5651_s25  ;;  %1246 = vrot.lane.b32.xlu2 %v978_v38, %s5648_s22 }
 0x271   : > { %979 = vrot.lane.b32.xlu1 %v977_v37, %s5645_s19 }
 0x272   : > { %1356 = vrot.lane.b32.xlu0 %v978_v38, %s5650_s24  ;;  %1354 = vrot.lane.b32.xlu2 %v977_v37, %s5650_s24 }
 0x279   : > { %1140 = vrot.lane.b32.xlu1 %v977_v37, %s5647_s21 }
 0x281   : > { %1142 = vrot.lane.b32.xlu1 %v978_v38, %s5647_s21 }
 0x289   : > { %1244 = vrot.lane.b32.xlu1 %v977_v37, %s5648_s22 }
 0x291   : > { %1411 = vrot.lane.b32.xlu1 %v978_v38, %s5651_s25 }
 0x299   : > { %1468 = vperm.xlu1 %5487, %v5318_v39  }
 0x2a1   : > { %1504 = vperm.xlu1 %5487, %v5319_v42   ;;  %v1147_v42 = vld [vmem:[#allocation2 + $0x60] sm:$0xff] }
 0x2a9   : > { %1511 = vperm.xlu1 %5487, %v5320_v43  }
 0x2b4   : > { %v1088_v47 = vpop.permute.xlu2 %1087 }
 0x2bc   : > { %v1300_v61 = vpop.permute.xlu2 %1299 }
 0x2c4   : > { %v1247_v32 = vpop.permute.xlu2 %1246 }
 0x2cb   : > { %v990_v44 = vpop.permute.xlu1 %989 }
 0x2cc   : > { %v982_v46 = vpop.permute.xlu0 %981 }
 0x2d3   : > { %v992_v48 = vpop.permute.xlu1 %991 }
 0x2d4   : > { %v993_v49 = vsel %vm382_vm1, %v990_v44, %v992_v48  ;;  %v994_v51 = vsel %vm382_vm1, %v992_v48, %v990_v44  ;;  %v1302_v59 = vpop.permute.xlu0 %1301  ;;  %v1355_v44 = vpop.permute.xlu2 %1354 }
 0x2d5   : > { %v997_v52 = vmul.f32 %v994_v51, %v5771_v11  ;;  %v998_v53 = vmul.f32 %v993_v49, %v5776_v13  ;;  %v1303_v2 = vsel %vm726_vm5, %v1300_v61, %v1302_v59  ;;  %v1304_v3 = vsel %vm726_vm5, %v1302_v59, %v1300_v61 }
 0x2d6   : > { %v1307_v10 = vmul.f32 %v1303_v2, %v5844_v54  ;;  %v1308_v12 = vmul.f32 %v1304_v3, %v5848_v56 }
 0x2d7   : > { %1017 = vmatpush.msra.mxu2 %v997_v52  ;;  %1037 = vmatpush.msra.mxu3 %v998_v53 }
 0x2d8   : > { %5300 = vmatmul.msk.f32.vlgmr.msra.gmra.mxu2 %vm394_vm3, %v996_v55  ;;  %5301 = vmatmul.msk.f32.vlgmr.msra.gmra.mxu3 %vm394_vm3, %v996_v55  ;;  %v1251_v55 = vld [vmem:[#allocation2 + $0x70] sm:$0xff] }
 0x2db   : > { %v1086_v60 = vpop.permute.xlu1 %1085 }
 0x2dc   : > { %v1089_v62 = vsel %vm485_vm0, %v1086_v60, %v1088_v47  ;;  %v1090_v63 = vsel %vm485_vm0, %v1088_v47, %v1086_v60  ;;  %v1410_v31 = vpop.permute.xlu0 %1409 }
 0x2dd   : > { %v1093_v4 = vmul.f32 %v1090_v63, %v5783_v16  ;;  %v1094_v5 = vmul.f32 %v1089_v62, %v5785_v17 }
 0x2df   : > { %1113 = vmatpush.msrb.mxu2 %v1093_v4  ;;  %1133 = vmatpush.msrb.mxu3 %v1094_v5  ;;  %v1361_v4 = vld [vmem:[#allocation2 + $0x80] sm:$0xff]  ;;  %v1416_v5 = vld [vmem:[#allocation2 + $0x88] sm:$0xff] }
 0x2e0   : > { %5304 = vmatmul.msk.f32.vlgmr.msrb.gmra.mxu2 %vm394_vm3, %v1092_v9  ;;  %5305 = vmatmul.msk.f32.vlgmr.msrb.gmra.mxu3 %vm394_vm3, %v1092_v9 }
 0x2e1   : > { %1217 = vmatpush.msra.mxu2 %v1197_v7  ;;  %1237 = vmatpush.msra.mxu3 %v1198_v8 }
 0x2e3   : > { %1327 = vmatpush.msrb.mxu2 %v1307_v10  ;;  %1347 = vmatpush.msrb.mxu3 %v1308_v12  ;;  %v980_v20 = vpop.permute.xlu1 %979 }
 0x2e4   : > { %v983_v21 = vsel %vm366_vm2, %v980_v20, %v982_v46  ;;  %v984_v24 = vsel %vm366_vm2, %v982_v46, %v980_v20  ;;  %v1357_v43 = vpop.permute.xlu0 %1356 }
 0x2e5   : > { %v987_v25 = vmul.f32 %v984_v24, %v5779_v14  ;;  %v988_v26 = vmul.f32 %v983_v21, %v5781_v15  ;;  %v1358_v47 = vsel %vm789_vm7, %v1355_v44, %v1357_v43  ;;  %v1359_v48 = vsel %vm789_vm7, %v1357_v43, %v1355_v44 }
 0x2e6   : > { %v1362_v59 = vmul.f32 %v1358_v47, %v5878_v18  ;;  %v1363_v60 = vmul.f32 %v1359_v48, %v5880_v19 }
 0x2e7   : > { %1060 = vmatpush.msrb.mxu0 %v987_v25  ;;  %1080 = vmatpush.msrb.mxu1 %v988_v26 }
 0x2e8   : > { %5302 = vmatmul.msk.f32.vlgmr.msrb.gmra.mxu0 %vm394_vm3, %v986_v27  ;;  %5303 = vmatmul.msk.f32.vlgmr.msrb.gmra.mxu1 %vm394_vm3, %v986_v27 }
 0x2e9   : > { %5308 = vmatmul.msk.f32.vlgmr.msra.gmra.mxu2 %vm394_vm3, %v1196_v28  ;;  %5309 = vmatmul.msk.f32.vlgmr.msra.gmra.mxu3 %vm394_vm3, %v1196_v28 }
 0x2eb   : > { %v1141_v29 = vpop.permute.xlu1 %1140 }
 0x2f1   : > { %5312 = vmatmul.msk.f32.vlgmr.msrb.gmra.mxu2 %vm394_vm3, %v1306_v30  ;;  %5313 = vmatmul.msk.f32.vlgmr.msrb.gmra.mxu3 %vm394_vm3, %v1306_v30 }
 0x2f3   : > { %v1143_v35 = vpop.permute.xlu1 %1142 }
 0x2f4   : > { %v1144_v36 = vsel %vm548_vm4, %v1141_v29, %v1143_v35  ;;  %v1145_v37 = vsel %vm548_vm4, %v1143_v35, %v1141_v29 }
 0x2f5   : > { %v1148_v38 = vmul.f32 %v1145_v37, %v5819_v40  ;;  %v1149_v39 = vmul.f32 %v1144_v36, %v5821_v41 }
 0x2f7   : > { %1168 = vmatpush.msra.mxu0 %v1148_v38  ;;  %1188 = vmatpush.msra.mxu1 %v1149_v39 }
 0x2f8   : > { %5306 = vmatmul.msk.f32.vlgmr.msra.gmra.mxu0 %vm394_vm3, %v1147_v42  ;;  %5307 = vmatmul.msk.f32.vlgmr.msra.gmra.mxu1 %vm394_vm3, %v1147_v42 }
 0x2fb   : > { %v1245_v46 = vpop.permute.xlu1 %1244 }
 0x2fc   : > { %v1248_v49 = vsel %vm665_vm6, %v1245_v46, %v1247_v32  ;;  %v1249_v51 = vsel %vm665_vm6, %v1247_v32, %v1245_v46 }
 0x2fd   : > { %v1252_v52 = vmul.f32 %v1248_v49, %v5851_v57  ;;  %v1253_v53 = vmul.f32 %v1249_v51, %v5853_v58 }
 0x2ff   : > { %1272 = vmatpush.msrb.mxu0 %v1252_v52  ;;  %1292 = vmatpush.msrb.mxu1 %v1253_v53 }
 0x300   : > { %5310 = vmatmul.msk.f32.vlgmr.msrb.gmra.mxu0 %vm394_vm3, %v1251_v55  ;;  %5311 = vmatmul.msk.f32.vlgmr.msrb.gmra.mxu1 %vm394_vm3, %v1251_v55 }
 0x301   : > { %1382 = vmatpush.msra.mxu0 %v1362_v59  ;;  %1402 = vmatpush.msra.mxu1 %v1363_v60 }
 0x303   : > { %v1412_v61 = vpop.permute.xlu1 %1411 }
 0x304   : > { %v1413_v62 = vsel %vm850_vm8, %v1410_v31, %v1412_v61  ;;  %v1414_v63 = vsel %vm850_vm8, %v1412_v61, %v1410_v31 }
 0x305   : > { %v1417_v2 = vmul.f32 %v1413_v62, %v5899_v33  ;;  %v1418_v3 = vmul.f32 %v1414_v63, %v5901_v34 }
 0x307   : > { %1437 = vmatpush.msra.mxu2 %v1417_v2  ;;  %1457 = vmatpush.msra.mxu3 %v1418_v3 }
 0x308   : > { %5314 = vmatmul.msk.f32.vlgmr.msra.gmra.mxu0 %vm394_vm3, %v1361_v4  ;;  %5315 = vmatmul.msk.f32.vlgmr.msra.gmra.mxu1 %vm394_vm3, %v1361_v4 }
 0x309   : > { %5316 = vmatmul.msk.f32.vlgmr.msra.gmra.mxu2 %vm394_vm3, %v1416_v5  ;;  %5317 = vmatmul.msk.f32.vlgmr.msra.gmra.mxu3 %vm394_vm3, %v1416_v5 }
 0x30b   : > { %v1469_v61 = vpop.permute.xlu1 %1468 }
 0x35b   : > { %v1019_v7 = vpop.f32.mrf.mxu2  ;;  %v1039_v8 = vpop.f32.mrf.mxu3 }
 0x363   : > { %v1115_v12 = vpop.f32.mrf.mxu2  ;;  %v1135_v20 = vpop.f32.mrf.mxu3 }
 0x365   : > { %v1062_v9 = vpop.f32.mrf.mxu0  ;;  %v1082_v10 = vpop.f32.mrf.mxu1 }
 0x366   : > { %v1063_v25 = vadd.f32 %v1062_v9, %v1019_v7  ;;  %v1083_v26 = vadd.f32 %v1082_v10, %v1039_v8 }
 0x368   : > { %v1138_v29 = vadd.f32 %v1115_v12, %v1063_v25  ;;  %v1139_v30 = vadd.f32 %v1135_v20, %v1083_v26 }
 0x36c   : > { %v1219_v27 = vpop.f32.mrf.mxu2  ;;  %v1239_v28 = vpop.f32.mrf.mxu3 }
 0x374   : > { %v1329_v39 = vpop.f32.mrf.mxu2  ;;  %v1349_v42 = vpop.f32.mrf.mxu3 }
 0x375   : > { %v1170_v21 = vpop.f32.mrf.mxu0  ;;  %v1190_v24 = vpop.f32.mrf.mxu1 }
 0x376   : > { %v1193_v35 = vadd.f32 %v1170_v21, %v1138_v29  ;;  %v1194_v36 = vadd.f32 %v1190_v24, %v1139_v30 }
 0x378   : > { %v1242_v37 = vadd.f32 %v1219_v27, %v1193_v35  ;;  %v1243_v38 = vadd.f32 %v1239_v28, %v1194_v36  ;;  %v1505_v27 = vpop.permute.xlu1 %1504 }
 0x37d   : > { %v1274_v31 = vpop.f32.mrf.mxu0  ;;  %v1294_v32 = vpop.f32.mrf.mxu1 }
 0x37e   : > { %v1297_v43 = vadd.f32 %v1274_v31, %v1242_v37  ;;  %v1298_v44 = vadd.f32 %v1294_v32, %v1243_v38 }
 0x380   : > { %v1352_v48 = vadd.f32 %v1329_v39, %v1297_v43  ;;  %v1353_v49 = vadd.f32 %v1349_v42, %v1298_v44  ;;  %v1512_v38 = vpop.permute.xlu1 %1511 }
 0x385   : > { %v1384_v46 = vpop.f32.mrf.mxu0  ;;  %v1404_v47 = vpop.f32.mrf.mxu1 }
 0x386   : > { %v1407_v51 = vadd.f32 %v1384_v46, %v1352_v48  ;;  %v1408_v52 = vadd.f32 %v1404_v47, %v1353_v49 }
 0x38c   : > { %v1439_v53 = vpop.f32.mrf.mxu2  ;;  %v1459_v55 = vpop.f32.mrf.mxu3 }
 0x38d   : > { %v1462_v59 = vadd.f32 %v1439_v53, %v1407_v51  ;;  %v1463_v60 = vadd.f32 %v1459_v55, %v1408_v52 }
 0x38f   : > { %v1471_v62 = vadd.f32 %v1469_v61, %v1462_v59  ;;  %v1472_v63 = vadd.f32 %v1469_v61, %v1463_v60 }
 0x391   : > { %v1477_v2 = vadd.f32 %v1472_v63, %v1471_v62 }
 0x393   : > { %1478 = vadd.xlane.f32.xlu2 %v1477_v2 }
 0x406   : > { %v1479_v3 = vpop.xlane.xlu2 %1478 }
 0x407   : > { %v1480_v4 = vmul.f32 %v1479_v3, %v5913_v45 }
 0x409   : > { %v1481_v5 = vsub.f32 %v1471_v62, %v1480_v4  ;;  %v1482_v7 = vsub.f32 %v1472_v63, %v1480_v4  ;;  %v5341_v63 = vld [vmem:[%s6866_s3 + $0x40] sm:$0xff] }
 0x40b   : > { %v1483_v8 = vmul.f32 %v1481_v5, %v1481_v5  ;;  %v1484_v9 = vmul.f32 %v1482_v7, %v1482_v7 }
 0x40d   : > { %v1485_v10 = vadd.f32 %v1484_v9, %v1483_v8  ;;  %v1537_v9 = vld [vmem:[#allocation2 + $0x90] sm:$0xff] }
 0x40f   : > { %1486 = vadd.xlane.f32.xlu0 %v1485_v10 }
 0x482   : > { %v1487_v12 = vpop.xlane.xlu0 %1486 }
 0x483   : > { %v1488_v20 = vmul.f32 %v1487_v12, %v5913_v45 }
 0x485   : > { %v1489_v21 = vadd.f32 1e-05, %v1488_v20 }
 0x487   : > { %5505 = vrsqrt.f32 %v1489_v21  ;;  %vm1496_vm14 = vweird.f32 %v1489_v21 }
 0x48d   : > { %v5506_v24 = vpop.eup %5505 }
 0x48e   : > { %v1491_v25 = vmul.f32 %v5506_v24, %v1489_v21  ;;  %vm1497_vm13 = vweird.f32 %v5506_v24 }
 0x48f   : > { %vm1498_vm15 = vmor %vm1496_vm14, %vm1497_vm13 }
 0x490   : > { %v1492_v26 = vmul.f32 %v5506_v24, %v1491_v25 }
 0x492   : > { %v1493_v28 = vmul.f32 0.5, %v1492_v26 }
 0x494   : > { %v1494_v29 = vsub.f32 1.5, %v1493_v28 }
 0x496   : > { %v1495_v30 = vmul.f32 %v5506_v24, %v1494_v29 }
 0x498   : > { %v1499_v31 = vsel %vm1498_vm15, %v5506_v24, %v1495_v30 }
 0x499   : > { %v1500_v32 = vmul.f32 %v1499_v31, %v1481_v5  ;;  %v1501_v35 = vmul.f32 %v1499_v31, %v1482_v7 }
 0x49b   : > { %v1507_v36 = vmul.f32 %v1505_v27, %v1500_v32  ;;  %v1508_v37 = vmul.f32 %v1505_v27, %v1501_v35  ;;  %v1547_v27 = vld [vmem:[#allocation2 + $0x98] sm:$0xff] }
 0x49d   : > { %v1514_v39 = vadd.f32 %v1512_v38, %v1507_v36  ;;  %v1515_v42 = vadd.f32 %v1512_v38, %v1508_v37  ;;  %v1643_v38 = vld [vmem:[#allocation2 + $0xa0] sm:$0xff] }
 0x49f   : > { %v1516_v43 = vsub.f32 0.0, %v1514_v39  ;;  %v1517_v44 = vsub.f32 0.0, %v1515_v42 }
 0x4a1   : > { %v1518_v46 = vmul.f32 1.442695, %v1516_v43  ;;  %v1520_v47 = vmul.f32 1.442695, %v1517_v44  ;;  %v1747_v43 = vld [vmem:[#allocation2 + $0xb0] sm:$0xff] }
 0x4a3   : > { %5507 = vpow2.f32 %v1518_v46 }
 0x4a4   : > { %5509 = vpow2.f32 %v1520_v47 }
 0x4a9   : > { %v5508_v48 = vpop.eup %5507 }
 0x4aa   : > { %v5510_v49 = vpop.eup %5509  ;;  %v1522_v51 = vadd.f32 1.0, %v5508_v48 }
 0x4ab   : > { %v1523_v52 = vadd.f32 1.0, %v5510_v49 }
 0x4ac   : > { %5511 = vrcp.f32 %v1522_v51 }
 0x4ad   : > { %5513 = vrcp.f32 %v1523_v52 }
 0x4b2   : > { %v5512_v53 = vpop.eup %5511 }
 0x4b3   : > { %v5514_v55 = vpop.eup %5513  ;;  %v1526_v59 = vmul.f32 %v5512_v53, %v1514_v39 }
 0x4b4   : > { %v1527_v60 = vmul.f32 %v5514_v55, %v1515_v42 }
 0x4b5   : > { %v6013_v61 = vadd.f32 %v1526_v59, %v5722_v0  ;;  %v5339_v0 = vld [vmem:[%s6866_s3 + $0x30] sm:$0xff]  ;;  %v1698_v59 = vld [vmem:[#allocation2 + $0xa8] sm:$0xff] }
 0x4b6   : > { %v6016_v62 = vadd.f32 %v1527_v60, %v5730_v1  ;;  %v5340_v1 = vld [vmem:[%s6866_s3 + $0x38] sm:$0xff] }
 0x4b7   : > { %1636 = vrot.lane.b32.xlu0 %v6013_v61, %s5646_s20  ;;  %1530 = vrot.lane.b32.xlu1 %v6013_v61, %s5645_s19  ;;  %v1748_v36 = vmul.f32 %v6013_v61, %v5791_v22 }
 0x4b8   : > { %1542 = vrot.lane.b32.xlu2 %v6016_v62, %s5644_s18  ;;  %v1749_v37 = vmul.f32 %v6016_v62, %v5793_v23 }
 0x4bf   : > { %1797 = vrot.lane.b32.xlu0 %v6016_v62, %s5648_s22  ;;  %1532 = vrot.lane.b32.xlu1 %v6016_v62, %s5645_s19 }
 0x4c0   : > { %1795 = vrot.lane.b32.xlu2 %v6013_v61, %s5648_s22 }
 0x4c7   : > { %1905 = vrot.lane.b32.xlu0 %v6013_v61, %s5650_s24  ;;  %1540 = vrot.lane.b32.xlu1 %v6013_v61, %s5644_s18 }
 0x4c8   : > { %1852 = vrot.lane.b32.xlu2 %v6016_v62, %s5649_s23 }
 0x4cf   : > { %1962 = vrot.lane.b32.xlu0 %v6016_v62, %s5651_s25  ;;  %1638 = vrot.lane.b32.xlu1 %v6016_v62, %s5646_s20 }
 0x4d0   : > { %1960 = vrot.lane.b32.xlu2 %v6013_v61, %s5651_s25 }
 0x4d7   : > { %1691 = vrot.lane.b32.xlu1 %v6013_v61, %s5647_s21 }
 0x4df   : > { %1693 = vrot.lane.b32.xlu1 %v6016_v62, %s5647_s21 }
 0x4e7   : > { %1850 = vrot.lane.b32.xlu1 %v6013_v61, %s5649_s23 }
 0x4ef   : > { %1907 = vrot.lane.b32.xlu1 %v6016_v62, %s5650_s24 }
 0x4f7   : > { %2019 = vperm.xlu1 %5487, %v5339_v0  }
 0x4ff   : > { %2055 = vperm.xlu1 %5487, %v5340_v1  }
 0x507   : > { %2062 = vperm.xlu1 %5487, %v5341_v63  }
 0x512   : > { %v1543_v10 = vpop.permute.xlu2 %1542 }
 0x51a   : > { %v1796_v39 = vpop.permute.xlu2 %1795 }
 0x522   : > { %v1853_v46 = vpop.permute.xlu2 %1852 }
 0x529   : > { %v1531_v2 = vpop.permute.xlu1 %1530  ;;  %v1637_v12 = vpop.permute.xlu0 %1636 }
 0x52a   : > { %v1961_v63 = vpop.permute.xlu2 %1960 }
 0x531   : > { %v1533_v3 = vpop.permute.xlu1 %1532  ;;  %v1798_v31 = vpop.permute.xlu0 %1797 }
 0x532   : > { %v1534_v4 = vsel %vm366_vm2, %v1531_v2, %v1533_v3  ;;  %v1535_v5 = vsel %vm366_vm2, %v1533_v3, %v1531_v2  ;;  %v1799_v48 = vsel %vm665_vm6, %v1796_v39, %v1798_v31  ;;  %v1800_v49 = vsel %vm665_vm6, %v1798_v31, %v1796_v39 }
 0x533   : > { %v1538_v7 = vmul.f32 %v1535_v5, %v5779_v14  ;;  %v1539_v8 = vmul.f32 %v1534_v4, %v5781_v15  ;;  %v1803_v60 = vmul.f32 %v1799_v48, %v5851_v57  ;;  %v1804_v0 = vmul.f32 %v1800_v49, %v5853_v58 }
 0x535   : > { %1611 = vmatpush.msrb.mxu2 %v1538_v7  ;;  %1631 = vmatpush.msrb.mxu3 %v1539_v8 }
 0x536   : > { %5323 = vmatmul.msk.f32.vlgmr.msrb.gmra.mxu2 %vm394_vm3, %v1537_v9  ;;  %5324 = vmatmul.msk.f32.vlgmr.msrb.gmra.mxu3 %vm394_vm3, %v1537_v9 }
 0x539   : > { %v1541_v20 = vpop.permute.xlu1 %1540  ;;  %v1906_v44 = vpop.permute.xlu0 %1905 }
 0x53a   : > { %v1544_v21 = vsel %vm382_vm1, %v1541_v20, %v1543_v10  ;;  %v1545_v24 = vsel %vm382_vm1, %v1543_v10, %v1541_v20  ;;  %v1802_v10 = vld [vmem:[#allocation2 + $0xb8] sm:$0xff] }
 0x53b   : > { %v1548_v25 = vmul.f32 %v1545_v24, %v5771_v11  ;;  %v1549_v26 = vmul.f32 %v1544_v21, %v5776_v13  ;;  %v1857_v21 = vld [vmem:[#allocation2 + $0xc0] sm:$0xff] }
 0x53d   : > { %1568 = vmatpush.msrb.mxu0 %v1548_v25  ;;  %1588 = vmatpush.msrb.mxu1 %v1549_v26 }
 0x53e   : > { %5321 = vmatmul.msk.f32.vlgmr.msrb.gmra.mxu0 %vm394_vm3, %v1547_v27  ;;  %5322 = vmatmul.msk.f32.vlgmr.msrb.gmra.mxu1 %vm394_vm3, %v1547_v27 }
 0x541   : > { %v1639_v28 = vpop.permute.xlu1 %1638  ;;  %v1963_v1 = vpop.permute.xlu0 %1962 }
 0x542   : > { %v1640_v29 = vsel %vm485_vm0, %v1637_v12, %v1639_v28  ;;  %v1641_v30 = vsel %vm485_vm0, %v1639_v28, %v1637_v12  ;;  %v1964_v3 = vsel %vm850_vm8, %v1961_v63, %v1963_v1  ;;  %v1965_v4 = vsel %vm850_vm8, %v1963_v1, %v1961_v63 }
 0x543   : > { %v1644_v32 = vmul.f32 %v1641_v30, %v5783_v16  ;;  %v1645_v35 = vmul.f32 %v1640_v29, %v5785_v17  ;;  %v1968_v12 = vmul.f32 %v1964_v3, %v5899_v33  ;;  %v1969_v20 = vmul.f32 %v1965_v4, %v5901_v34  ;;  %v1912_v29 = vld [vmem:[#allocation2 + $0xc8] sm:$0xff]  ;;  %v1967_v30 = vld [vmem:[#allocation2 + $0xd0] sm:$0xff] }
 0x545   : > { %1664 = vmatpush.msra.mxu0 %v1644_v32  ;;  %1684 = vmatpush.msra.mxu1 %v1645_v35 }
 0x546   : > { %5325 = vmatmul.msk.f32.vlgmr.msra.gmra.mxu0 %vm394_vm3, %v1643_v38  ;;  %5326 = vmatmul.msk.f32.vlgmr.msra.gmra.mxu1 %vm394_vm3, %v1643_v38 }
 0x547   : > { %1768 = vmatpush.msrb.mxu0 %v1748_v36  ;;  %1788 = vmatpush.msrb.mxu1 %v1749_v37 }
 0x549   : > { %v1692_v42 = vpop.permute.xlu1 %1691 }
 0x54e   : > { %5329 = vmatmul.msk.f32.vlgmr.msrb.gmra.mxu0 %vm394_vm3, %v1747_v43  ;;  %5330 = vmatmul.msk.f32.vlgmr.msrb.gmra.mxu1 %vm394_vm3, %v1747_v43 }
 0x551   : > { %v1694_v47 = vpop.permute.xlu1 %1693 }
 0x552   : > { %v1695_v51 = vsel %vm548_vm4, %v1692_v42, %v1694_v47  ;;  %v1696_v52 = vsel %vm548_vm4, %v1694_v47, %v1692_v42 }
 0x553   : > { %v1699_v53 = vmul.f32 %v1696_v52, %v5819_v40  ;;  %v1700_v55 = vmul.f32 %v1695_v51, %v5821_v41 }
 0x555   : > { %1719 = vmatpush.msra.mxu2 %v1699_v53  ;;  %1739 = vmatpush.msra.mxu3 %v1700_v55 }
 0x556   : > { %5327 = vmatmul.msk.f32.vlgmr.msra.gmra.mxu2 %vm394_vm3, %v1698_v59  ;;  %5328 = vmatmul.msk.f32.vlgmr.msra.gmra.mxu3 %vm394_vm3, %v1698_v59 }
 0x557   : > { %1823 = vmatpush.msrb.mxu2 %v1803_v60  ;;  %1843 = vmatpush.msrb.mxu3 %v1804_v0 }
 0x559   : > { %v1851_v2 = vpop.permute.xlu1 %1850 }
 0x55a   : > { %v1854_v5 = vsel %vm726_vm5, %v1851_v2, %v1853_v46  ;;  %v1855_v7 = vsel %vm726_vm5, %v1853_v46, %v1851_v2 }
 0x55b   : > { %v1858_v8 = vmul.f32 %v1854_v5, %v5844_v54  ;;  %v1859_v9 = vmul.f32 %v1855_v7, %v5848_v56 }
 0x55d   : > { %1878 = vmatpush.msra.mxu0 %v1858_v8  ;;  %1898 = vmatpush.msra.mxu1 %v1859_v9 }
 0x55e   : > { %5331 = vmatmul.msk.f32.vlgmr.msrb.gmra.mxu2 %vm394_vm3, %v1802_v10  ;;  %5332 = vmatmul.msk.f32.vlgmr.msrb.gmra.mxu3 %vm394_vm3, %v1802_v10 }
 0x55f   : > { %1988 = vmatpush.msrb.mxu0 %v1968_v12  ;;  %2008 = vmatpush.msrb.mxu1 %v1969_v20 }
 0x560   : > { %5333 = vmatmul.msk.f32.vlgmr.msra.gmra.mxu0 %vm394_vm3, %v1857_v21  ;;  %5334 = vmatmul.msk.f32.vlgmr.msra.gmra.mxu1 %vm394_vm3, %v1857_v21 }
 0x561   : > { %v1908_v24 = vpop.permute.xlu1 %1907 }
 0x562   : > { %v1909_v25 = vsel %vm789_vm7, %v1906_v44, %v1908_v24  ;;  %v1910_v26 = vsel %vm789_vm7, %v1908_v24, %v1906_v44 }
 0x563   : > { %v1913_v27 = vmul.f32 %v1909_v25, %v5878_v18  ;;  %v1914_v28 = vmul.f32 %v1910_v26, %v5880_v19 }
 0x565   : > { %1933 = vmatpush.msra.mxu2 %v1913_v27  ;;  %1953 = vmatpush.msra.mxu3 %v1914_v28 }
 0x566   : > { %5335 = vmatmul.msk.f32.vlgmr.msra.gmra.mxu2 %vm394_vm3, %v1912_v29  ;;  %5336 = vmatmul.msk.f32.vlgmr.msra.gmra.mxu3 %vm394_vm3, %v1912_v29 }
 0x568   : > { %5337 = vmatmul.msk.f32.vlgmr.msrb.gmra.mxu0 %vm394_vm3, %v1967_v30  ;;  %5338 = vmatmul.msk.f32.vlgmr.msrb.gmra.mxu1 %vm394_vm3, %v1967_v30 }
 0x569   : > { %v2020_v24 = vpop.permute.xlu1 %2019 }
 0x5b9   : > { %v1613_v37 = vpop.f32.mrf.mxu2  ;;  %v1633_v38 = vpop.f32.mrf.mxu3 }
 0x5bb   : > { %v1570_v31 = vpop.f32.mrf.mxu0  ;;  %v1590_v32 = vpop.f32.mrf.mxu1 }
 0x5bc   : > { %v1614_v43 = vadd.f32 %v1613_v37, %v1570_v31  ;;  %v1634_v44 = vadd.f32 %v1633_v38, %v1590_v32 }
 0x5c3   : > { %v1666_v35 = vpop.f32.mrf.mxu0  ;;  %v1686_v36 = vpop.f32.mrf.mxu1 }
 0x5c4   : > { %v1689_v48 = vadd.f32 %v1666_v35, %v1614_v43  ;;  %v1690_v49 = vadd.f32 %v1686_v36, %v1634_v44 }
 0x5cb   : > { %v1770_v39 = vpop.f32.mrf.mxu0  ;;  %v1790_v42 = vpop.f32.mrf.mxu1 }
 0x5d9   : > { %v1721_v46 = vpop.f32.mrf.mxu2  ;;  %v1741_v47 = vpop.f32.mrf.mxu3 }
 0x5da   : > { %v1744_v51 = vadd.f32 %v1721_v46, %v1689_v48  ;;  %v1745_v52 = vadd.f32 %v1741_v47, %v1690_v49  ;;  %v2056_v46 = vpop.permute.xlu1 %2055 }
 0x5dc   : > { %v1793_v0 = vadd.f32 %v1770_v39, %v1744_v51  ;;  %v1794_v1 = vadd.f32 %v1790_v42, %v1745_v52 }
 0x5dd   : > { %v1880_v53 = vpop.f32.mrf.mxu0  ;;  %v1900_v55 = vpop.f32.mrf.mxu1 }
 0x5e1   : > { %v1825_v59 = vpop.f32.mrf.mxu2  ;;  %v1845_v60 = vpop.f32.mrf.mxu3 }
 0x5e2   : > { %v1848_v63 = vadd.f32 %v1825_v59, %v1793_v0  ;;  %v1849_v2 = vadd.f32 %v1845_v60, %v1794_v1  ;;  %v2063_v60 = vpop.permute.xlu1 %2062 }
 0x5e4   : > { %v1903_v3 = vadd.f32 %v1880_v53, %v1848_v63  ;;  %v1904_v4 = vadd.f32 %v1900_v55, %v1849_v2 }
 0x5e5   : > { %v1990_v5 = vpop.f32.mrf.mxu0  ;;  %v2010_v7 = vpop.f32.mrf.mxu1 }
 0x5e9   : > { %v1935_v8 = vpop.f32.mrf.mxu2  ;;  %v1955_v9 = vpop.f32.mrf.mxu3 }
 0x5ea   : > { %v1958_v10 = vadd.f32 %v1935_v8, %v1903_v3  ;;  %v1959_v12 = vadd.f32 %v1955_v9, %v1904_v4 }
 0x5ec   : > { %v2013_v20 = vadd.f32 %v1990_v5, %v1958_v10  ;;  %v2014_v21 = vadd.f32 %v2010_v7, %v1959_v12 }
 0x5ee   : > { %v2022_v25 = vadd.f32 %v2020_v24, %v2013_v20  ;;  %v2023_v26 = vadd.f32 %v2020_v24, %v2014_v21  ;;  %v5360_v24 = vld [vmem:[%s6866_s3 + $0x48] sm:$0xff] }
 0x5f0   : > { %v2028_v27 = vadd.f32 %v2023_v26, %v2022_v25 }
 0x5f2   : > { %2029 = vadd.xlane.f32.xlu2 %v2028_v27 }
 0x665   : > { %v2030_v28 = vpop.xlane.xlu2 %2029 }
 0x666   : > { %v2031_v29 = vmul.f32 %v2030_v28, %v5913_v45 }
 0x668   : > { %v2032_v30 = vsub.f32 %v2022_v25, %v2031_v29  ;;  %v2033_v31 = vsub.f32 %v2023_v26, %v2031_v29  ;;  %v5361_v25 = vld [vmem:[%s6866_s3 + $0x50] sm:$0xff]  ;;  %v5362_v26 = vld [vmem:[%s6866_s3 + $0x58] sm:$0xff] }
 0x66a   : > { %v2034_v32 = vmul.f32 %v2032_v30, %v2032_v30  ;;  %v2035_v35 = vmul.f32 %v2033_v31, %v2033_v31 }
 0x66c   : > { %v2036_v36 = vadd.f32 %v2035_v35, %v2034_v32 }
 0x66e   : > { %2037 = vadd.xlane.f32.xlu0 %v2036_v36 }
 0x6e1   : > { %v2038_v37 = vpop.xlane.xlu0 %2037 }
 0x6e2   : > { %v2039_v38 = vmul.f32 %v2038_v37, %v5913_v45  ;;  %v2096_v37 = vld [vmem:[#allocation2 + $0xe0] sm:$0xff] }
 0x6e4   : > { %v2040_v39 = vadd.f32 1e-05, %v2039_v38 }
 0x6e6   : > { %5515 = vrsqrt.f32 %v2040_v39  ;;  %vm2047_vm10 = vweird.f32 %v2040_v39 }
 0x6ec   : > { %v5516_v42 = vpop.eup %5515 }
 0x6ed   : > { %v2042_v43 = vmul.f32 %v5516_v42, %v2040_v39  ;;  %vm2048_vm9 = vweird.f32 %v5516_v42 }
 0x6ee   : > { %vm2049_vm11 = vmor %vm2047_vm10, %vm2048_vm9 }
 0x6ef   : > { %v2043_v44 = vmul.f32 %v5516_v42, %v2042_v43 }
 0x6f1   : > { %v2044_v47 = vmul.f32 0.5, %v2043_v44 }
 0x6f3   : > { %v2045_v48 = vsub.f32 1.5, %v2044_v47 }
 0x6f5   : > { %v2046_v49 = vmul.f32 %v5516_v42, %v2045_v48 }
 0x6f7   : > { %v2050_v51 = vsel %vm2049_vm11, %v5516_v42, %v2046_v49 }
 0x6f8   : > { %v2051_v52 = vmul.f32 %v2050_v51, %v2032_v30  ;;  %v2052_v53 = vmul.f32 %v2050_v51, %v2033_v31 }
 0x6fa   : > { %v2058_v55 = vmul.f32 %v2056_v46, %v2051_v52  ;;  %v2059_v59 = vmul.f32 %v2056_v46, %v2052_v53  ;;  %v2192_v53 = vld [vmem:[#allocation2 + $0xe8] sm:$0xff] }
 0x6fc   : > { %v2065_v0 = vadd.f32 %v2063_v60, %v2058_v55  ;;  %v2066_v1 = vadd.f32 %v2063_v60, %v2059_v59 }
 0x6fe   : > { %v2067_v63 = vsub.f32 0.0, %v2065_v0  ;;  %v2068_v2 = vsub.f32 0.0, %v2066_v1 }
 0x700   : > { %v2069_v3 = vmul.f32 1.442695, %v2067_v63  ;;  %v2071_v4 = vmul.f32 1.442695, %v2068_v2 }
 0x702   : > { %5517 = vpow2.f32 %v2069_v3  ;;  %v2086_v3 = vld [vmem:[#allocation2 + $0xd8] sm:$0xff] }
 0x703   : > { %5519 = vpow2.f32 %v2071_v4  ;;  %v2296_v4 = vld [vmem:[#allocation2 + $0xf8] sm:$0xff] }
 0x708   : > { %v5518_v5 = vpop.eup %5517 }
 0x709   : > { %v5520_v7 = vpop.eup %5519  ;;  %v2073_v8 = vadd.f32 1.0, %v5518_v5 }
 0x70a   : > { %v2074_v9 = vadd.f32 1.0, %v5520_v7  ;;  %v2406_v7 = vld [vmem:[#allocation2 + $0x108] sm:$0xff] }
 0x70b   : > { %5521 = vrcp.f32 %v2073_v8 }
 0x70c   : > { %5523 = vrcp.f32 %v2074_v9 }
 0x711   : > { %v5522_v10 = vpop.eup %5521 }
 0x712   : > { %v5524_v12 = vpop.eup %5523  ;;  %v2077_v20 = vmul.f32 %v5522_v10, %v2065_v0 }
 0x713   : > { %v2078_v21 = vmul.f32 %v5524_v12, %v2066_v1 }
 0x714   : > { %2079 = vrot.lane.b32.xlu0 %v2077_v20, %s5645_s19  ;;  %2089 = vrot.lane.b32.xlu1 %v2077_v20, %s5644_s18  ;;  %v2297_v51 = vmul.f32 %v2077_v20, %v5791_v22 }
 0x715   : > { %2187 = vrot.lane.b32.xlu2 %v2078_v21, %s5646_s20  ;;  %v2298_v52 = vmul.f32 %v2078_v21, %v5793_v23 }
 0x71c   : > { %2399 = vrot.lane.b32.xlu0 %v2077_v20, %s5649_s23  ;;  %2091 = vrot.lane.b32.xlu1 %v2078_v21, %s5644_s18 }
 0x71d   : > { %2401 = vrot.lane.b32.xlu2 %v2078_v21, %s5649_s23 }
 0x724   : > { %2346 = vrot.lane.b32.xlu0 %v2078_v21, %s5648_s22  ;;  %2185 = vrot.lane.b32.xlu1 %v2077_v20, %s5646_s20 }
 0x725   : > { %2509 = vrot.lane.b32.xlu2 %v2077_v20, %s5651_s25 }
 0x72c   : > { %2454 = vrot.lane.b32.xlu0 %v2077_v20, %s5650_s24  ;;  %2081 = vrot.lane.b32.xlu1 %v2078_v21, %s5645_s19 }
 0x72d   : > { %2456 = vrot.lane.b32.xlu2 %v2078_v21, %s5650_s24 }
 0x734   : > { %2240 = vrot.lane.b32.xlu1 %v2077_v20, %s5647_s21 }
 0x73c   : > { %2242 = vrot.lane.b32.xlu1 %v2078_v21, %s5647_s21 }
 0x744   : > { %2344 = vrot.lane.b32.xlu1 %v2077_v20, %s5648_s22 }
 0x74c   : > { %2511 = vrot.lane.b32.xlu1 %v2078_v21, %s5651_s25 }
 0x754   : > { %2568 = vperm.xlu1 %5487, %v5360_v24  }
 0x75c   : > { %2604 = vperm.xlu1 %5487, %v5361_v25   ;;  %v2247_v25 = vld [vmem:[#allocation2 + $0xf0] sm:$0xff] }
 0x764   : > { %2611 = vperm.xlu1 %5487, %v5362_v26  }
 0x76f   : > { %v2188_v29 = vpop.permute.xlu2 %2187 }
 0x777   : > { %v2402_v42 = vpop.permute.xlu2 %2401 }
 0x77f   : > { %v2510_v9 = vpop.permute.xlu2 %2509 }
 0x786   : > { %v2090_v27 = vpop.permute.xlu1 %2089  ;;  %v2080_v28 = vpop.permute.xlu0 %2079 }
 0x78e   : > { %v2092_v30 = vpop.permute.xlu1 %2091  ;;  %v2400_v38 = vpop.permute.xlu0 %2399 }
 0x78f   : > { %v2093_v31 = vsel %vm382_vm1, %v2090_v27, %v2092_v30  ;;  %v2094_v32 = vsel %vm382_vm1, %v2092_v30, %v2090_v27  ;;  %v2403_v46 = vsel %vm726_vm5, %v2400_v38, %v2402_v42  ;;  %v2404_v47 = vsel %vm726_vm5, %v2402_v42, %v2400_v38  ;;  %v2457_v27 = vpop.permute.xlu2 %2456 }
 0x790   : > { %v2097_v35 = vmul.f32 %v2094_v32, %v5771_v11  ;;  %v2098_v36 = vmul.f32 %v2093_v31, %v5776_v13  ;;  %v2407_v55 = vmul.f32 %v2403_v46, %v5844_v54  ;;  %v2408_v59 = vmul.f32 %v2404_v47, %v5848_v56 }
 0x792   : > { %2117 = vmatpush.msrb.mxu2 %v2097_v35  ;;  %2137 = vmatpush.msrb.mxu3 %v2098_v36 }
 0x793   : > { %5342 = vmatmul.msk.f32.vlgmr.msrb.gmra.mxu2 %vm394_vm3, %v2096_v37  ;;  %5343 = vmatmul.msk.f32.vlgmr.msrb.gmra.mxu3 %vm394_vm3, %v2096_v37  ;;  %v2351_v37 = vld [vmem:[#allocation2 + $0x100] sm:$0xff] }
 0x796   : > { %v2186_v39 = vpop.permute.xlu1 %2185  ;;  %v2347_v8 = vpop.permute.xlu0 %2346 }
 0x797   : > { %v2189_v43 = vsel %vm485_vm0, %v2186_v39, %v2188_v29  ;;  %v2190_v44 = vsel %vm485_vm0, %v2188_v29, %v2186_v39 }
 0x798   : > { %v2193_v48 = vmul.f32 %v2190_v44, %v5783_v16  ;;  %v2194_v49 = vmul.f32 %v2189_v43, %v5785_v17 }
 0x79a   : > { %2213 = vmatpush.msra.mxu2 %v2193_v48  ;;  %2233 = vmatpush.msra.mxu3 %v2194_v49  ;;  %v2461_v48 = vld [vmem:[#allocation2 + $0x110] sm:$0xff]  ;;  %v2516_v49 = vld [vmem:[#allocation2 + $0x118] sm:$0xff] }
 0x79b   : > { %5346 = vmatmul.msk.f32.vlgmr.msra.gmra.mxu2 %vm394_vm3, %v2192_v53  ;;  %5347 = vmatmul.msk.f32.vlgmr.msra.gmra.mxu3 %vm394_vm3, %v2192_v53 }
 0x79c   : > { %2317 = vmatpush.msrb.mxu2 %v2297_v51  ;;  %2337 = vmatpush.msrb.mxu3 %v2298_v52 }
 0x79e   : > { %2427 = vmatpush.msra.mxu2 %v2407_v55  ;;  %2447 = vmatpush.msra.mxu3 %v2408_v59  ;;  %v2082_v60 = vpop.permute.xlu1 %2081  ;;  %v2455_v26 = vpop.permute.xlu0 %2454 }
 0x79f   : > { %v2083_v0 = vsel %vm366_vm2, %v2080_v28, %v2082_v60  ;;  %v2084_v1 = vsel %vm366_vm2, %v2082_v60, %v2080_v28  ;;  %v2458_v29 = vsel %vm789_vm7, %v2455_v26, %v2457_v27  ;;  %v2459_v30 = vsel %vm789_vm7, %v2457_v27, %v2455_v26 }
 0x7a0   : > { %v2087_v63 = vmul.f32 %v2084_v1, %v5779_v14  ;;  %v2088_v2 = vmul.f32 %v2083_v0, %v5781_v15  ;;  %v2462_v38 = vmul.f32 %v2458_v29, %v5878_v18  ;;  %v2463_v39 = vmul.f32 %v2459_v30, %v5880_v19 }
 0x7a2   : > { %2160 = vmatpush.msra.mxu0 %v2087_v63  ;;  %2180 = vmatpush.msra.mxu1 %v2088_v2 }
 0x7a3   : > { %5344 = vmatmul.msk.f32.vlgmr.msra.gmra.mxu0 %vm394_vm3, %v2086_v3  ;;  %5345 = vmatmul.msk.f32.vlgmr.msra.gmra.mxu1 %vm394_vm3, %v2086_v3 }
 0x7a4   : > { %5350 = vmatmul.msk.f32.vlgmr.msrb.gmra.mxu2 %vm394_vm3, %v2296_v4  ;;  %5351 = vmatmul.msk.f32.vlgmr.msrb.gmra.mxu3 %vm394_vm3, %v2296_v4 }
 0x7a6   : > { %v2241_v5 = vpop.permute.xlu1 %2240 }
 0x7ac   : > { %5354 = vmatmul.msk.f32.vlgmr.msra.gmra.mxu2 %vm394_vm3, %v2406_v7  ;;  %5355 = vmatmul.msk.f32.vlgmr.msra.gmra.mxu3 %vm394_vm3, %v2406_v7 }
 0x7ae   : > { %v2243_v10 = vpop.permute.xlu1 %2242 }
 0x7af   : > { %v2244_v12 = vsel %vm548_vm4, %v2241_v5, %v2243_v10  ;;  %v2245_v20 = vsel %vm548_vm4, %v2243_v10, %v2241_v5 }
 0x7b0   : > { %v2248_v21 = vmul.f32 %v2245_v20, %v5819_v40  ;;  %v2249_v24 = vmul.f32 %v2244_v12, %v5821_v41 }
 0x7b2   : > { %2268 = vmatpush.msrb.mxu0 %v2248_v21  ;;  %2288 = vmatpush.msrb.mxu1 %v2249_v24 }
 0x7b3   : > { %5348 = vmatmul.msk.f32.vlgmr.msrb.gmra.mxu0 %vm394_vm3, %v2247_v25  ;;  %5349 = vmatmul.msk.f32.vlgmr.msrb.gmra.mxu1 %vm394_vm3, %v2247_v25 }
 0x7b6   : > { %v2345_v28 = vpop.permute.xlu1 %2344 }
 0x7b7   : > { %v2348_v31 = vsel %vm665_vm6, %v2345_v28, %v2347_v8  ;;  %v2349_v32 = vsel %vm665_vm6, %v2347_v8, %v2345_v28 }
 0x7b8   : > { %v2352_v35 = vmul.f32 %v2348_v31, %v5851_v57  ;;  %v2353_v36 = vmul.f32 %v2349_v32, %v5853_v58 }
 0x7ba   : > { %2372 = vmatpush.msra.mxu0 %v2352_v35  ;;  %2392 = vmatpush.msra.mxu1 %v2353_v36 }
 0x7bb   : > { %5352 = vmatmul.msk.f32.vlgmr.msra.gmra.mxu0 %vm394_vm3, %v2351_v37  ;;  %5353 = vmatmul.msk.f32.vlgmr.msra.gmra.mxu1 %vm394_vm3, %v2351_v37 }
 0x7bc   : > { %2482 = vmatpush.msrb.mxu0 %v2462_v38  ;;  %2502 = vmatpush.msrb.mxu1 %v2463_v39 }
 0x7be   : > { %v2512_v42 = vpop.permute.xlu1 %2511 }
 0x7bf   : > { %v2513_v43 = vsel %vm850_vm8, %v2510_v9, %v2512_v42  ;;  %v2514_v44 = vsel %vm850_vm8, %v2512_v42, %v2510_v9 }
 0x7c0   : > { %v2517_v46 = vmul.f32 %v2513_v43, %v5899_v33  ;;  %v2518_v47 = vmul.f32 %v2514_v44, %v5901_v34 }
 0x7c2   : > { %2537 = vmatpush.msrb.mxu2 %v2517_v46  ;;  %2557 = vmatpush.msrb.mxu3 %v2518_v47 }
 0x7c3   : > { %5356 = vmatmul.msk.f32.vlgmr.msrb.gmra.mxu0 %vm394_vm3, %v2461_v48  ;;  %5357 = vmatmul.msk.f32.vlgmr.msrb.gmra.mxu1 %vm394_vm3, %v2461_v48 }
 0x7c4   : > { %5358 = vmatmul.msk.f32.vlgmr.msrb.gmra.mxu2 %vm394_vm3, %v2516_v49  ;;  %5359 = vmatmul.msk.f32.vlgmr.msrb.gmra.mxu3 %vm394_vm3, %v2516_v49 }
 0x7c6   : > { %v2569_v42 = vpop.permute.xlu1 %2568 }
 0x816   : > { %v2119_v51 = vpop.f32.mrf.mxu2  ;;  %v2139_v52 = vpop.f32.mrf.mxu3 }
 0x81e   : > { %v2215_v59 = vpop.f32.mrf.mxu2  ;;  %v2235_v60 = vpop.f32.mrf.mxu3 }
 0x820   : > { %v2162_v53 = vpop.f32.mrf.mxu0  ;;  %v2182_v55 = vpop.f32.mrf.mxu1 }
 0x821   : > { %v2163_v63 = vadd.f32 %v2162_v53, %v2119_v51  ;;  %v2183_v2 = vadd.f32 %v2182_v55, %v2139_v52 }
 0x823   : > { %v2238_v5 = vadd.f32 %v2215_v59, %v2163_v63  ;;  %v2239_v7 = vadd.f32 %v2235_v60, %v2183_v2 }
 0x827   : > { %v2319_v3 = vpop.f32.mrf.mxu2  ;;  %v2339_v4 = vpop.f32.mrf.mxu3 }
 0x82f   : > { %v2429_v24 = vpop.f32.mrf.mxu2  ;;  %v2449_v25 = vpop.f32.mrf.mxu3 }
 0x830   : > { %v2270_v0 = vpop.f32.mrf.mxu0  ;;  %v2290_v1 = vpop.f32.mrf.mxu1 }
 0x831   : > { %v2293_v10 = vadd.f32 %v2270_v0, %v2238_v5  ;;  %v2294_v12 = vadd.f32 %v2290_v1, %v2239_v7 }
 0x833   : > { %v2342_v20 = vadd.f32 %v2319_v3, %v2293_v10  ;;  %v2343_v21 = vadd.f32 %v2339_v4, %v2294_v12  ;;  %v2605_v3 = vpop.permute.xlu1 %2604 }
 0x838   : > { %v2374_v8 = vpop.f32.mrf.mxu0  ;;  %v2394_v9 = vpop.f32.mrf.mxu1 }
 0x839   : > { %v2397_v26 = vadd.f32 %v2374_v8, %v2342_v20  ;;  %v2398_v27 = vadd.f32 %v2394_v9, %v2343_v21 }
 0x83b   : > { %v2452_v30 = vadd.f32 %v2429_v24, %v2397_v26  ;;  %v2453_v31 = vadd.f32 %v2449_v25, %v2398_v27  ;;  %v2612_v21 = vpop.permute.xlu1 %2611 }
 0x840   : > { %v2484_v28 = vpop.f32.mrf.mxu0  ;;  %v2504_v29 = vpop.f32.mrf.mxu1 }
 0x841   : > { %v2507_v32 = vadd.f32 %v2484_v28, %v2452_v30  ;;  %v2508_v35 = vadd.f32 %v2504_v29, %v2453_v31 }
 0x847   : > { %v2539_v36 = vpop.f32.mrf.mxu2  ;;  %v2559_v37 = vpop.f32.mrf.mxu3 }
 0x848   : > { %v2562_v38 = vadd.f32 %v2539_v36, %v2507_v32  ;;  %v2563_v39 = vadd.f32 %v2559_v37, %v2508_v35 }
 0x84a   : > { %v2571_v43 = vadd.f32 %v2569_v42, %v2562_v38  ;;  %v2572_v44 = vadd.f32 %v2569_v42, %v2563_v39 }
 0x84c   : > { %v2577_v46 = vadd.f32 %v2572_v44, %v2571_v43 }
 0x84e   : > { %2578 = vadd.xlane.f32.xlu0 %v2577_v46 }
 0x8c1   : > { %v2579_v47 = vpop.xlane.xlu0 %2578 }
 0x8c2   : > { %v2580_v48 = vmul.f32 %v2579_v47, %v5913_v45 }
 0x8c4   : > { %v2581_v49 = vsub.f32 %v2571_v43, %v2580_v48  ;;  %v2582_v51 = vsub.f32 %v2572_v44, %v2580_v48 }
 0x8c6   : > { %v2583_v52 = vmul.f32 %v2581_v49, %v2581_v49  ;;  %v2584_v53 = vmul.f32 %v2582_v51, %v2582_v51 }
 0x8c8   : > { %v2585_v55 = vadd.f32 %v2584_v53, %v2583_v52 }
 0x8ca   : > { %2586 = vadd.xlane.f32.xlu2 %v2585_v55 }
 0x93d   : > { %v2587_v59 = vpop.xlane.xlu2 %2586 }
 0x93e   : > { %v2588_v60 = vmul.f32 %v2587_v59, %v5913_v45 }
 0x940   : > { %v2589_v0 = vadd.f32 1e-05, %v2588_v60 }
 0x942   : > { %5525 = vrsqrt.f32 %v2589_v0  ;;  %vm2596_vm13 = vweird.f32 %v2589_v0 }
 0x948   : > { %v5526_v1 = vpop.eup %5525 }
 0x949   : > { %v2591_v63 = vmul.f32 %v5526_v1, %v2589_v0  ;;  %vm2597_vm12 = vweird.f32 %v5526_v1 }
 0x94a   : > { %vm2598_vm14 = vmor %vm2596_vm13, %vm2597_vm12 }
 0x94b   : > { %v2592_v2 = vmul.f32 %v5526_v1, %v2591_v63 }
 0x94d   : > { %v2593_v4 = vmul.f32 0.5, %v2592_v2 }
 0x94f   : > { %v2594_v5 = vsub.f32 1.5, %v2593_v4 }
 0x951   : > { %v2595_v7 = vmul.f32 %v5526_v1, %v2594_v5 }
 0x953   : > { %v2599_v8 = vsel %vm2598_vm14, %v5526_v1, %v2595_v7  ;;  %v2647_v1 = vld [vmem:[#allocation2 + $0x128] sm:$0xff] }
 0x954   : > { %v2600_v9 = vmul.f32 %v2599_v8, %v2581_v49  ;;  %v2601_v10 = vmul.f32 %v2599_v8, %v2582_v51  ;;  %v2637_v51 = vld [vmem:[#allocation2 + $0x120] sm:$0xff] }
 0x955   : > { %v5381_v8 = vld [vmem:[%s6866_s3 + $0x60] sm:$0xff] }
 0x956   : > { %v2607_v12 = vmul.f32 %v2605_v3, %v2600_v9  ;;  %v2608_v20 = vmul.f32 %v2605_v3, %v2601_v10 }
 0x958   : > { %v2614_v24 = vadd.f32 %v2612_v21, %v2607_v12  ;;  %v2615_v25 = vadd.f32 %v2612_v21, %v2608_v20  ;;  %v2743_v12 = vld [vmem:[#allocation2 + $0x130] sm:$0xff] }
 0x95a   : > { %v2616_v26 = vsub.f32 0.0, %v2614_v24  ;;  %v2617_v27 = vsub.f32 0.0, %v2615_v25 }
 0x95c   : > { %v2618_v28 = vmul.f32 1.442695, %v2616_v26  ;;  %v2620_v29 = vmul.f32 1.442695, %v2617_v27 }
 0x95e   : > { %5527 = vpow2.f32 %v2618_v28 }
 0x95f   : > { %5529 = vpow2.f32 %v2620_v29 }
 0x964   : > { %v5528_v30 = vpop.eup %5527 }
 0x965   : > { %v5530_v31 = vpop.eup %5529  ;;  %v2622_v32 = vadd.f32 1.0, %v5528_v30  ;;  %v2798_v30 = vld [vmem:[#allocation2 + $0x138] sm:$0xff] }
 0x966   : > { %v2623_v35 = vadd.f32 1.0, %v5530_v31  ;;  %v2847_v31 = vld [vmem:[#allocation2 + $0x140] sm:$0xff] }
 0x967   : > { %5531 = vrcp.f32 %v2622_v32 }
 0x968   : > { %5533 = vrcp.f32 %v2623_v35 }
 0x96d   : > { %v5532_v36 = vpop.eup %5531 }
 0x96e   : > { %v5534_v37 = vpop.eup %5533  ;;  %v2626_v38 = vmul.f32 %v5532_v36, %v2614_v24 }
 0x96f   : > { %v2627_v39 = vmul.f32 %v5534_v37, %v2615_v25  ;;  %v5382_v25 = vld [vmem:[%s6866_s3 + $0x68] sm:$0xff]  ;;  %v5383_v37 = vld [vmem:[%s6866_s3 + $0x70] sm:$0xff] }
 0x970   : > { %v6227_v42 = vadd.f32 %v2626_v38, %v6013_v61 }
 0x971   : > { %v6230_v43 = vadd.f32 %v2627_v39, %v6016_v62 }
 0x972   : > { %2736 = vrot.lane.b32.xlu2 %v6227_v42, %s5646_s20  ;;  %2630 = vrot.lane.b32.xlu1 %v6227_v42, %s5645_s19  ;;  %v2848_v9 = vmul.f32 %v6227_v42, %v5791_v22 }
 0x973   : > { %2642 = vrot.lane.b32.xlu0 %v6230_v43, %s5644_s18  ;;  %v2849_v10 = vmul.f32 %v6230_v43, %v5793_v23 }
 0x97a   : > { %2897 = vrot.lane.b32.xlu2 %v6230_v43, %s5648_s22  ;;  %2632 = vrot.lane.b32.xlu1 %v6230_v43, %s5645_s19 }
 0x97b   : > { %2793 = vrot.lane.b32.xlu0 %v6230_v43, %s5647_s21 }
 0x982   : > { %3005 = vrot.lane.b32.xlu2 %v6227_v42, %s5650_s24  ;;  %2640 = vrot.lane.b32.xlu1 %v6227_v42, %s5644_s18 }
 0x983   : > { %2950 = vrot.lane.b32.xlu0 %v6227_v42, %s5649_s23 }
 0x98a   : > { %3062 = vrot.lane.b32.xlu2 %v6230_v43, %s5651_s25  ;;  %2738 = vrot.lane.b32.xlu1 %v6230_v43, %s5646_s20 }
 0x98b   : > { %3007 = vrot.lane.b32.xlu0 %v6230_v43, %s5650_s24 }
 0x992   : > { %2791 = vrot.lane.b32.xlu1 %v6227_v42, %s5647_s21 }
 0x993   : > { %3119 = vperm.xlu0 %5488, %v5381_v8  }
 0x99a   : > { %2895 = vrot.lane.b32.xlu1 %v6227_v42, %s5648_s22 }
 0x99b   : > { %3155 = vperm.xlu0 %5488, %v5382_v25  }
 0x9a2   : > { %2952 = vrot.lane.b32.xlu1 %v6230_v43, %s5649_s23 }
 0x9a3   : > { %3162 = vperm.xlu0 %5488, %v5383_v37  }
 0x9aa   : > { %3060 = vrot.lane.b32.xlu1 %v6227_v42, %s5651_s25 }
 0x9cc   : > { %v2737_v63 = vpop.permute.xlu2 %2736 }
 0x9d4   : > { %v2898_v21 = vpop.permute.xlu2 %2897 }
 0x9dc   : > { %v3006_v35 = vpop.permute.xlu2 %3005 }
 0x9e4   : > { %v2631_v61 = vpop.permute.xlu1 %2630 }
 0x9e5   : > { %v2643_v62 = vpop.permute.xlu0 %2642 }
 0x9ec   : > { %v2633_v44 = vpop.permute.xlu1 %2632 }
 0x9ed   : > { %v2634_v46 = vsel %vm366_vm2, %v2631_v61, %v2633_v44  ;;  %v2635_v47 = vsel %vm366_vm2, %v2633_v44, %v2631_v61  ;;  %v2794_v59 = vpop.permute.xlu0 %2793 }
 0x9ee   : > { %v2638_v48 = vmul.f32 %v2635_v47, %v5779_v14  ;;  %v2639_v49 = vmul.f32 %v2634_v46, %v5781_v15  ;;  %v2902_v47 = vld [vmem:[#allocation2 + $0x148] sm:$0xff] }
 0x9f0   : > { %2711 = vmatpush.msra.mxu2 %v2638_v48  ;;  %2731 = vmatpush.msra.mxu3 %v2639_v49 }
 0x9f1   : > { %5365 = vmatmul.msk.f32.vlgmr.msra.gmra.mxu2 %vm394_vm3, %v2637_v51  ;;  %5366 = vmatmul.msk.f32.vlgmr.msra.gmra.mxu3 %vm394_vm3, %v2637_v51 }
 0x9f4   : > { %v2641_v52 = vpop.permute.xlu1 %2640 }
 0x9f5   : > { %v2644_v53 = vsel %vm382_vm1, %v2641_v52, %v2643_v62  ;;  %v2645_v55 = vsel %vm382_vm1, %v2643_v62, %v2641_v52  ;;  %v2951_v20 = vpop.permute.xlu0 %2950 }
 0x9f6   : > { %v2648_v60 = vmul.f32 %v2645_v55, %v5771_v11  ;;  %v2649_v0 = vmul.f32 %v2644_v53, %v5776_v13 }
 0x9f8   : > { %2668 = vmatpush.msra.mxu0 %v2648_v60  ;;  %2688 = vmatpush.msra.mxu1 %v2649_v0  ;;  %v2957_v60 = vld [vmem:[#allocation2 + $0x150] sm:$0xff]  ;;  %v3012_v0 = vld [vmem:[#allocation2 + $0x158] sm:$0xff] }
 0x9f9   : > { %5363 = vmatmul.msk.f32.vlgmr.msra.gmra.mxu0 %vm394_vm3, %v2647_v1  ;;  %5364 = vmatmul.msk.f32.vlgmr.msra.gmra.mxu1 %vm394_vm3, %v2647_v1  ;;  %v3063_v1 = vpop.permute.xlu2 %3062 }
 0x9fc   : > { %v2739_v2 = vpop.permute.xlu1 %2738 }
 0x9fd   : > { %v2740_v3 = vsel %vm485_vm0, %v2737_v63, %v2739_v2  ;;  %v2741_v4 = vsel %vm485_vm0, %v2739_v2, %v2737_v63  ;;  %v3008_v32 = vpop.permute.xlu0 %3007 }
 0x9fe   : > { %v2744_v5 = vmul.f32 %v2741_v4, %v5783_v16  ;;  %v2745_v7 = vmul.f32 %v2740_v3, %v5785_v17  ;;  %v3009_v38 = vsel %vm789_vm7, %v3006_v35, %v3008_v32  ;;  %v3010_v39 = vsel %vm789_vm7, %v3008_v32, %v3006_v35 }
 0x9ff   : > { %v3013_v48 = vmul.f32 %v3009_v38, %v5878_v18  ;;  %v3014_v49 = vmul.f32 %v3010_v39, %v5880_v19 }
 0xa00   : > { %2764 = vmatpush.msrb.mxu0 %v2744_v5  ;;  %2784 = vmatpush.msrb.mxu1 %v2745_v7  ;;  %v3067_v7 = vld [vmem:[#allocation2 + $0x160] sm:$0xff] }
 0xa01   : > { %5367 = vmatmul.msk.f32.vlgmr.msrb.gmra.mxu0 %vm394_vm3, %v2743_v12  ;;  %5368 = vmatmul.msk.f32.vlgmr.msrb.gmra.mxu1 %vm394_vm3, %v2743_v12 }
 0xa02   : > { %2868 = vmatpush.msra.mxu0 %v2848_v9  ;;  %2888 = vmatpush.msra.mxu1 %v2849_v10 }
 0xa04   : > { %v2792_v24 = vpop.permute.xlu1 %2791 }
 0xa05   : > { %v2795_v26 = vsel %vm548_vm4, %v2792_v24, %v2794_v59  ;;  %v2796_v27 = vsel %vm548_vm4, %v2794_v59, %v2792_v24 }
 0xa06   : > { %v2799_v28 = vmul.f32 %v2796_v27, %v5819_v40  ;;  %v2800_v29 = vmul.f32 %v2795_v26, %v5821_v41 }
 0xa08   : > { %2819 = vmatpush.msrb.mxu2 %v2799_v28  ;;  %2839 = vmatpush.msrb.mxu3 %v2800_v29 }
 0xa09   : > { %5369 = vmatmul.msk.f32.vlgmr.msrb.gmra.mxu2 %vm394_vm3, %v2798_v30  ;;  %5370 = vmatmul.msk.f32.vlgmr.msrb.gmra.mxu3 %vm394_vm3, %v2798_v30 }
 0xa0a   : > { %5371 = vmatmul.msk.f32.vlgmr.msra.gmra.mxu0 %vm394_vm3, %v2847_v31  ;;  %5372 = vmatmul.msk.f32.vlgmr.msra.gmra.mxu1 %vm394_vm3, %v2847_v31 }
 0xa0c   : > { %v2896_v36 = vpop.permute.xlu1 %2895 }
 0xa0d   : > { %v2899_v61 = vsel %vm665_vm6, %v2896_v36, %v2898_v21  ;;  %v2900_v62 = vsel %vm665_vm6, %v2898_v21, %v2896_v36 }
 0xa0e   : > { %v2903_v44 = vmul.f32 %v2899_v61, %v5851_v57  ;;  %v2904_v46 = vmul.f32 %v2900_v62, %v5853_v58 }
 0xa10   : > { %2923 = vmatpush.msra.mxu2 %v2903_v44  ;;  %2943 = vmatpush.msra.mxu3 %v2904_v46 }
 0xa11   : > { %5373 = vmatmul.msk.f32.vlgmr.msra.gmra.mxu2 %vm394_vm3, %v2902_v47  ;;  %5374 = vmatmul.msk.f32.vlgmr.msra.gmra.mxu3 %vm394_vm3, %v2902_v47 }
 0xa12   : > { %3033 = vmatpush.msrb.mxu2 %v3013_v48  ;;  %3053 = vmatpush.msrb.mxu3 %v3014_v49 }
 0xa14   : > { %v2953_v51 = vpop.permute.xlu1 %2952 }
 0xa15   : > { %v2954_v52 = vsel %vm726_vm5, %v2951_v20, %v2953_v51  ;;  %v2955_v53 = vsel %vm726_vm5, %v2953_v51, %v2951_v20 }
 0xa16   : > { %v2958_v55 = vmul.f32 %v2954_v52, %v5844_v54  ;;  %v2959_v59 = vmul.f32 %v2955_v53, %v5848_v56 }
 0xa18   : > { %2978 = vmatpush.msrb.mxu0 %v2958_v55  ;;  %2998 = vmatpush.msrb.mxu1 %v2959_v59 }
 0xa19   : > { %5375 = vmatmul.msk.f32.vlgmr.msrb.gmra.mxu0 %vm394_vm3, %v2957_v60  ;;  %5376 = vmatmul.msk.f32.vlgmr.msrb.gmra.mxu1 %vm394_vm3, %v2957_v60 }
 0xa1a   : > { %5377 = vmatmul.msk.f32.vlgmr.msrb.gmra.mxu2 %vm394_vm3, %v3012_v0  ;;  %5378 = vmatmul.msk.f32.vlgmr.msrb.gmra.mxu3 %vm394_vm3, %v3012_v0 }
 0xa1c   : > { %v3061_v63 = vpop.permute.xlu1 %3060 }
 0xa1d   : > { %v3064_v2 = vsel %vm850_vm8, %v3061_v63, %v3063_v1  ;;  %v3065_v3 = vsel %vm850_vm8, %v3063_v1, %v3061_v63  ;;  %v3120_v1 = vpop.permute.xlu0 %3119 }
 0xa1e   : > { %v3068_v4 = vmul.f32 %v3064_v2, %v5899_v33  ;;  %v3069_v5 = vmul.f32 %v3065_v3, %v5901_v34 }
 0xa20   : > { %3088 = vmatpush.msra.mxu0 %v3068_v4  ;;  %3108 = vmatpush.msra.mxu1 %v3069_v5 }
 0xa21   : > { %5379 = vmatmul.msk.f32.vlgmr.msra.gmra.mxu0 %vm394_vm3, %v3067_v7  ;;  %5380 = vmatmul.msk.f32.vlgmr.msra.gmra.mxu1 %vm394_vm3, %v3067_v7 }
 0xa74   : > { %v2713_v20 = vpop.f32.mrf.mxu2  ;;  %v2733_v21 = vpop.f32.mrf.mxu3 }
 0xa76   : > { %v2670_v8 = vpop.f32.mrf.mxu0  ;;  %v2690_v9 = vpop.f32.mrf.mxu1 }
 0xa77   : > { %v2714_v26 = vadd.f32 %v2713_v20, %v2670_v8  ;;  %v2734_v27 = vadd.f32 %v2733_v21, %v2690_v9 }
 0xa7e   : > { %v2766_v10 = vpop.f32.mrf.mxu0  ;;  %v2786_v12 = vpop.f32.mrf.mxu1 }
 0xa7f   : > { %v2789_v30 = vadd.f32 %v2766_v10, %v2714_v26  ;;  %v2790_v31 = vadd.f32 %v2786_v12, %v2734_v27 }
 0xa87   : > { %v2870_v24 = vpop.f32.mrf.mxu0  ;;  %v2890_v25 = vpop.f32.mrf.mxu1 }
 0xa8c   : > { %v2821_v28 = vpop.f32.mrf.mxu2  ;;  %v2841_v29 = vpop.f32.mrf.mxu3 }
 0xa8d   : > { %v2844_v32 = vadd.f32 %v2821_v28, %v2789_v30  ;;  %v2845_v35 = vadd.f32 %v2841_v29, %v2790_v31  ;;  %v3156_v28 = vpop.permute.xlu0 %3155 }
 0xa8f   : > { %v2893_v38 = vadd.f32 %v2870_v24, %v2844_v32  ;;  %v2894_v39 = vadd.f32 %v2890_v25, %v2845_v35 }
 0xa94   : > { %v2925_v36 = vpop.f32.mrf.mxu2  ;;  %v2945_v37 = vpop.f32.mrf.mxu3 }
 0xa95   : > { %v2948_v44 = vadd.f32 %v2925_v36, %v2893_v38  ;;  %v2949_v46 = vadd.f32 %v2945_v37, %v2894_v39  ;;  %v3163_v39 = vpop.permute.xlu0 %3162 }
 0xa96   : > { %v2980_v61 = vpop.f32.mrf.mxu0  ;;  %v3000_v62 = vpop.f32.mrf.mxu1 }
 0xa97   : > { %v3003_v47 = vadd.f32 %v2980_v61, %v2948_v44  ;;  %v3004_v48 = vadd.f32 %v3000_v62, %v2949_v46 }
 0xa9d   : > { %v3035_v49 = vpop.f32.mrf.mxu2  ;;  %v3055_v51 = vpop.f32.mrf.mxu3 }
 0xa9e   : > { %v3058_v52 = vadd.f32 %v3035_v49, %v3003_v47  ;;  %v3059_v53 = vadd.f32 %v3055_v51, %v3004_v48  ;;  %v3090_v55 = vpop.f32.mrf.mxu0  ;;  %v3110_v59 = vpop.f32.mrf.mxu1 }
 0xaa0   : > { %v3113_v60 = vadd.f32 %v3090_v55, %v3058_v52  ;;  %v3114_v0 = vadd.f32 %v3110_v59, %v3059_v53 }
 0xaa2   : > { %v3122_v63 = vadd.f32 %v3120_v1, %v3113_v60  ;;  %v3123_v2 = vadd.f32 %v3120_v1, %v3114_v0  ;;  %v5402_v1 = vld [vmem:[%s6866_s3 + $0x78] sm:$0xff] }
 0xaa4   : > { %v3128_v3 = vadd.f32 %v3123_v2, %v3122_v63 }
 0xaa6   : > { %3129 = vadd.xlane.f32.xlu1 %v3128_v3 }
 0xb19   : > { %v3130_v4 = vpop.xlane.xlu1 %3129 }
 0xb1a   : > { %v3131_v5 = vmul.f32 %v3130_v4, %v5913_v45 }
 0xb1c   : > { %v3132_v7 = vsub.f32 %v3122_v63, %v3131_v5  ;;  %v3133_v8 = vsub.f32 %v3123_v2, %v3131_v5  ;;  %v5403_v63 = vld [vmem:[%s6866_s3 + $0x80] sm:$0xff]  ;;  %v5404_v2 = vld [vmem:[%s6866_s3 + $0x88] sm:$0xff] }
 0xb1e   : > { %v3134_v9 = vmul.f32 %v3132_v7, %v3132_v7  ;;  %v3135_v10 = vmul.f32 %v3133_v8, %v3133_v8 }
 0xb20   : > { %v3136_v12 = vadd.f32 %v3135_v10, %v3134_v9 }
 0xb22   : > { %3137 = vadd.xlane.f32.xlu2 %v3136_v12 }
 0xb95   : > { %v3138_v20 = vpop.xlane.xlu2 %3137 }
 0xb96   : > { %v3139_v21 = vmul.f32 %v3138_v20, %v5913_v45 }
 0xb98   : > { %v3140_v24 = vadd.f32 1e-05, %v3139_v21 }
 0xb9a   : > { %5535 = vrsqrt.f32 %v3140_v24  ;;  %vm3147_vm9 = vweird.f32 %v3140_v24 }
 0xba0   : > { %v5536_v25 = vpop.eup %5535 }
 0xba1   : > { %v3142_v26 = vmul.f32 %v5536_v25, %v3140_v24  ;;  %vm3148_vm15 = vweird.f32 %v5536_v25 }
 0xba2   : > { %vm3149_vm10 = vmor %vm3147_vm9, %vm3148_vm15 }
 0xba3   : > { %v3143_v27 = vmul.f32 %v5536_v25, %v3142_v26  ;;  %v3196_v26 = vld [vmem:[#allocation2 + $0x170] sm:$0xff] }
 0xba5   : > { %v3144_v29 = vmul.f32 0.5, %v3143_v27 }
 0xba7   : > { %v3145_v30 = vsub.f32 1.5, %v3144_v29 }
 0xba9   : > { %v3146_v31 = vmul.f32 %v5536_v25, %v3145_v30  ;;  %v3292_v30 = vld [vmem:[#allocation2 + $0x178] sm:$0xff] }
 0xbab   : > { %v3150_v32 = vsel %vm3149_vm10, %v5536_v25, %v3146_v31 }
 0xbac   : > { %v3151_v35 = vmul.f32 %v3150_v32, %v3132_v7  ;;  %v3152_v36 = vmul.f32 %v3150_v32, %v3133_v8 }
 0xbae   : > { %v3158_v37 = vmul.f32 %v3156_v28, %v3151_v35  ;;  %v3159_v38 = vmul.f32 %v3156_v28, %v3152_v36 }
 0xbb0   : > { %v3165_v61 = vadd.f32 %v3163_v39, %v3158_v37  ;;  %v3166_v62 = vadd.f32 %v3163_v39, %v3159_v38 }
 0xbb2   : > { %v3167_v44 = vsub.f32 0.0, %v3165_v61  ;;  %v3168_v46 = vsub.f32 0.0, %v3166_v62 }
 0xbb4   : > { %v3169_v47 = vmul.f32 1.442695, %v3167_v44  ;;  %v3171_v48 = vmul.f32 1.442695, %v3168_v46 }
 0xbb6   : > { %5537 = vpow2.f32 %v3169_v47 }
 0xbb7   : > { %5539 = vpow2.f32 %v3171_v48 }
 0xbbc   : > { %v5538_v49 = vpop.eup %5537 }
 0xbbd   : > { %v5540_v51 = vpop.eup %5539  ;;  %v3173_v52 = vadd.f32 1.0, %v5538_v49 }
 0xbbe   : > { %v3174_v53 = vadd.f32 1.0, %v5540_v51 }
 0xbbf   : > { %5541 = vrcp.f32 %v3173_v52 }
 0xbc0   : > { %5543 = vrcp.f32 %v3174_v53 }
 0xbc5   : > { %v5542_v55 = vpop.eup %5541 }
 0xbc6   : > { %v5544_v59 = vpop.eup %5543  ;;  %v3177_v60 = vmul.f32 %v5542_v55, %v3165_v61  ;;  %v3186_v61 = vld [vmem:[#allocation2 + $0x168] sm:$0xff] }
 0xbc7   : > { %v3178_v0 = vmul.f32 %v5544_v59, %v3166_v62  ;;  %v3396_v62 = vld [vmem:[#allocation2 + $0x188] sm:$0xff]  ;;  %v3347_v59 = vld [vmem:[#allocation2 + $0x180] sm:$0xff] }
 0xbc8   : > { %3285 = vrot.lane.b32.xlu1 %v3177_v60, %s5646_s20  ;;  %3189 = vrot.lane.b32.xlu0 %v3177_v60, %s5644_s18  ;;  %v3397_v27 = vmul.f32 %v3177_v60, %v5791_v22 }
 0xbc9   : > { %3287 = vrot.lane.b32.xlu2 %v3178_v0, %s5646_s20  ;;  %v3398_v28 = vmul.f32 %v3178_v0, %v5793_v23 }
 0xbd0   : > { %3342 = vrot.lane.b32.xlu1 %v3178_v0, %s5647_s21  ;;  %3191 = vrot.lane.b32.xlu0 %v3178_v0, %s5644_s18 }
 0xbd1   : > { %3499 = vrot.lane.b32.xlu2 %v3177_v60, %s5649_s23 }
 0xbd8   : > { %3444 = vrot.lane.b32.xlu1 %v3177_v60, %s5648_s22  ;;  %3179 = vrot.lane.b32.xlu0 %v3177_v60, %s5645_s19 }
 0xbd9   : > { %3446 = vrot.lane.b32.xlu2 %v3178_v0, %s5648_s22 }
 0xbe0   : > { %3611 = vrot.lane.b32.xlu1 %v3178_v0, %s5651_s25  ;;  %3181 = vrot.lane.b32.xlu0 %v3178_v0, %s5645_s19 }
 0xbe1   : > { %3554 = vrot.lane.b32.xlu2 %v3177_v60, %s5650_s24 }
 0xbe8   : > { %3668 = vperm.xlu1 %5487, %v5402_v1   ;;  %3340 = vrot.lane.b32.xlu0 %v3177_v60, %s5647_s21 }
 0xbf0   : > { %3704 = vperm.xlu1 %5487, %v5403_v63   ;;  %3501 = vrot.lane.b32.xlu0 %v3178_v0, %s5649_s23 }
 0xbf8   : > { %3711 = vperm.xlu1 %5487, %v5404_v2   ;;  %3609 = vrot.lane.b32.xlu0 %v3177_v60, %s5651_s25 }
 0xc00   : > { %3556 = vrot.lane.b32.xlu0 %v3178_v0, %s5650_s24 }
 0xc23   : > { %v3288_v5 = vpop.permute.xlu2 %3287 }
 0xc2b   : > { %v3500_v32 = vpop.permute.xlu2 %3499 }
 0xc33   : > { %v3447_v46 = vpop.permute.xlu2 %3446 }
 0xc3a   : > { %v3190_v3 = vpop.permute.xlu0 %3189  ;;  %v3286_v4 = vpop.permute.xlu1 %3285 }
 0xc3b   : > { %v3289_v7 = vsel %vm485_vm0, %v3286_v4, %v3288_v5  ;;  %v3290_v8 = vsel %vm485_vm0, %v3288_v5, %v3286_v4  ;;  %v3451_v5 = vld [vmem:[#allocation2 + $0x190] sm:$0xff] }
 0xc3c   : > { %v3293_v24 = vmul.f32 %v3290_v8, %v5783_v16  ;;  %v3294_v25 = vmul.f32 %v3289_v7, %v5785_v17  ;;  %v3506_v7 = vld [vmem:[#allocation2 + $0x198] sm:$0xff] }
 0xc42   : > { %v3192_v9 = vpop.permute.xlu0 %3191  ;;  %v3343_v31 = vpop.permute.xlu1 %3342 }
 0xc43   : > { %v3193_v10 = vsel %vm382_vm1, %v3190_v3, %v3192_v9  ;;  %v3194_v12 = vsel %vm382_vm1, %v3192_v9, %v3190_v3 }
 0xc44   : > { %v3197_v20 = vmul.f32 %v3194_v12, %v5771_v11  ;;  %v3198_v21 = vmul.f32 %v3193_v10, %v5776_v13 }
 0xc46   : > { %3217 = vmatpush.msra.mxu2 %v3197_v20  ;;  %3237 = vmatpush.msra.mxu3 %v3198_v21 }
 0xc47   : > { %5384 = vmatmul.msk.f32.vlgmr.msra.gmra.mxu2 %vm394_vm3, %v3196_v26  ;;  %5385 = vmatmul.msk.f32.vlgmr.msra.gmra.mxu3 %vm394_vm3, %v3196_v26 }
 0xc48   : > { %3313 = vmatpush.msrb.mxu2 %v3293_v24  ;;  %3333 = vmatpush.msrb.mxu3 %v3294_v25  ;;  %v3616_v24 = vld [vmem:[#allocation2 + $0x1a8] sm:$0xff]  ;;  %v3555_v25 = vpop.permute.xlu2 %3554 }
 0xc4a   : > { %3417 = vmatpush.msra.mxu2 %v3397_v27  ;;  %3437 = vmatpush.msra.mxu3 %v3398_v28  ;;  %v3180_v29 = vpop.permute.xlu0 %3179  ;;  %v3445_v44 = vpop.permute.xlu1 %3444 }
 0xc4b   : > { %v3448_v48 = vsel %vm665_vm6, %v3445_v44, %v3447_v46  ;;  %v3449_v49 = vsel %vm665_vm6, %v3447_v46, %v3445_v44 }
 0xc4c   : > { %v3452_v60 = vmul.f32 %v3448_v48, %v5851_v57  ;;  %v3453_v0 = vmul.f32 %v3449_v49, %v5853_v58 }
 0xc4f   : > { %5388 = vmatmul.msk.f32.vlgmr.msrb.gmra.mxu2 %vm394_vm3, %v3292_v30  ;;  %5389 = vmatmul.msk.f32.vlgmr.msrb.gmra.mxu3 %vm394_vm3, %v3292_v30 }
 0xc52   : > { %v3182_v35 = vpop.permute.xlu0 %3181  ;;  %v3612_v8 = vpop.permute.xlu1 %3611 }
 0xc53   : > { %v3183_v36 = vsel %vm366_vm2, %v3180_v29, %v3182_v35  ;;  %v3184_v37 = vsel %vm366_vm2, %v3182_v35, %v3180_v29 }
 0xc54   : > { %v3187_v38 = vmul.f32 %v3184_v37, %v5779_v14  ;;  %v3188_v39 = vmul.f32 %v3183_v36, %v5781_v15 }
 0xc56   : > { %3260 = vmatpush.msrb.mxu0 %v3187_v38  ;;  %3280 = vmatpush.msrb.mxu1 %v3188_v39 }
 0xc57   : > { %5386 = vmatmul.msk.f32.vlgmr.msrb.gmra.mxu0 %vm394_vm3, %v3186_v61  ;;  %5387 = vmatmul.msk.f32.vlgmr.msrb.gmra.mxu1 %vm394_vm3, %v3186_v61 }
 0xc58   : > { %5392 = vmatmul.msk.f32.vlgmr.msra.gmra.mxu2 %vm394_vm3, %v3396_v62  ;;  %5393 = vmatmul.msk.f32.vlgmr.msra.gmra.mxu3 %vm394_vm3, %v3396_v62 }
 0xc5a   : > { %v3341_v47 = vpop.permute.xlu0 %3340 }
 0xc5b   : > { %v3344_v51 = vsel %vm548_vm4, %v3341_v47, %v3343_v31  ;;  %v3345_v52 = vsel %vm548_vm4, %v3343_v31, %v3341_v47  ;;  %v3561_v31 = vld [vmem:[#allocation2 + $0x1a0] sm:$0xff] }
 0xc5c   : > { %v3348_v53 = vmul.f32 %v3345_v52, %v5819_v40  ;;  %v3349_v55 = vmul.f32 %v3344_v51, %v5821_v41 }
 0xc5e   : > { %3368 = vmatpush.msra.mxu0 %v3348_v53  ;;  %3388 = vmatpush.msra.mxu1 %v3349_v55 }
 0xc5f   : > { %5390 = vmatmul.msk.f32.vlgmr.msra.gmra.mxu0 %vm394_vm3, %v3347_v59  ;;  %5391 = vmatmul.msk.f32.vlgmr.msra.gmra.mxu1 %vm394_vm3, %v3347_v59 }
 0xc60   : > { %3472 = vmatpush.msrb.mxu0 %v3452_v60  ;;  %3492 = vmatpush.msrb.mxu1 %v3453_v0 }
 0xc62   : > { %v3502_v1 = vpop.permute.xlu0 %3501 }
 0xc63   : > { %v3503_v63 = vsel %vm726_vm5, %v3500_v32, %v3502_v1  ;;  %v3504_v2 = vsel %vm726_vm5, %v3502_v1, %v3500_v32 }
 0xc64   : > { %v3507_v3 = vmul.f32 %v3503_v63, %v5844_v54  ;;  %v3508_v4 = vmul.f32 %v3504_v2, %v5848_v56 }
 0xc66   : > { %3527 = vmatpush.msrb.mxu2 %v3507_v3  ;;  %3547 = vmatpush.msrb.mxu3 %v3508_v4 }
 0xc67   : > { %5394 = vmatmul.msk.f32.vlgmr.msrb.gmra.mxu0 %vm394_vm3, %v3451_v5  ;;  %5395 = vmatmul.msk.f32.vlgmr.msrb.gmra.mxu1 %vm394_vm3, %v3451_v5 }
 0xc68   : > { %5396 = vmatmul.msk.f32.vlgmr.msrb.gmra.mxu2 %vm394_vm3, %v3506_v7  ;;  %5397 = vmatmul.msk.f32.vlgmr.msrb.gmra.mxu3 %vm394_vm3, %v3506_v7 }
 0xc6a   : > { %v3610_v9 = vpop.permute.xlu0 %3609 }
 0xc6b   : > { %v3613_v10 = vsel %vm850_vm8, %v3610_v9, %v3612_v8  ;;  %v3614_v12 = vsel %vm850_vm8, %v3612_v8, %v3610_v9 }
 0xc6c   : > { %v3617_v20 = vmul.f32 %v3613_v10, %v5899_v33  ;;  %v3618_v21 = vmul.f32 %v3614_v12, %v5901_v34 }
 0xc6e   : > { %3637 = vmatpush.msra.mxu2 %v3617_v20  ;;  %3657 = vmatpush.msra.mxu3 %v3618_v21 }
 0xc70   : > { %5400 = vmatmul.msk.f32.vlgmr.msra.gmra.mxu2 %vm394_vm3, %v3616_v24  ;;  %5401 = vmatmul.msk.f32.vlgmr.msra.gmra.mxu3 %vm394_vm3, %v3616_v24 }
 0xc72   : > { %v3557_v26 = vpop.permute.xlu0 %3556 }
 0xc73   : > { %v3558_v27 = vsel %vm789_vm7, %v3555_v25, %v3557_v26  ;;  %v3559_v28 = vsel %vm789_vm7, %v3557_v26, %v3555_v25  ;;  %v3669_v25 = vpop.permute.xlu1 %3668 }
 0xc74   : > { %v3562_v29 = vmul.f32 %v3558_v27, %v5878_v18  ;;  %v3563_v30 = vmul.f32 %v3559_v28, %v5880_v19 }
 0xc76   : > { %3582 = vmatpush.msra.mxu0 %v3562_v29  ;;  %3602 = vmatpush.msra.mxu1 %v3563_v30 }
 0xc77   : > { %5398 = vmatmul.msk.f32.vlgmr.msra.gmra.mxu0 %vm394_vm3, %v3561_v31  ;;  %5399 = vmatmul.msk.f32.vlgmr.msra.gmra.mxu1 %vm394_vm3, %v3561_v31 }
 0xcca   : > { %v3219_v32 = vpop.f32.mrf.mxu2  ;;  %v3239_v35 = vpop.f32.mrf.mxu3 }
 0xcd2   : > { %v3315_v38 = vpop.f32.mrf.mxu2  ;;  %v3335_v39 = vpop.f32.mrf.mxu3 }
 0xcd4   : > { %v3262_v36 = vpop.f32.mrf.mxu0  ;;  %v3282_v37 = vpop.f32.mrf.mxu1 }
 0xcd5   : > { %v3263_v47 = vadd.f32 %v3262_v36, %v3219_v32  ;;  %v3283_v48 = vadd.f32 %v3282_v37, %v3239_v35 }
 0xcd7   : > { %v3338_v49 = vadd.f32 %v3315_v38, %v3263_v47  ;;  %v3339_v51 = vadd.f32 %v3335_v39, %v3283_v48  ;;  %v3705_v47 = vpop.permute.xlu1 %3704 }
 0xcdb   : > { %v3419_v44 = vpop.f32.mrf.mxu2  ;;  %v3439_v46 = vpop.f32.mrf.mxu3 }
 0xcdc   : > { %v3370_v61 = vpop.f32.mrf.mxu0  ;;  %v3390_v62 = vpop.f32.mrf.mxu1 }
 0xcdd   : > { %v3393_v52 = vadd.f32 %v3370_v61, %v3338_v49  ;;  %v3394_v53 = vadd.f32 %v3390_v62, %v3339_v51 }
 0xcdf   : > { %v3442_v1 = vadd.f32 %v3419_v44, %v3393_v52  ;;  %v3443_v63 = vadd.f32 %v3439_v46, %v3394_v53 }
 0xce4   : > { %v3474_v60 = vpop.f32.mrf.mxu0  ;;  %v3494_v0 = vpop.f32.mrf.mxu1 }
 0xce5   : > { %v3497_v2 = vadd.f32 %v3474_v60, %v3442_v1  ;;  %v3498_v3 = vadd.f32 %v3494_v0, %v3443_v63  ;;  %v3712_v0 = vpop.permute.xlu1 %3711 }
 0xceb   : > { %v3529_v55 = vpop.f32.mrf.mxu2  ;;  %v3549_v59 = vpop.f32.mrf.mxu3 }
 0xcec   : > { %v3552_v4 = vadd.f32 %v3529_v55, %v3497_v2  ;;  %v3553_v5 = vadd.f32 %v3549_v59, %v3498_v3 }
 0xcf3   : > { %v3639_v7 = vpop.f32.mrf.mxu2  ;;  %v3659_v8 = vpop.f32.mrf.mxu3 }
 0xcf4   : > { %v3584_v9 = vpop.f32.mrf.mxu0  ;;  %v3604_v10 = vpop.f32.mrf.mxu1 }
 0xcf5   : > { %v3607_v12 = vadd.f32 %v3584_v9, %v3552_v4  ;;  %v3608_v20 = vadd.f32 %v3604_v10, %v3553_v5 }
 0xcf7   : > { %v3662_v21 = vadd.f32 %v3639_v7, %v3607_v12  ;;  %v3663_v24 = vadd.f32 %v3659_v8, %v3608_v20 }
 0xcf9   : > { %v3671_v26 = vadd.f32 %v3669_v25, %v3662_v21  ;;  %v3672_v27 = vadd.f32 %v3669_v25, %v3663_v24 }
 0xcfb   : > { %v3677_v28 = vadd.f32 %v3672_v27, %v3671_v26 }
 0xcfd   : > { %3678 = vadd.xlane.f32.xlu2 %v3677_v28  ;;  %v3967_v28 = vld [vmem:[%s6867_s4] sm:$0xf] }
 0xd70   : > { %v3679_v29 = vpop.xlane.xlu2 %3678 }
 0xd71   : > { %v3680_v30 = vmul.f32 %v3679_v29, %v5913_v45 }
 0xd73   : > { %v3681_v31 = vsub.f32 %v3671_v26, %v3680_v30  ;;  %v3682_v32 = vsub.f32 %v3672_v27, %v3680_v30  ;;  %v5427_v27 = vld [vmem:[%s6866_s3 + $0xa0] sm:$0xff] }
 0xd75   : > { %v3683_v35 = vmul.f32 %v3681_v31, %v3681_v31  ;;  %v3684_v36 = vmul.f32 %v3682_v32, %v3682_v32 }
 0xd77   : > { %v3685_v37 = vadd.f32 %v3684_v36, %v3683_v35 }
 0xd79   : > { %3686 = vadd.xlane.f32.xlu0 %v3685_v37 }
 0xdec   : > { %v3687_v38 = vpop.xlane.xlu0 %3686 }
 0xded   : > { %v3688_v39 = vmul.f32 %v3687_v38, %v5913_v45 }
 0xdef   : > { %v3689_v61 = vadd.f32 1e-05, %v3688_v39  ;;  %v4082_v39 = vld [vmem:[#allocation2 + $0x1b8] sm:$0xff] }
 0xdf1   : > { %5545 = vrsqrt.f32 %v3689_v61  ;;  %vm3696_vm12 = vweird.f32 %v3689_v61 }
 0xdf7   : > { %v5546_v62 = vpop.eup %5545 }
 0xdf8   : > { %v3691_v44 = vmul.f32 %v5546_v62, %v3689_v61  ;;  %vm3697_vm11 = vweird.f32 %v5546_v62 }
 0xdf9   : > { %vm3698_vm13 = vmor %vm3696_vm12, %vm3697_vm11  ;;  %vm5108_vm11 = vcmask 1040384   ;;  %vm5111_vm12 = vcmask 1041408  }
 0xdfa   : > { %v3692_v46 = vmul.f32 %v5546_v62, %v3691_v44 }
 0xdfc   : > { %v3693_v48 = vmul.f32 0.5, %v3692_v46 }
 0xdfe   : > { %v3694_v49 = vsub.f32 1.5, %v3693_v48 }
 0xe00   : > { %v3695_v51 = vmul.f32 %v5546_v62, %v3694_v49 }
 0xe02   : > { %v3699_v52 = vsel %vm3698_vm13, %v5546_v62, %v3695_v51  ;;  %vm5114_vm13 = vcmask 1042432  }
 0xe03   : > { %v3700_v53 = vmul.f32 %v3699_v52, %v3681_v31  ;;  %v3701_v55 = vmul.f32 %v3699_v52, %v3682_v32 }
 0xe05   : > { %v3707_v59 = vmul.f32 %v3705_v47, %v3700_v53  ;;  %v3708_v60 = vmul.f32 %v3705_v47, %v3701_v55 }
 0xe07   : > { %v3714_v1 = vadd.f32 %v3712_v0, %v3707_v59  ;;  %v3715_v63 = vadd.f32 %v3712_v0, %v3708_v60  ;;  %v4178_v59 = vld [vmem:[#allocation2 + $0x1c0] sm:$0xff] }
 0xe09   : > { %v3716_v2 = vsub.f32 0.0, %v3714_v1  ;;  %v3717_v3 = vsub.f32 0.0, %v3715_v63 }
 0xe0b   : > { %v3718_v4 = vmul.f32 1.442695, %v3716_v2  ;;  %v3720_v5 = vmul.f32 1.442695, %v3717_v3 }
 0xe0d   : > { %5547 = vpow2.f32 %v3718_v4 }
 0xe0e   : > { %5549 = vpow2.f32 %v3720_v5  ;;  %v4078_v5 = vld [vmem:[#allocation2 + $0x1b0] sm:$0xff] }
 0xe13   : > { %v5548_v7 = vpop.eup %5547 }
 0xe14   : > { %v5550_v8 = vpop.eup %5549  ;;  %v3722_v9 = vadd.f32 1.0, %v5548_v7  ;;  %v4274_v7 = vld [vmem:[#allocation2 + $0x1d0] sm:$0xff] }
 0xe15   : > { %v3723_v10 = vadd.f32 1.0, %v5550_v8 }
 0xe16   : > { %5551 = vrcp.f32 %v3722_v9  ;;  %v5275_v9 = vld [vmem:[%s6864_s1 + $0x12] sm:$0x3] }
 0xe17   : > { %5553 = vrcp.f32 %v3723_v10  ;;  %v3856_v10 = vsub.f32 1.0, %v5275_v9 }
 0xe1c   : > { %v5552_v12 = vpop.eup %5551 }
 0xe1d   : > { %v5554_v20 = vpop.eup %5553  ;;  %v3726_v21 = vmul.f32 %v5552_v12, %v3714_v1 }
 0xe1e   : > { %v3727_v24 = vmul.f32 %v5554_v20, %v3715_v63  ;;  %v4370_v20 = vld [vmem:[#allocation2 + $0x1e0] sm:$0xff] }
 0xe1f   : > { %v6445_v25 = vadd.f32 %v3726_v21, %v6227_v42  ;;  %v5425_v42 = vld [vmem:[%s6866_s3 + $0x90] sm:$0xff] }
 0xe20   : > { %v6448_v26 = vadd.f32 %v3727_v24, %v6230_v43  ;;  %v5426_v43 = vld [vmem:[%s6866_s3 + $0x98] sm:$0xff]  ;;  %v3850_v24 = vperm.slane %v5275_v9, 0 }
 0xe21   : > { %5092 = vst [vmem:[%s337_s28] sm:$0xff] %v6445_v25  ;;  %4071 = vrot.lane.b32.xlu0 %v6445_v25, %s5645_s19  ;;  %3868 = vrot.lane.b32.xlu1 %v6445_v25, %s5644_s18  ;;  %v4275_v53 = vmul.f32 %v6445_v25, %v5791_v22 }
 0xe22   : > { %5093 = vst [vmem:[%s337_s28 + $0x8] sm:$0xff] %v6448_v26  ;;  %4173 = vrot.lane.b32.xlu2 %v6448_v26, %s5646_s20  ;;  %4011 = vmatpush.msrb.mxu1 %v6448_v26  ;;  %v4276_v55 = vmul.f32 %v6448_v26, %v5793_v23 }
 0xe23   : > { %3991 = vmatpush.msrb.mxu0 %v6445_v25  ;;  %5406 = vmatmul.msk.f32.vlgmr.msrb.gmra.mxu1 %vm394_vm3, %v3967_v28 }
 0xe24   : > { %5405 = vmatmul.msk.f32.vlgmr.msrb.gmra.mxu0 %vm394_vm3, %v3967_v28 }
 0xe29   : > { %3843 = vrot.lane.b32.xlu0 %v6445_v25, %s5649_s23  ;;  %3870 = vrot.lane.b32.xlu1 %v6448_v26, %s5644_s18 }
 0xe2a   : > { %3845 = vrot.lane.b32.xlu2 %v6448_v26, %s5649_s23 }
 0xe31   : > { %3742 = vrot.lane.b32.xlu0 %v6448_v26, %s5648_s22  ;;  %4171 = vrot.lane.b32.xlu1 %v6445_v25, %s5646_s20 }
 0xe32   : > { %4473 = vrot.lane.b32.xlu2 %v6445_v25, %s5651_s25 }
 0xe39   : > { %4418 = vrot.lane.b32.xlu0 %v6445_v25, %s5650_s24  ;;  %4073 = vrot.lane.b32.xlu1 %v6448_v26, %s5645_s19 }
 0xe3a   : > { %4420 = vrot.lane.b32.xlu2 %v6448_v26, %s5650_s24 }
 0xe41   : > { %3730 = vrot.lane.b32.xlu1 %v6445_v25, %s5647_s21 }
 0xe49   : > { %3732 = vrot.lane.b32.xlu1 %v6448_v26, %s5647_s21 }
 0xe51   : > { %3740 = vrot.lane.b32.xlu1 %v6445_v25, %s5648_s22 }
 0xe59   : > { %4475 = vrot.lane.b32.xlu1 %v6448_v26, %s5651_s25 }
 0xe61   : > { %4532 = vperm.xlu1 %5487, %v5425_v42   ;;  %v3851_v42 = vperm.slane %v5275_v9, 1 }
 0xe69   : > { %4568 = vperm.xlu1 %5487, %v5426_v43   ;;  %v3858_v43 = vperm.slane %v3856_v10, 0 }
 0xe71   : > { %4575 = vperm.xlu1 %5487, %v5427_v27   ;;  %v3859_v27 = vperm.slane %v3856_v10, 1  ;;  %v4323_v10 = vld [vmem:[#allocation2 + $0x1d8] sm:$0xff] }
 0xe7c   : > { %v4174_v31 = vpop.permute.xlu2 %4173 }
 0xe84   : > { %v3846_v44 = vpop.permute.xlu2 %3845 }
 0xe8c   : > { %v4474_v21 = vpop.permute.xlu2 %4473 }
 0xe93   : > { %v3869_v29 = vpop.permute.xlu1 %3868  ;;  %v4072_v30 = vpop.permute.xlu0 %4071 }
 0xe9b   : > { %v3871_v32 = vpop.permute.xlu1 %3870  ;;  %v3844_v61 = vpop.permute.xlu0 %3843 }
 0xe9c   : > { %v6502_v35 = vsel %vm382_vm1, %v3869_v29, %v3871_v32  ;;  %v6506_v36 = vsel %vm382_vm1, %v3871_v32, %v3869_v29  ;;  %v3847_v48 = vsel %vm726_vm5, %v3844_v61, %v3846_v44  ;;  %v3848_v49 = vsel %vm726_vm5, %v3846_v44, %v3844_v61 }
 0xe9d   : > { %v4083_v37 = vmul.f32 %v6506_v36, %v5771_v11  ;;  %v4084_v38 = vmul.f32 %v6502_v35, %v5776_v13  ;;  %v4371_v60 = vmul.f32 %v3847_v48, %v5844_v54  ;;  %v4372_v0 = vmul.f32 %v3848_v49, %v5848_v56 }
 0xe9e   : > { %v3854_v29 = vmul.f32 %v3850_v24, %v3847_v48  ;;  %v3874_v44 = vsub.f32 %v6445_v25, %v6506_v36 }
 0xe9f   : > { %4103 = vmatpush.msrb.mxu2 %v4083_v37  ;;  %4123 = vmatpush.msrb.mxu3 %v4084_v38 }
 0xea0   : > { %5407 = vmatmul.msk.f32.vlgmr.msrb.gmra.mxu2 %vm394_vm3, %v4082_v39  ;;  %5408 = vmatmul.msk.f32.vlgmr.msrb.gmra.mxu3 %vm394_vm3, %v4082_v39 }
 0xea3   : > { %v4172_v62 = vpop.permute.xlu1 %4171  ;;  %v3743_v12 = vpop.permute.xlu0 %3742 }
 0xea4   : > { %v4175_v46 = vsel %vm485_vm0, %v4172_v62, %v4174_v31  ;;  %v4176_v47 = vsel %vm485_vm0, %v4174_v31, %v4172_v62  ;;  %v4227_v62 = vld [vmem:[#allocation2 + $0x1c8] sm:$0xff] }
 0xea5   : > { %v4179_v51 = vmul.f32 %v4176_v47, %v5783_v16  ;;  %v4180_v52 = vmul.f32 %v4175_v46, %v5785_v17  ;;  %v3875_v46 = vsub.f32 %v6448_v26, %v6502_v35 }
 0xea7   : > { %4199 = vmatpush.msra.mxu2 %v4179_v51  ;;  %4219 = vmatpush.msra.mxu3 %v4180_v52 }
 0xea8   : > { %5411 = vmatmul.msk.f32.vlgmr.msra.gmra.mxu2 %vm394_vm3, %v4178_v59  ;;  %5412 = vmatmul.msk.f32.vlgmr.msra.gmra.mxu3 %vm394_vm3, %v4178_v59  ;;  %v3879_v59 = vmul.f32 %v3875_v46, %v3875_v46 }
 0xea9   : > { %4295 = vmatpush.msrb.mxu2 %v4275_v53  ;;  %4315 = vmatpush.msrb.mxu3 %v4276_v55  ;;  %v4421_v53 = vpop.permute.xlu2 %4420  ;;  %v3878_v55 = vmul.f32 %v3874_v44, %v3874_v44 }
 0xeab   : > { %4391 = vmatpush.msra.mxu2 %v4371_v60  ;;  %4411 = vmatpush.msra.mxu3 %v4372_v0  ;;  %v4074_v1 = vpop.permute.xlu1 %4073 }
 0xeac   : > { %v4075_v63 = vsel %vm366_vm2, %v4072_v30, %v4074_v1  ;;  %v4076_v2 = vsel %vm366_vm2, %v4074_v1, %v4072_v30  ;;  %v3855_v30 = vmul.f32 %v3851_v42, %v3848_v49  ;;  %v4419_v49 = vpop.permute.xlu0 %4418 }
 0xead   : > { %v4079_v3 = vmul.f32 %v4076_v2, %v5779_v14  ;;  %v4080_v4 = vmul.f32 %v4075_v63, %v5781_v15  ;;  %v4422_v36 = vsel %vm789_vm7, %v4419_v49, %v4421_v53  ;;  %v4423_v35 = vsel %vm789_vm7, %v4421_v53, %v4419_v49 }
 0xeae   : > { %v4426_v24 = vmul.f32 %v4422_v36, %v5878_v18 }
 0xeaf   : > { %4146 = vmatpush.msra.mxu0 %v4079_v3  ;;  %4166 = vmatpush.msra.mxu1 %v4080_v4 }
 0xeb0   : > { %5409 = vmatmul.msk.f32.vlgmr.msra.gmra.mxu0 %vm394_vm3, %v4078_v5  ;;  %5410 = vmatmul.msk.f32.vlgmr.msra.gmra.mxu1 %vm394_vm3, %v4078_v5 }
 0xeb1   : > { %5415 = vmatmul.msk.f32.vlgmr.msrb.gmra.mxu2 %vm394_vm3, %v4274_v7  ;;  %5416 = vmatmul.msk.f32.vlgmr.msrb.gmra.mxu3 %vm394_vm3, %v4274_v7 }
 0xeb3   : > { %v3731_v8 = vpop.permute.xlu1 %3730 }
 0xeb9   : > { %5419 = vmatmul.msk.f32.vlgmr.msra.gmra.mxu2 %vm394_vm3, %v4370_v20  ;;  %5420 = vmatmul.msk.f32.vlgmr.msra.gmra.mxu3 %vm394_vm3, %v4370_v20  ;;  %v4427_v20 = vmul.f32 %v4423_v35, %v5880_v19 }
 0xebb   : > { %v3733_v28 = vpop.permute.xlu1 %3732 }
 0xebc   : > { %v3734_v31 = vsel %vm548_vm4, %v3731_v8, %v3733_v28  ;;  %v3735_v32 = vsel %vm548_vm4, %v3733_v28, %v3731_v8 }
 0xebd   : > { %v3736_v37 = vmul.f32 %v3735_v32, %v5819_v40  ;;  %v3737_v38 = vmul.f32 %v3734_v31, %v5821_v41  ;;  %v3862_v39 = vmul.f32 %v3858_v43, %v3735_v32  ;;  %v3863_v61 = vmul.f32 %v3859_v27, %v3734_v31  ;;  %v4425_v31 = vld [vmem:[#allocation2 + $0x1e8] sm:$0xff]  ;;  %v4480_v32 = vld [vmem:[#allocation2 + $0x1f0] sm:$0xff] }
 0xebf   : > { %v3864_v47 = vadd.f32 %v3862_v39, %v3854_v29  ;;  %v3865_v48 = vadd.f32 %v3863_v61, %v3855_v30  ;;  %4246 = vmatpush.msrb.mxu0 %v3736_v37  ;;  %4266 = vmatpush.msrb.mxu1 %v3737_v38  ;;  %v3738_v63 = vadd.f32 %v3736_v37, %v6445_v25  ;;  %v6595_v37 = vpop.f32.mrf.mxu0 }
 0xec0   : > { %5413 = vmatmul.msk.f32.vlgmr.msrb.gmra.mxu0 %vm394_vm3, %v4227_v62  ;;  %5414 = vmatmul.msk.f32.vlgmr.msrb.gmra.mxu1 %vm394_vm3, %v4227_v62  ;;  %v3739_v2 = vadd.f32 %v3737_v38, %v6448_v26  ;;  %v6597_v38 = vpop.f32.mrf.mxu1 }
 0xec1   : > { %v3866_v51 = vsub.f32 %v6445_v25, %v3864_v47  ;;  %v3867_v52 = vsub.f32 %v6448_v26, %v3865_v48 }
 0xec3   : > { %v3876_v60 = vmul.f32 %v3866_v51, %v3866_v51  ;;  %v3877_v0 = vmul.f32 %v3867_v52, %v3867_v52  ;;  %v3741_v1 = vpop.permute.xlu1 %3740 }
 0xec4   : > { %v3744_v3 = vsel %vm665_vm6, %v3741_v1, %v3743_v12  ;;  %v3745_v4 = vsel %vm665_vm6, %v3743_v12, %v3741_v1 }
 0xec5   : > { %v6571_v5 = vadd.f32 %v3878_v55, %v3876_v60  ;;  %v6573_v7 = vadd.f32 %v3879_v59, %v3877_v0  ;;  %v3746_v8 = vmul.f32 %v3744_v3, %v5851_v57  ;;  %v3747_v9 = vmul.f32 %v3745_v4, %v5853_v58 }
 0xec7   : > { %4342 = vmatpush.msra.mxu0 %v3746_v8  ;;  %4362 = vmatpush.msra.mxu1 %v3747_v9  ;;  %v6579_v42 = vadd.f32 %v3746_v8, %v3738_v63  ;;  %v6581_v43 = vadd.f32 %v3747_v9, %v3739_v2 }
 0xec8   : > { %5417 = vmatmul.msk.f32.vlgmr.msra.gmra.mxu0 %vm394_vm3, %v4323_v10  ;;  %5418 = vmatmul.msk.f32.vlgmr.msra.gmra.mxu1 %vm394_vm3, %v4323_v10 }
 0xec9   : > { %4466 = vmatpush.msrb.mxu1 %v4427_v20  ;;  %4446 = vmatpush.msrb.mxu0 %v4426_v24 }
 0xecb   : > { %v4476_v12 = vpop.permute.xlu1 %4475 }
 0xecc   : > { %v4477_v27 = vsel %vm850_vm8, %v4474_v21, %v4476_v12  ;;  %v4478_v28 = vsel %vm850_vm8, %v4476_v12, %v4474_v21 }
 0xecd   : > { %v4481_v29 = vmul.f32 %v4477_v27, %v5899_v33  ;;  %v4482_v30 = vmul.f32 %v4478_v28, %v5901_v34 }
 0xecf   : > { %4501 = vmatpush.msrb.mxu2 %v4481_v29  ;;  %4521 = vmatpush.msrb.mxu3 %v4482_v30 }
 0xed0   : > { %5421 = vmatmul.msk.f32.vlgmr.msrb.gmra.mxu0 %vm394_vm3, %v4425_v31  ;;  %5423 = vmatmul.msk.f32.vlgmr.msrb.gmra.mxu2 %vm394_vm3, %v4480_v32 }
 0xed1   : > { %5422 = vmatmul.msk.f32.vlgmr.msrb.gmra.mxu1 %vm394_vm3, %v4425_v31  ;;  %5424 = vmatmul.msk.f32.vlgmr.msrb.gmra.mxu3 %vm394_vm3, %v4480_v32 }
 0xed3   : > { %v4533_v31 = vpop.permute.xlu1 %4532 }
 0xf23   : > { %v4105_v21 = vpop.f32.mrf.mxu2  ;;  %v4125_v39 = vpop.f32.mrf.mxu3 }
 0xf2b   : > { %v4201_v44 = vpop.f32.mrf.mxu2  ;;  %v4221_v46 = vpop.f32.mrf.mxu3 }
 0xf2d   : > { %v4148_v61 = vpop.f32.mrf.mxu0  ;;  %v4168_v62 = vpop.f32.mrf.mxu1 }
 0xf2e   : > { %v4149_v49 = vadd.f32 %v4148_v61, %v4105_v21  ;;  %v4169_v51 = vadd.f32 %v4168_v62, %v4125_v39 }
 0xf30   : > { %v4224_v55 = vadd.f32 %v4201_v44, %v4149_v49  ;;  %v4225_v59 = vadd.f32 %v4221_v46, %v4169_v51 }
 0xf34   : > { %v4297_v52 = vpop.f32.mrf.mxu2  ;;  %v4317_v53 = vpop.f32.mrf.mxu3 }
 0xf3c   : > { %v4393_v2 = vpop.f32.mrf.mxu2  ;;  %v4413_v4 = vpop.f32.mrf.mxu3 }
 0xf3d   : > { %v4248_v47 = vpop.f32.mrf.mxu0  ;;  %v4268_v48 = vpop.f32.mrf.mxu1 }
 0xf3e   : > { %v4271_v35 = vadd.f32 %v4248_v47, %v4224_v55  ;;  %v4272_v0 = vadd.f32 %v4268_v48, %v4225_v59 }
 0xf40   : > { %v4320_v1 = vadd.f32 %v4297_v52, %v4271_v35  ;;  %v4321_v63 = vadd.f32 %v4317_v53, %v4272_v0 }
 0xf45   : > { %v4344_v36 = vpop.f32.mrf.mxu0  ;;  %v4364_v60 = vpop.f32.mrf.mxu1 }
 0xf46   : > { %v4367_v3 = vadd.f32 %v4344_v36, %v4320_v1  ;;  %v4368_v8 = vadd.f32 %v4364_v60, %v4321_v63  ;;  %v4569_v60 = vpop.permute.xlu1 %4568 }
 0xf48   : > { %v4416_v10 = vadd.f32 %v4393_v2, %v4367_v3  ;;  %v4417_v24 = vadd.f32 %v4413_v4, %v4368_v8 }
 0xf4d   : > { %v4448_v9 = vpop.f32.mrf.mxu0 }
 0xf4e   : > { %v4468_v20 = vpop.f32.mrf.mxu1  ;;  %v4471_v12 = vadd.f32 %v4448_v9, %v4416_v10  ;;  %v4576_v10 = vpop.permute.xlu1 %4575 }
 0xf4f   : > { %v4472_v27 = vadd.f32 %v4468_v20, %v4417_v24 }
 0xf53   : > { %v4503_v28 = vpop.f32.mrf.mxu2 }
 0xf54   : > { %v4526_v29 = vadd.f32 %v4503_v28, %v4471_v12  ;;  %v4523_v30 = vpop.f32.mrf.mxu3 }
 0xf55   : > { %v4527_v32 = vadd.f32 %v4523_v30, %v4472_v27 }
 0xf56   : > { %v4535_v21 = vadd.f32 %v4533_v31, %v4526_v29 }
 0xf57   : > { %v4536_v39 = vadd.f32 %v4533_v31, %v4527_v32 }
 0xf59   : > { %v4541_v61 = vadd.f32 %v4536_v39, %v4535_v21 }
 0xf5b   : > { %4542 = vadd.xlane.f32.xlu0 %v4541_v61 }
 0xf6f   : > { %3750 = vrot.lane.b32.xlu0 %v6579_v42, %s5644_s18 }
 0xfce   : > { %v4543_v62 = vpop.xlane.xlu0 %4542 }
 0xfcf   : > { %v4544_v44 = vmul.f32 %v4543_v62, %v5913_v45 }
 0xfd1   : > { %v4545_v46 = vsub.f32 %v4535_v21, %v4544_v44  ;;  %v4546_v47 = vsub.f32 %v4536_v39, %v4544_v44 }
 0xfd3   : > { %v4547_v48 = vmul.f32 %v4545_v46, %v4545_v46  ;;  %v4548_v49 = vmul.f32 %v4546_v47, %v4546_v47 }
 0xfd5   : > { %v4549_v51 = vadd.f32 %v4548_v49, %v4547_v48 }
 0xfd7   : > { %4550 = vadd.xlane.f32.xlu2 %v4549_v51 }
 0xfe1   : > { %v3751_v44 = vpop.permute.xlu0 %3750 }
0x104a   : > { %v4551_v52 = vpop.xlane.xlu2 %4550 }
0x104b   : > { %v4552_v53 = vmul.f32 %v4551_v52, %v5913_v45 }
0x104d   : > { %v4553_v55 = vadd.f32 1e-05, %v4552_v53 }
0x104f   : > { %5555 = vrsqrt.f32 %v4553_v55  ;;  %vm4560_vm15 = vweird.f32 %v4553_v55 }
0x1055   : > { %v5556_v59 = vpop.eup %5555 }
0x1056   : > { %v4555_v36 = vmul.f32 %v5556_v59, %v4553_v55  ;;  %vm4561_vm14 = vweird.f32 %v5556_v59  ;;  %v5654_v55 = vmov 1  }
0x1057   : > { %vm4562_vm9 = vmor %vm4560_vm15, %vm4561_vm14  ;;  %5490 = vset.pattern.permute.xlu1 %v5654_v55 }
0x1058   : > { %v4556_v35 = vmul.f32 %v5556_v59, %v4555_v36 }
0x105a   : > { %v4557_v0 = vmul.f32 0.5, %v4556_v35 }
0x105c   : > { %v4558_v1 = vsub.f32 1.5, %v4557_v0 }
0x105e   : > { %v4559_v63 = vmul.f32 %v5556_v59, %v4558_v1 }
0x1060   : > { %v4563_v2 = vsel %vm4562_vm9, %v5556_v59, %v4559_v63 }
0x1061   : > { %v4564_v3 = vmul.f32 %v4563_v2, %v4545_v46  ;;  %v4565_v4 = vmul.f32 %v4563_v2, %v4546_v47 }
0x1063   : > { %v4571_v8 = vmul.f32 %v4569_v60, %v4564_v3  ;;  %v4572_v9 = vmul.f32 %v4569_v60, %v4565_v4  ;;  %v4609_v4 = vld [vmem:[#allocation2 + $0x200] sm:$0xff] }
0x1065   : > { %v4578_v20 = vadd.f32 %v4576_v10, %v4571_v8  ;;  %v4579_v45 = vadd.f32 %v4576_v10, %v4572_v9  ;;  %v4599_v8 = vld [vmem:[#allocation2 + $0x1f8] sm:$0xff] }
0x1067   : > { %v4580_v24 = vsub.f32 0.0, %v4578_v20  ;;  %v4581_v12 = vsub.f32 0.0, %v4579_v45 }
0x1069   : > { %v4582_v27 = vmul.f32 1.442695, %v4580_v24  ;;  %v4584_v28 = vmul.f32 1.442695, %v4581_v12 }
0x106b   : > { %5557 = vpow2.f32 %v4582_v27 }
0x106c   : > { %5559 = vpow2.f32 %v4584_v28 }
0x1071   : > { %v5558_v29 = vpop.eup %5557 }
0x1072   : > { %v5560_v30 = vpop.eup %5559  ;;  %v4586_v31 = vadd.f32 1.0, %v5558_v29 }
0x1073   : > { %v4587_v32 = vadd.f32 1.0, %v5560_v30 }
0x1074   : > { %5561 = vrcp.f32 %v4586_v31 }
0x1075   : > { %5563 = vrcp.f32 %v4587_v32 }
0x1076   : > { %5565 = vrsqrt.f32 %v6571_v5 }
0x1077   : > { %5567 = vrsqrt.f32 %v6573_v7 }
0x107a   : > { %v5562_v21 = vpop.eup %5561 }
0x107b   : > { %v5564_v39 = vpop.eup %5563  ;;  %v6603_v61 = vmul.f32 %v5562_v21, %v4578_v20 }
0x107c   : > { %v6605_v62 = vmul.f32 %v5564_v39, %v4579_v45 }
0x107d   : > { %4698 = vrot.lane.b32.xlu0 %v6603_v61, %s5646_s20  ;;  %4592 = vrot.lane.b32.xlu1 %v6603_v61, %s5645_s19 }
0x107e   : > { %4604 = vrot.lane.b32.xlu2 %v6605_v62, %s5644_s18 }
0x1085   : > { %4857 = vrot.lane.b32.xlu0 %v6603_v61, %s5648_s22  ;;  %4594 = vrot.lane.b32.xlu1 %v6605_v62, %s5645_s19 }
0x1086   : > { %3752 = vrot.lane.b32.xlu2 %v6581_v43, %s5644_s18 }
0x108d   : > { %4914 = vrot.lane.b32.xlu0 %v6605_v62, %s5649_s23  ;;  %4602 = vrot.lane.b32.xlu1 %v6603_v61, %s5644_s18 }
0x108e   : > { %4859 = vrot.lane.b32.xlu2 %v6605_v62, %s5648_s22 }
0x1095   : > { %3762 = vrot.lane.b32.xlu0 %v6581_v43, %s5650_s24  ;;  %3760 = vrot.lane.b32.xlu1 %v6579_v42, %s5650_s24 }
0x1096   : > { %4967 = vrot.lane.b32.xlu2 %v6603_v61, %s5650_s24 }
0x109d   : > { %4700 = vrot.lane.b32.xlu1 %v6605_v62, %s5646_s20 }
0x109e   : > { %5022 = vrot.lane.b32.xlu2 %v6603_v61, %s5651_s25 }
0x10a5   : > { %4753 = vrot.lane.b32.xlu1 %v6603_v61, %s5647_s21 }
0x10ad   : > { %4755 = vrot.lane.b32.xlu1 %v6605_v62, %s5647_s21 }
0x10b5   : > { %4912 = vrot.lane.b32.xlu1 %v6603_v61, %s5649_s23 }
0x10bd   : > { %4969 = vrot.lane.b32.xlu1 %v6605_v62, %s5650_s24 }
0x10c5   : > { %5024 = vrot.lane.b32.xlu1 %v6605_v62, %s5651_s25  ;;  %s342_s25 = scalar_lea.vmem %s6870_s7, %s5716_s14 }
0x10d8   : > { %v4605_v48 = vpop.permute.xlu2 %4604 }
0x10e0   : > { %v3753_v35 = vpop.permute.xlu2 %3752 }
0x10ef   : > { %v4593_v46 = vpop.permute.xlu1 %4592  ;;  %v4699_v47 = vpop.permute.xlu0 %4698 }
0x10f7   : > { %v4595_v49 = vpop.permute.xlu1 %4594  ;;  %v6645_v51 = vpop.permute.xlu0 %4857 }
0x10f8   : > { %v4596_v52 = vsel %vm366_vm2, %v4593_v46, %v4595_v49  ;;  %v4597_v53 = vsel %vm366_vm2, %v4595_v49, %v4593_v46  ;;  %vm3901_vm2 = vcmp.eq.f32.partialorder %v6573_v7, inf }
0x10f9   : > { %v4600_v59 = vmul.f32 %v4597_v53, %v5779_v14  ;;  %v4601_v36 = vmul.f32 %v4596_v52, %v5781_v15  ;;  %v3754_v14 = vsel %vm382_vm1, %v3751_v44, %v3753_v35  ;;  %v3755_v15 = vsel %vm382_vm1, %v3753_v35, %v3751_v44 }
0x10fa   : > { %v3756_v9 = vmul.f32 %v3755_v15, %v5771_v11  ;;  %v3757_v10 = vmul.f32 %v3754_v14, %v5776_v13 }
0x10fb   : > { %4673 = vmatpush.msra.mxu2 %v4600_v59  ;;  %4693 = vmatpush.msra.mxu3 %v4601_v36 }
0x10fc   : > { %5430 = vmatmul.msk.f32.vlgmr.msra.gmra.mxu2 %vm394_vm3, %v4599_v8  ;;  %5431 = vmatmul.msk.f32.vlgmr.msra.gmra.mxu3 %vm394_vm3, %v4599_v8  ;;  %v3758_v27 = vadd.f32 %v3756_v9, %v6579_v42  ;;  %v3759_v28 = vadd.f32 %v3757_v10, %v6581_v43 }
0x10ff   : > { %v4603_v60 = vpop.permute.xlu1 %4602  ;;  %v6653_v0 = vpop.permute.xlu0 %4914 }
0x1100   : > { %v4606_v1 = vsel %vm382_vm1, %v4603_v60, %v4605_v48  ;;  %v4607_v63 = vsel %vm382_vm1, %v4605_v48, %v4603_v60 }
0x1101   : > { %v4610_v2 = vmul.f32 %v4607_v63, %v5771_v11  ;;  %v4611_v3 = vmul.f32 %v4606_v1, %v5776_v13 }
0x1103   : > { %4630 = vmatpush.msra.mxu0 %v4610_v2  ;;  %4650 = vmatpush.msra.mxu1 %v4611_v3  ;;  %v4760_v3 = vld [vmem:[#allocation2 + $0x210] sm:$0xff] }
0x1104   : > { %5428 = vmatmul.msk.f32.vlgmr.msra.gmra.mxu0 %vm394_vm3, %v4609_v4  ;;  %5429 = vmatmul.msk.f32.vlgmr.msra.gmra.mxu1 %vm394_vm3, %v4609_v4 }
0x1107   : > { %v3761_v20 = vpop.permute.xlu1 %3760  ;;  %v3763_v45 = vpop.permute.xlu0 %3762 }
0x1108   : > { %v3764_v24 = vsel %vm789_vm7, %v3761_v20, %v3763_v45  ;;  %v3765_v12 = vsel %vm789_vm7, %v3763_v45, %v3761_v20 }
0x1109   : > { %v3766_v29 = vmul.f32 %v3764_v24, %v5878_v18  ;;  %v3767_v30 = vmul.f32 %v3765_v12, %v5880_v19 }
0x110b   : > { %v3768_v31 = vadd.f32 %v3766_v29, %v3758_v27  ;;  %v3769_v32 = vadd.f32 %v3767_v30, %v3759_v28  ;;  %v4864_v29 = vld [vmem:[#allocation2 + $0x220] sm:$0xff]  ;;  %v5655_v30 = vmov 2  }
0x110d   : > { %v3770_v21 = vmul.f32 0.11111111, %v3768_v31  ;;  %v3771_v39 = vmul.f32 0.11111111, %v3769_v32  ;;  %v4919_v31 = vld [vmem:[#allocation2 + $0x228] sm:$0xff]  ;;  %v4974_v32 = vld [vmem:[#allocation2 + $0x230] sm:$0xff] }
0x110f   : > { %v3772_v44 = vsub.f32 %v6445_v25, %v3770_v21  ;;  %v4701_v46 = vpop.permute.xlu1 %4700  ;;  %v3773_v48 = vsub.f32 %v6448_v26, %v3771_v39  ;;  %v4810_v25 = vmul.f32 %v6603_v61, %v5791_v22  ;;  %v4705_v26 = vld [vmem:[#allocation2 + $0x208] sm:$0xff]  ;;  %v6706_v22 = vld [vmem:[%s6868_s5] sm:$0xf]  ;;  %v4809_v61 = vld [vmem:[#allocation2 + $0x218] sm:$0xff] }
0x1110   : > { %v4702_v49 = vsel %vm485_vm0, %v4699_v47, %v4701_v46  ;;  %v4703_v42 = vsel %vm485_vm0, %v4701_v46, %v4699_v47  ;;  %vm3889_vm0 = vcmp.eq.f32.partialorder %v6571_v5, inf }
0x1111   : > { %v4706_v43 = vmul.f32 %v4703_v42, %v5783_v16  ;;  %v4707_v52 = vmul.f32 %v4702_v49, %v5785_v17  ;;  %v6687_v53 = vmul.f32 %v3773_v48, %v3773_v48  ;;  %v6689_v55 = vmul.f32 %v3772_v44, %v3772_v44 }
0x1112   : > { %v4811_v16 = vmul.f32 %v6605_v62, %v5793_v23  ;;  %v4860_v23 = vpop.permute.xlu2 %4859 }
0x1113   : > { %4726 = vmatpush.msrb.mxu0 %v4706_v43  ;;  %4746 = vmatpush.msrb.mxu1 %v4707_v52  ;;  %v4861_v62 = vsel %vm665_vm6, %v6645_v51, %v4860_v23  ;;  %v4862_v47 = vsel %vm665_vm6, %v4860_v23, %v6645_v51 }
0x1114   : > { %3778 = vrot.lane.b32.xlu2 %v6687_v53, %s5647_s21  ;;  %3786 = vrot.lane.b32.xlu1 %v6689_v55, %s5648_s22  ;;  %v4865_v63 = vmul.f32 %v4861_v62, %v5851_v57  ;;  %v4866_v2 = vmul.f32 %v4862_v47, %v5853_v58 }
0x1115   : > { %3776 = vrot.lane.b32.xlu0 %v6689_v55, %s5647_s21  ;;  %4830 = vmatpush.msra.mxu0 %v4810_v25 }
0x1116   : > { %4850 = vmatpush.msra.mxu1 %v4811_v16  ;;  %5432 = vmatmul.msk.f32.vlgmr.msrb.gmra.mxu0 %vm394_vm3, %v4705_v26 }
0x1117   : > { %v4754_v17 = vpop.permute.xlu1 %4753  ;;  %5433 = vmatmul.msk.f32.vlgmr.msrb.gmra.mxu1 %vm394_vm3, %v4705_v26 }
0x111a   : > { %v4968_v9 = vpop.permute.xlu2 %4967 }
0x111c   : > { %3970 = vperm.xlu2 %5489, %v6706_v22   ;;  %4029 = vperm.xlu1 %5490, %v6706_v22  }
0x111d   : > { %3788 = vrot.lane.b32.xlu0 %v6687_v53, %s5648_s22 }
0x111e   : > { %5436 = vmatmul.msk.f32.vlgmr.msra.gmra.mxu0 %vm394_vm3, %v4809_v61 }
0x111f   : > { %v4756_v59 = vpop.permute.xlu1 %4755  ;;  %5437 = vmatmul.msk.f32.vlgmr.msra.gmra.mxu1 %vm394_vm3, %v4809_v61 }
0x1120   : > { %v4757_v36 = vsel %vm548_vm4, %v4754_v17, %v4756_v59  ;;  %v4758_v35 = vsel %vm548_vm4, %v4756_v59, %v4754_v17 }
0x1121   : > { %v4761_v60 = vmul.f32 %v4758_v35, %v5819_v40  ;;  %v4762_v1 = vmul.f32 %v4757_v36, %v5821_v41 }
0x1123   : > { %4781 = vmatpush.msrb.mxu2 %v4761_v60  ;;  %4801 = vmatpush.msrb.mxu3 %v4762_v1 }
0x1124   : > { %5434 = vmatmul.msk.f32.vlgmr.msrb.gmra.mxu2 %vm394_vm3, %v4760_v3  ;;  %5435 = vmatmul.msk.f32.vlgmr.msrb.gmra.mxu3 %vm394_vm3, %v4760_v3  ;;  %v3892_v3 = vand.u32 2147483648, %v6571_v5 }
0x1125   : > { %4885 = vmatpush.msra.mxu2 %v4865_v63  ;;  %4905 = vmatpush.msra.mxu3 %v4866_v2 }
0x1126   : > { %5492 = vset.pattern.permute.xlu1 %v5652_v50  ;;  %5491 = vset.pattern.permute.xlu2 %v5655_v30 }
0x1127   : > { %v4913_v51 = vpop.permute.xlu1 %4912 }
0x1128   : > { %v4916_v4 = vsel %vm726_vm5, %v4913_v51, %v6653_v0  ;;  %v4917_v14 = vsel %vm726_vm5, %v6653_v0, %v4913_v51  ;;  %v5023_v0 = vpop.permute.xlu2 %5022 }
0x1129   : > { %v4920_v15 = vmul.f32 %v4916_v4, %v5844_v54  ;;  %v4921_v8 = vmul.f32 %v4917_v14, %v5848_v56  ;;  %v5656_v4 = vmov 8.0   ;;  %v3904_v14 = vand.u32 2147483648, %v6573_v7 }
0x112a   : > { %5569 = vrcp.f32 %v5656_v4 }
0x112b   : > { %4940 = vmatpush.msrb.mxu0 %v4920_v15  ;;  %4960 = vmatpush.msrb.mxu1 %v4921_v8 }
0x112c   : > { %5438 = vmatmul.msk.f32.vlgmr.msra.gmra.mxu2 %vm394_vm3, %v4864_v29  ;;  %5439 = vmatmul.msk.f32.vlgmr.msra.gmra.mxu3 %vm394_vm3, %v4864_v29 }
0x112d   : > { %5440 = vmatmul.msk.f32.vlgmr.msrb.gmra.mxu0 %vm394_vm3, %v4919_v31  ;;  %5441 = vmatmul.msk.f32.vlgmr.msrb.gmra.mxu1 %vm394_vm3, %v4919_v31 }
0x112f   : > { %v4970_v10 = vpop.permute.xlu1 %4969 }
0x1130   : > { %v4971_v50 = vsel %vm789_vm7, %v4968_v9, %v4970_v10  ;;  %v4972_v20 = vsel %vm789_vm7, %v4970_v10, %v4968_v9 }
0x1131   : > { %v4975_v45 = vmul.f32 %v4971_v50, %v5878_v18  ;;  %v4976_v24 = vmul.f32 %v4972_v20, %v5880_v19 }
0x1133   : > { %4995 = vmatpush.msrb.mxu2 %v4975_v45  ;;  %5015 = vmatpush.msrb.mxu3 %v4976_v24 }
0x1134   : > { %5442 = vmatmul.msk.f32.vlgmr.msrb.gmra.mxu2 %vm394_vm3, %v4974_v32  ;;  %5443 = vmatmul.msk.f32.vlgmr.msrb.gmra.mxu3 %vm394_vm3, %v4974_v32 }
0x1137   : > { %v5025_v54 = vpop.permute.xlu1 %5024 }
0x1138   : > { %v5026_v56 = vsel %vm850_vm8, %v5023_v0, %v5025_v54  ;;  %v5027_v12 = vsel %vm850_vm8, %v5025_v54, %v5023_v0 }
0x1139   : > { %v5030_v27 = vmul.f32 %v5026_v56, %v5899_v33  ;;  %v5031_v28 = vmul.f32 %v5027_v12, %v5901_v34  ;;  %v5029_v33 = vld [vmem:[#allocation2 + $0x238] sm:$0xff] }
0x113b   : > { %5050 = vmatpush.msra.mxu0 %v5030_v27  ;;  %5070 = vmatpush.msra.mxu1 %v5031_v28 }
0x113c   : > { %5444 = vmatmul.msk.f32.vlgmr.msra.gmra.mxu0 %vm394_vm3, %v5029_v33  ;;  %5445 = vmatmul.msk.f32.vlgmr.msra.gmra.mxu1 %vm394_vm3, %v5029_v33  ;;  %vm3891_vm3 = vcmp.eq.f32.partialorder %v6571_v5, 0.0 }
0x116e   : > { %v3779_v21 = vpop.permute.xlu2 %3778 }
0x1176   : > { %v3971_v29 = vpop.permute.xlu2 %3970 }
0x1177   : > { %v4014_v32 = vadd.f32 %v6597_v38, %v3971_v29 }
0x1186   : > { %v3787_v49 = vpop.permute.xlu1 %3786 }
0x1187   : > { %v3777_v34 = vpop.permute.xlu0 %3776 }
0x1188   : > { %v3780_v39 = vsel %vm548_vm4, %v3777_v34, %v3779_v21  ;;  %v3781_v44 = vsel %vm548_vm4, %v3779_v21, %v3777_v34  ;;  %vm3903_vm4 = vcmp.eq.f32.partialorder %v6573_v7, 0.0 }
0x1189   : > { %v3782_v46 = vmul.f32 %v3781_v44, %v5819_v40  ;;  %v3783_v48 = vmul.f32 %v3780_v39, %v5821_v41  ;;  %v4017_v44 = vsub.f32 0.0, %v4014_v32 }
0x118b   : > { %v3784_v25 = vadd.f32 %v3782_v46, %v6689_v55  ;;  %v3785_v26 = vadd.f32 %v3783_v48, %v6687_v53 }
0x118f   : > { %v3789_v42 = vpop.permute.xlu0 %3788 }
0x1190   : > { %v3790_v43 = vsel %vm665_vm6, %v3787_v49, %v3789_v42  ;;  %v3791_v52 = vsel %vm665_vm6, %v3789_v42, %v3787_v49  ;;  %v4020_v42 = vmul.f32 1.442695, %v4017_v44  ;;  %vm4034_vm6 = vcmask 1043456  }
0x1191   : > { %v3792_v16 = vmul.f32 %v3790_v43, %v5851_v57  ;;  %v3793_v17 = vmul.f32 %v3791_v52, %v5853_v58  ;;  %v5566_v57 = vpop.eup %5565  ;;  %v5446_v58 = vld [vmem:[%s6866_s3 + $0xa8] sm:$0xff] }
0x1192   : > { %v5568_v53 = vpop.eup %5567  ;;  %v3883_v55 = vmul.f32 %v5566_v57, %v6571_v5 }
0x1193   : > { %v6774_v40 = vadd.f32 %v3792_v16, %v3784_v25  ;;  %v6776_v41 = vadd.f32 %v3793_v17, %v3785_v26  ;;  %v3895_v61 = vmul.f32 %v5568_v53, %v6573_v7  ;;  %v5570_v50 = vpop.eup %5569 }
0x1194   : > { %v3884_v23 = vmul.f32 %v5566_v57, %v3883_v55  ;;  %v3831_v45 = vmul.f32 8.0, %v5570_v50  ;;  %vm3835_vm5 = vweird.f32 %v5570_v50 }
0x1195   : > { %3798 = vrot.lane.b32.xlu2 %v6776_v41, %s5644_s18  ;;  %3806 = vrot.lane.b32.xlu1 %v6774_v40, %s5650_s24  ;;  %v3896_v62 = vmul.f32 %v5568_v53, %v3895_v61 }
0x1196   : > { %3796 = vrot.lane.b32.xlu0 %v6774_v40, %s5644_s18  ;;  %v3885_v47 = vmul.f32 0.5, %v3884_v23  ;;  %v3832_v54 = vsub.f32 1.0, %v3831_v45  ;;  %s5452_s18 = sshll.u32 %s6873_s9, 3 }
0x1197   : > { %v3897_v59 = vmul.f32 0.5, %v3896_v62  ;;  %s347_s9 = scalar_lea.vmem %s6871_s8, %s5452_s18 }
0x1198   : > { %v3886_v36 = vsub.f32 1.5, %v3885_v47  ;;  %v3833_v27 = vmul.f32 %v5570_v50, %v3832_v54 }
0x1199   : > { %v3898_v35 = vsub.f32 1.5, %v3897_v59 }
0x119a   : > { %v3887_v60 = vmul.f32 %v5566_v57, %v3886_v36  ;;  %v3834_v30 = vadd.f32 %v5570_v50, %v3833_v27 }
0x119b   : > { %v3899_v1 = vmul.f32 %v5568_v53, %v3898_v35 }
0x119c   : > { %v3888_v63 = vmul.f32 %v3887_v60, %v6571_v5  ;;  %v6805_v34 = vsel %vm3835_vm5, %v5570_v50, %v3834_v30 }
0x119d   : > { %4050 = vperm.xlu2 %5491, %v6706_v22   ;;  %5081 = vperm.xlu1 %5492, %v5446_v58   ;;  %v3900_v2 = vmul.f32 %v3899_v1, %v6573_v7 }
0x119e   : > { %3808 = vrot.lane.b32.xlu0 %v6776_v41, %s5650_s24  ;;  %v3890_v22 = vsel %vm3889_vm0, %v6571_v5, %v3888_v63 }
0x119f   : > { %v3902_v51 = vsel %vm3901_vm2, %v6573_v7, %v3900_v2  ;;  %v3893_v15 = vsel %vm3891_vm3, %v3892_v3, %v3890_v22  ;;  %v3994_v7 = vadd.f32 %v6595_v37, %v3971_v29  ;;  %v4030_v2 = vpop.permute.xlu1 %4029 }
0x11a0   : > { %v3905_v8 = vsel %vm3903_vm4, %v3904_v14, %v3902_v51  ;;  %v3906_v9 = vrot.slane %v3893_v15, 4 }
0x11a1   : > { %v3912_v10 = vrot.slane %v3905_v8, 4  ;;  %v4016_v39 = vsub.f32 0.0, %v3994_v7 }
0x11a2   : > { %v3907_v20 = vadd.f32 %v3906_v9, %v3893_v15 }
0x11a3   : > { %v3913_v24 = vadd.f32 %v3912_v10, %v3905_v8  ;;  %v4018_v49 = vmul.f32 1.442695, %v4016_v39 }
0x11a4   : > { %v3908_v0 = vrot.slane %v3907_v20, 2 }
0x11a5   : > { %v3914_v56 = vrot.slane %v3913_v24, 2  ;;  %5571 = vpow2.f32 %v4018_v49 }
0x11a6   : > { %v3909_v12 = vadd.f32 %v3908_v0, %v3907_v20  ;;  %5573 = vpow2.f32 %v4020_v42 }
0x11a7   : > { %v3915_v28 = vadd.f32 %v3914_v56, %v3913_v24 }
0x11a8   : > { %v3910_v5 = vrot.slane %v3909_v12, 1 }
0x11a9   : > { %v3916_v31 = vrot.slane %v3915_v28, 1 }
0x11aa   : > { %v3911_v33 = vadd.f32 %v3910_v5, %v3909_v12 }
0x11ab   : > { %v3917_v21 = vadd.f32 %v3916_v31, %v3915_v28  ;;  %v5572_v38 = vpop.eup %5571  ;;  %v4632_v31 = vpop.f32.mrf.mxu0 }
0x11ac   : > { %v3918_v46 = vmul.f32 %v3911_v33, %v6805_v34  ;;  %v5574_v17 = vpop.eup %5573  ;;  %v4022_v57 = vadd.f32 1.0, %v5572_v38  ;;  %v4652_v33 = vpop.f32.mrf.mxu1 }
0x11ad   : > { %v3919_v48 = vmul.f32 %v3917_v21, %v6805_v34  ;;  %v4023_v58 = vadd.f32 1.0, %v5574_v17  ;;  %v4695_v38 = vpop.f32.mrf.mxu3 }
0x11ae   : > { %v3920_v43 = vsub.f32 %v3893_v15, %v3918_v46  ;;  %5575 = vrcp.f32 %v4022_v57 }
0x11af   : > { %v3921_v52 = vsub.f32 %v3905_v8, %v3919_v48  ;;  %5577 = vrcp.f32 %v4023_v58 }
0x11b0   : > { %v3922_v25 = vmul.f32 %v3920_v43, %v3920_v43 }
0x11b1   : > { %v3923_v37 = vmul.f32 %v3921_v52, %v3921_v52 }
0x11b2   : > { %v3924_v26 = vrot.slane %v3922_v25, 4 }
0x11b3   : > { %v3930_v16 = vrot.slane %v3923_v37, 4 }
0x11b4   : > { %v3925_v53 = vadd.f32 %v3924_v26, %v3922_v25  ;;  %v5576_v59 = vpop.eup %5575  ;;  %v4675_v25 = vpop.f32.mrf.mxu2 }
0x11b5   : > { %v3931_v55 = vadd.f32 %v3930_v16, %v3923_v37  ;;  %v5578_v36 = vpop.eup %5577  ;;  %v4026_v1 = vmul.f32 %v5576_v59, %v3994_v7  ;;  %v4728_v59 = vpop.f32.mrf.mxu0  ;;  %v4676_v6 = vadd.f32 %v4675_v25, %v4632_v31 }
0x11b6   : > { %v3926_v61 = vrot.slane %v3925_v53, 2  ;;  %v4027_v63 = vmul.f32 %v5578_v36, %v4014_v32  ;;  %v4748_v36 = vpop.f32.mrf.mxu1 }
0x11b7   : > { %v3932_v23 = vrot.slane %v3931_v55, 2  ;;  %v4032_v51 = vmul.f32 %v4030_v2, %v4026_v1 }
0x11b8   : > { %v3927_v62 = vadd.f32 %v3926_v61, %v3925_v53  ;;  %v4033_v4 = vmul.f32 %v4030_v2, %v4027_v63 }
0x11b9   : > { %v3933_v47 = vadd.f32 %v3932_v23, %v3931_v55  ;;  %v4035_v8 = vsel %vm4034_vm6, %v4032_v51, 0.0 }
0x11ba   : > { %v3928_v35 = vrot.slane %v3927_v62, 1  ;;  %v4042_v9 = vsel %vm4034_vm6, %v4033_v4, 0.0  ;;  %v4036_v10 = vrot.slane %v4035_v8, 4  ;;  %v4696_v4 = vadd.f32 %v4695_v38, %v4652_v33 }
0x11bb   : > { %v3934_v60 = vrot.slane %v3933_v47, 1  ;;  %v4043_v50 = vrot.slane %v4042_v9, 4 }
0x11bc   : > { %v3929_v22 = vadd.f32 %v3928_v35, %v3927_v62  ;;  %v4037_v20 = vadd.f32 %v4036_v10, %v4035_v8  ;;  %v4803_v10 = vpop.f32.mrf.mxu3 }
0x11bd   : > { %v3935_v3 = vadd.f32 %v3934_v60, %v3933_v47  ;;  %v4044_v45 = vadd.f32 %v4043_v50, %v4042_v9  ;;  %v4783_v9 = vpop.f32.mrf.mxu2 }
0x11be   : > { %v6809_v14 = vmul.f32 0.14285715, %v3929_v22  ;;  %v4038_v54 = vrot.slane %v4037_v20, 2 }
0x11bf   : > { %v6811_v15 = vmul.f32 0.14285715, %v3935_v3  ;;  %v4045_v56 = vrot.slane %v4044_v45, 2 }
0x11c0   : > { %5579 = vrsqrt.f32 %v6809_v14  ;;  %v4039_v29 = vadd.f32 %v4038_v54, %v4037_v20  ;;  %vm3947_vm8 = vcmp.eq.f32.partialorder %v6809_v14, 0.0 }
0x11c1   : > { %5581 = vrsqrt.f32 %v6811_v15  ;;  %v4046_v5 = vadd.f32 %v4045_v56, %v4044_v45  ;;  %v4752_v56 = vadd.f32 %v4748_v36, %v4696_v4  ;;  %vm3959_vm10 = vcmp.eq.f32.partialorder %v6811_v15, 0.0 }
0x11c2   : > { %v4040_v21 = vrot.slane %v4039_v29, 1 }
0x11c3   : > { %v4047_v39 = vrot.slane %v4046_v5, 1 }
0x11c4   : > { %v4041_v37 = vadd.f32 %v4040_v21, %v4039_v29  ;;  %v3948_v29 = vand.u32 2147483648, %v6809_v14  ;;  %v4907_v25 = vpop.f32.mrf.mxu3 }
0x11c5   : > { %v4048_v26 = vadd.f32 %v4047_v39, %v4046_v5 }
0x11c6   : > { %v5580_v24 = vpop.eup %5579 }
0x11c7   : > { %v5582_v0 = vpop.eup %5581  ;;  %v3939_v27 = vmul.f32 %v5580_v24, %v6809_v14 }
0x11c8   : > { %v3951_v28 = vmul.f32 %v5582_v0, %v6811_v15 }
0x11c9   : > { %v3940_v7 = vmul.f32 %v5580_v24, %v3939_v27 }
0x11ca   : > { %v3952_v32 = vmul.f32 %v5582_v0, %v3951_v28  ;;  %v4852_v28 = vpop.f32.mrf.mxu1 }
0x11cb   : > { %v3941_v48 = vmul.f32 0.5, %v3940_v7  ;;  %v3960_v7 = vand.u32 2147483648, %v6811_v15 }
0x11cc   : > { %v3953_v49 = vmul.f32 0.5, %v3952_v32  ;;  %v5017_v36 = vpop.f32.mrf.mxu3 }
0x11cd   : > { %v3942_v57 = vsub.f32 1.5, %v3941_v48 }
0x11ce   : > { %v3954_v53 = vsub.f32 1.5, %v3953_v49 }
0x11cf   : > { %v3943_v1 = vmul.f32 %v5580_v24, %v3942_v57  ;;  %v4751_v24 = vadd.f32 %v4728_v59, %v4676_v6 }
0x11d0   : > { %v3955_v2 = vmul.f32 %v5582_v0, %v3954_v53 }
0x11d1   : > { %v4806_v32 = vadd.f32 %v4783_v9, %v4751_v24 }
0x11ef   : > { %v3799_v12 = vpop.permute.xlu2 %3798 }
0x11f7   : > { %v4051_v42 = vpop.permute.xlu2 %4050 }
0x11f8   : > { %v4053_v58 = vadd.f32 %v4051_v42, %v4041_v37  ;;  %v4054_v55 = vadd.f32 %v4051_v42, %v4048_v26  ;;  %v4887_v42 = vpop.f32.mrf.mxu2 }
0x11fa   : > { %v4055_v63 = vsub.f32 0.0, %v4053_v58  ;;  %v4056_v22 = vsub.f32 0.0, %v4054_v55 }
0x11fc   : > { %v4059_v50 = vmul.f32 1.442695, %v4056_v22 }
0x1200   : > { %v4997_v59 = vpop.f32.mrf.mxu2 }
0x1207   : > { %v3807_v16 = vpop.permute.xlu1 %3806 }
0x1208   : > { %v3797_v30 = vpop.permute.xlu0 %3796 }
0x1209   : > { %v3800_v44 = vsel %vm382_vm1, %v3797_v30, %v3799_v12  ;;  %v3801_v46 = vsel %vm382_vm1, %v3799_v12, %v3797_v30  ;;  %vm3945_vm1 = vcmp.eq.f32.partialorder %v6809_v14, inf  ;;  %v4832_v12 = vpop.f32.mrf.mxu0 }
0x120a   : > { %v3802_v43 = vmul.f32 %v3801_v46, %v5771_v11  ;;  %v3803_v52 = vmul.f32 %v3800_v44, %v5776_v13  ;;  %v4807_v44 = vadd.f32 %v4803_v10, %v4752_v56 }
0x120c   : > { %v3804_v11 = vadd.f32 %v3802_v43, %v6774_v40  ;;  %v3805_v13 = vadd.f32 %v3803_v52, %v6776_v41  ;;  %v3944_v41 = vmul.f32 %v3943_v1, %v6809_v14  ;;  %v4855_v52 = vadd.f32 %v4832_v12, %v4806_v32 }
0x120e   : > { %v3946_v27 = vsel %vm3945_vm1, %v6809_v14, %v3944_v41 }
0x120f   : > { %v3949_v33 = vsel %vm3947_vm8, %v3948_v29, %v3946_v27  ;;  %v5082_v10 = vpop.permute.xlu1 %5081 }
0x1210   : > { %v3809_v17 = vpop.permute.xlu0 %3808  ;;  %v3962_v43 = vadd.f32 1.0, %v3949_v33 }
0x1211   : > { %v3810_v61 = vsel %vm789_vm7, %v3807_v16, %v3809_v17  ;;  %v3811_v23 = vsel %vm789_vm7, %v3809_v17, %v3807_v16  ;;  %vm3957_vm7 = vcmp.eq.f32.partialorder %v6811_v15, inf  ;;  %v4856_v17 = vadd.f32 %v4852_v28, %v4807_v44  ;;  %v4942_v58 = vpop.f32.mrf.mxu0 }
0x1212   : > { %v3812_v62 = vmul.f32 %v3810_v61, %v5878_v18  ;;  %v3813_v47 = vmul.f32 %v3811_v23, %v5880_v19  ;;  %v4057_v18 = vmul.f32 1.442695, %v4055_v63  ;;  %v3956_v19 = vmul.f32 %v3955_v2, %v6811_v15  ;;  %v4962_v23 = vpop.f32.mrf.mxu1 }
0x1213   : > { %v4910_v61 = vadd.f32 %v4887_v42, %v4855_v52 }
0x1214   : > { %v3814_v35 = vadd.f32 %v3812_v62, %v3804_v11  ;;  %v3815_v60 = vadd.f32 %v3813_v47, %v3805_v13  ;;  %5583 = vpow2.f32 %v4057_v18  ;;  %v3958_v5 = vsel %vm3957_vm7, %v6811_v15, %v3956_v19 }
0x1215   : > { %5585 = vpow2.f32 %v4059_v50  ;;  %v3961_v46 = vsel %vm3959_vm10, %v3960_v7, %v3958_v5  ;;  %v4911_v11 = vadd.f32 %v4907_v25, %v4856_v17  ;;  %v4965_v13 = vadd.f32 %v4942_v58, %v4910_v61 }
0x1216   : > { %v3816_v3 = vmul.f32 0.11111111, %v3814_v35  ;;  %v3817_v51 = vmul.f32 0.11111111, %v3815_v60  ;;  %v3963_v37 = vadd.f32 1.0, %v3961_v46  ;;  %5587 = vrcp.f32 %v3962_v43 }
0x1217   : > { %v4966_v47 = vadd.f32 %v4962_v23, %v4911_v11  ;;  %v5020_v1 = vadd.f32 %v4997_v59, %v4965_v13 }
0x1218   : > { %v3818_v8 = vrot.slane %v3816_v3, 4  ;;  %v3824_v40 = vrot.slane %v3817_v51, 4  ;;  %5589 = vrcp.f32 %v3963_v37 }
0x1219   : > { %v5021_v22 = vadd.f32 %v5017_v36, %v4966_v47 }
0x121a   : > { %v3819_v20 = vadd.f32 %v3818_v8, %v3816_v3  ;;  %v3825_v45 = vadd.f32 %v3824_v40, %v3817_v51  ;;  %v5584_v14 = vpop.eup %5583  ;;  %v5052_v3 = vpop.f32.mrf.mxu0 }
0x121b   : > { %v5586_v26 = vpop.eup %5585  ;;  %v4061_v57 = vadd.f32 1.0, %v5584_v14  ;;  %v5072_v4 = vpop.f32.mrf.mxu1  ;;  %v5075_v9 = vadd.f32 %v5052_v3, %v5020_v1 }
0x121c   : > { %v3820_v0 = vrot.slane %v3819_v20, 2  ;;  %v3826_v54 = vrot.slane %v3825_v45, 2  ;;  %v4062_v55 = vadd.f32 1.0, %v5586_v26  ;;  %v5588_v62 = vpop.eup %5587  ;;  %v5076_v18 = vadd.f32 %v5072_v4, %v5021_v22 }
0x121d   : > { %v5084_v27 = vadd.f32 %v5082_v10, %v5075_v9 }
0x121e   : > { %v3821_v30 = vadd.f32 %v3820_v0, %v3819_v20  ;;  %v3827_v31 = vadd.f32 %v3826_v54, %v3825_v45  ;;  %v5085_v5 = vadd.f32 %v5082_v10, %v5076_v18 }
0x1220   : > { %v3822_v21 = vrot.slane %v3821_v30, 1  ;;  %v3828_v39 = vrot.slane %v3827_v31, 1 }
0x1222   : > { %v3823_v48 = vadd.f32 %v3822_v21, %v3821_v30  ;;  %v3829_v49 = vadd.f32 %v3828_v39, %v3827_v31 }
0x1224   : > { %v3837_v38 = vmul.f32 %v6805_v34, %v3823_v48  ;;  %v3838_v16 = vmul.f32 %v6805_v34, %v3829_v49  ;;  %v5590_v34 = vpop.eup %5589 }
0x1226   : > { %v3839_v15 = vadd.f32 1.0, %v3837_v38  ;;  %v3840_v53 = vadd.f32 1.0, %v3838_v16 }
0x1228   : > { %5591 = vrcp.f32 %v3839_v15 }
0x1229   : > { %5593 = vrcp.f32 %v3840_v53 }
0x122a   : > { %5595 = vrcp.f32 %v4061_v57 }
0x122b   : > { %5597 = vrcp.f32 %v4062_v55 }
0x122e   : > { %v5592_v35 = vpop.eup %5591 }
0x122f   : > { %v5594_v60 = vpop.eup %5593  ;;  %v4065_v63 = vadd.f32 %v5592_v35, %v5588_v62  ;;  %v5109_v56 = vsel %vm5108_vm11, %v5592_v35, %v5588_v62 }
0x1230   : > { %v5596_v2 = vpop.eup %5595  ;;  %v4066_v51 = vadd.f32 %v5594_v60, %v5590_v34  ;;  %v5110_v50 = vsel %vm5108_vm11, %v5594_v60, %v5590_v34 }
0x1231   : > { %v5598_v6 = vpop.eup %5597  ;;  %v4067_v8 = vadd.f32 %v5596_v2, %v4065_v63  ;;  %v5098_v12 = vrot.slane %v5596_v2, 6 }
0x1232   : > { %v4068_v40 = vadd.f32 %v5598_v6, %v4066_v51  ;;  %v5099_v20 = vrot.slane %v5598_v6, 6 }
0x1233   : > { %v4069_v41 = vmul.f32 0.33333334, %v4067_v8  ;;  %v5112_v32 = vsel %vm5111_vm12, %v5109_v56, %v5098_v12 }
0x1234   : > { %v4070_v19 = vmul.f32 0.33333334, %v4068_v40  ;;  %v5113_v29 = vsel %vm5111_vm12, %v5110_v50, %v5099_v20 }
0x1235   : > { %v5086_v45 = vsub.f32 1.0, %v4069_v41  ;;  %v5104_v0 = vrot.slane %v4069_v41, 5 }
0x1236   : > { %v5087_v24 = vsub.f32 1.0, %v4070_v19  ;;  %v5105_v54 = vrot.slane %v4070_v19, 5 }
0x1237   : > { %v5088_v28 = vperm.slane %v5086_v45, 0  ;;  %v5115_v39 = vsel %vm5114_vm13, %v5112_v32, %v5104_v0 }
0x1238   : > { %v5089_v30 = vperm.slane %v5087_v24, 0  ;;  %v5116_v31 = vsel %vm5114_vm13, %v5113_v29, %v5105_v54 }
0x1239   : > { %v5090_v7 = vmul.f32 %v5088_v28, %v5084_v27  ;;  %v5119_v33 = vrot.slane %v5116_v31, 4 }
0x123a   : > { %v5091_v21 = vmul.f32 %v5089_v30, %v5085_v5 }
0x123b   : > { %5094 = vst [vmem:[%s342_s25] sm:$0xff] %v5090_v7  ;;  %v5120_v44 = vsel %vm4034_vm6, %v5115_v39, %v5119_v33 }
0x123c   : > { %5095 = vst [vmem:[%s342_s25 + $0x8] sm:$0xff] %v5091_v21 }
0x123d   : > { %5122 = vst [vmem:[%s347_s9] sm:$0xff] %v5120_v44 }
0x123e PF: > { %s20_s27 = sadd.s32 1, %s5639_s27  }
0x123f   : > { %p17_p7 = scmp.ge.s32.totalorder %s20_s27, 4  }
0x1241   :  { %19 = sbr.rel (!%p17_p7) target bundleno = 1 (0x1), region = 204 }
0x1246   :  { %5176 = vsyncpa [#allocation3], 1 }
0x1247   :  { %5178 = vsyncpa [#allocation3 + $0x1], 1 }

</bundles_post_ra>
